<compile_context>
chip_gen: v6e
topology: v6e:2x2x1
jax: 0.10.0
libtpu: 0.0.40
codegen_flags: <defaults>
</compile_context>

<pallas_src>
import functools

import jax
import jax.numpy as jnp
from jax.experimental import pallas as pl
from jax.experimental.pallas import tpu as pltpu


def down_kernel(x_ref, w_ref, o_ref, xpad_ref, *, bn, cin, cout, hh, ww, hp, wp):
    """Process `bn` batch elements (channels-last).

    x_ref   : VMEM (bn, hh, ww, cin)        bf16 -- unpadded input tile
    w_ref   : VMEM (9*cin, cout)            bf16 -- conv weights, tap-major rows
    o_ref   : VMEM (bn, hp, 1, wp*cout)     f32  -- pooled output, lane-dense
    xpad_ref: VMEM (bn, hh+2, ww+2, cin)    bf16 -- scratch with 1-pixel zero halo
    """
    m = bn * hh * ww

    # ---- halo-only zeroing (interior is fully overwritten every step) ------------
    zrow = jnp.zeros((bn, 1, ww + 2, cin), xpad_ref.dtype)
    zcol = jnp.zeros((bn, hh + 2, 1, cin), xpad_ref.dtype)
    xpad_ref[:, 0:1, :, :] = zrow
    xpad_ref[:, hh + 1:hh + 2, :, :] = zrow
    xpad_ref[:, :, 0:1, :] = zcol
    xpad_ref[:, :, ww + 1:ww + 2, :] = zcol
    xpad_ref[:, 1:1 + hh, 1:1 + ww, :] = x_ref[...]

    # ---- 3x3 conv as ONE MXU matmul with K = 9*cin --------------------------------
    # patches[(b,h,w), t*cin + ci] = xpad[b, h+dh, w+dw, ci],  t = dh*3 + dw
    patches = jnp.concatenate(
        [xpad_ref[:, dh:dh + hh, dw:dw + ww, :] for dh in range(3) for dw in range(3)],
        axis=-1)                                                  # (bn, hh, ww, 9*cin)
    acc = jnp.dot(patches.reshape(m, 9 * cin), w_ref[...],
                  preferred_element_type=jnp.float32)             # (m, cout) f32

    # ---- ReLU (f32, VPU) -----------------------------------------------------------
    acc = jnp.maximum(acc, 0.0)

    # ---- MaxPool2d(kernel=3, stride=3), floor mode ----------------------------------
    conv = acc.reshape(bn, hh, ww, cout)
    # Row pooling: split the (major) H axis into (hp, 3) and reduce -- pure outer
    # reindexing, no sublane/lane shuffling.
    rows = conv[:, :3 * hp, :, :].reshape(bn, hp, 3, ww, cout).max(axis=2)  # (bn,hp,ww,cout)
    # Column pooling: wp small sublane-window maxes, concatenated on the LANE axis so
    # the output block (and its HBM DMA) is lane-dense.
    bands = [rows[:, :, 3 * j:3 * j + 3, :].max(axis=2, keepdims=True) for j in range(wp)]
    o_ref[...] = jnp.concatenate(bands, axis=-1).astype(o_ref.dtype)   # (bn,hp,1,wp*cout)


def _pick_batch_block(n, est_fn, budget_bytes):
    """Largest divisor of n whose VMEM estimate fits the budget.

    Among fitting choices we prefer ones that leave >= 2 grid steps so both v7x
    TensorCores get work (on single-core v5e/v6e the extra step costs ~0.35us,
    negligible vs. the matmul)."""
    divisors = [d for d in range(1, n + 1) if n % d == 0]
    fits = [d for d in divisors if est_fn(d) <= budget_bytes]
    if not fits:
        return 1  # best effort; see TODO about H-tiling for very large shapes
    multi = [d for d in fits if n // d >= 2]
    return max(multi) if multi else max(fits)


def down_forward(x, weight, *, compute_dtype=jnp.bfloat16):
    """x: (N, Cin, H, W) float32; weight: (Cout, Cin, 3, 3) float32 (OIHW). Returns NCHW."""
    n, cin, hh, ww = x.shape
    cout = weight.shape[0]
    assert hh >= 3 and ww >= 3, "MaxPool2d(3, stride=3) needs spatial dims >= 3"
    hp = (hh - 3) // 3 + 1
    wp = (ww - 3) // 3 + 1

    # Layout plumbing (wrapper side): NCHW -> NHWC activations, OIHW -> tap-major rows.
    # TODO(synk): keep the surrounding graph NHWC to drop this extra HBM pass.
    x_nhwc = jnp.transpose(x, (0, 2, 3, 1)).astype(compute_dtype)          # (N, H, W, Cin)
    w_flat = jnp.transpose(weight, (2, 3, 1, 0)).reshape(9 * cin, cout)    # (9*Cin, Cout)
    w_flat = w_flat.astype(compute_dtype)

    in_bytes = jnp.dtype(compute_dtype).itemsize

    def est_vmem(bn):
        x_blk = 2 * bn * hh * ww * cin * in_bytes            # double-buffered input
        w_blk = 2 * 9 * cin * cout * in_bytes                 # double-buffered weights
        o_blk = 2 * bn * hp * wp * cout * 4                   # double-buffered output
        xpad = bn * (hh + 2) * (ww + 2) * cin * in_bytes      # halo scratch
        live = bn * hh * ww * (9 * cin * in_bytes + cout * 4)  # im2col + f32 acc values
        return x_blk + w_blk + o_blk + xpad + live

    # Conservative budget so the same tiling fits v7x (64 MiB VMEM) and v5e/v6e (128 MiB).
    bn = _pick_batch_block(n, est_vmem, budget_bytes=24 << 20)

    kernel = functools.partial(down_kernel, bn=bn, cin=cin, cout=cout,
                               hh=hh, ww=ww, hp=hp, wp=wp)

    flops = 2 * n * hh * ww * 9 * cin * cout
    bytes_accessed = (n * hh * ww * cin * in_bytes
                      + 9 * cin * cout * in_bytes
                      + n * hp * wp * cout * 4)

    out = pl.pallas_call(
        kernel,
        out_shape=jax.ShapeDtypeStruct((n, hp, 1, wp * cout), jnp.float32),
        grid=(n // bn,),
        in_specs=[
            pl.BlockSpec((bn, hh, ww, cin), lambda b: (b, 0, 0, 0)),   # activations
            pl.BlockSpec((9 * cin, cout), lambda b: (0, 0)),           # weights (full)
        ],
        out_specs=pl.BlockSpec((bn, hp, 1, wp * cout), lambda b: (b, 0, 0, 0)),
        scratch_shapes=[pltpu.VMEM((bn, hh + 2, ww + 2, cin), compute_dtype)],
        compiler_params=pltpu.CompilerParams(
            dimension_semantics=("parallel",),
            vmem_limit_bytes=int(min(64 << 20, max(32 << 20, 2 * est_vmem(bn)))),
        ),
        cost_estimate=pl.CostEstimate(flops=flops, transcendentals=0,
                                      bytes_accessed=bytes_accessed),
    )(x_nhwc, w_flat)

    # Lane-dense (n, hp, 1, wp*cout) -> PyTorch's NCHW.
    out = out.reshape(n, hp, wp, cout)
    return jnp.transpose(out, (0, 3, 1, 2)).astype(x.dtype)


def down_reference(x, weight):
    """Plain-JAX f32 reference matching the PyTorch forward exactly."""
    conv = jax.lax.conv_general_dilated(
        x, weight, window_strides=(1, 1), padding=((1, 1), (1, 1)),
        dimension_numbers=("NCHW", "OIHW", "NCHW"))
    act = jnp.maximum(conv, 0.0)
    return jax.lax.reduce_window(
        act, -jnp.inf, jax.lax.max,
        window_dimensions=(1, 1, 3, 3), window_strides=(1, 1, 3, 3),
        padding="VALID")


if __name__ == "__main__":
    key = jax.random.PRNGKey(0)
    k_x, k_w = jax.random.split(key)

    N, CIN, COUT, H, W = 2, 4, 8, 16, 16
    x = jax.random.normal(k_x, (N, CIN, H, W), dtype=jnp.float32)
    # nn.Conv2d(kernel_size=3, bias=False) weights, OIHW.
    weight = 0.1 * jax.random.normal(k_w, (COUT, CIN, 3, 3), dtype=jnp.float32)

    out = jax.block_until_ready(down_forward(x, weight))
    ref = jax.block_until_ready(down_reference(x, weight))

    assert out.shape == ref.shape, (out.shape, ref.shape)
    # bf16 MXU inputs (f32 accumulation) -> relaxed tolerance vs. the f32 reference.
    assert jnp.allclose(out, ref, atol=5e-2, rtol=5e-2), "mismatch vs reference"

    print("KERNEL_OK")
</pallas_src>

<mosaic_0001>
module attributes {stable_mosaic.version = 11 : i64} {
  func.func @down_kernel(%arg0: i32, %arg1: memref<1x16x16x4xbf16, #tpu.memory_space<vmem>>, %arg2: memref<36x8xbf16, #tpu.memory_space<vmem>>, %arg3: memref<1x5x1x40xf32, #tpu.memory_space<vmem>>, %arg4: memref<1x18x18x4xbf16, #tpu.memory_space<vmem>>) attributes {dimension_semantics = [#tpu.dimension_semantics<parallel>], iteration_bounds = array<i64: 2>, scalar_prefetch = 0 : i64, scratch_operands = 1 : i64, tpu.core_type = #tpu.core_type<tc>, window_params = [{transform_indices = @transform_0, window_bounds = array<i64: 1, 16, 16, 4>}, {pipeline_mode = #tpu.pipeline_mode<synchronous>, transform_indices = @transform_1, window_bounds = array<i64: 36, 8>}, {transform_indices = @transform_2, window_bounds = array<i64: 1, 5, 1, 40>}]} {
    %cst = arith.constant 0.000000e+00 : bf16
    %0 = vector.broadcast %cst : bf16 to vector<1x1x18x4xbf16>
    %cst_0 = arith.constant 0.000000e+00 : bf16
    %1 = vector.broadcast %cst_0 : bf16 to vector<1x18x1x4xbf16>
    %c0 = arith.constant 0 : index
    %c0_1 = arith.constant 0 : index
    %c0_2 = arith.constant 0 : index
    %c0_3 = arith.constant 0 : index
    %2 = vector.load %arg4[%c0, %c0_1, %c0_2, %c0_3] : memref<1x18x18x4xbf16, #tpu.memory_space<vmem>>, vector<1x1x18x4xbf16>
    tpu.vector_store %arg4[%c0, %c0_1, %c0_2, %c0_3], %0 {strides = array<i32>} : memref<1x18x18x4xbf16, #tpu.memory_space<vmem>>, vector<1x1x18x4xbf16>,
    %c0_4 = arith.constant 0 : index
    %c17 = arith.constant 17 : index
    %c0_5 = arith.constant 0 : index
    %c0_6 = arith.constant 0 : index
    %3 = vector.load %arg4[%c0_4, %c17, %c0_5, %c0_6] : memref<1x18x18x4xbf16, #tpu.memory_space<vmem>>, vector<1x1x18x4xbf16>
    tpu.vector_store %arg4[%c0_4, %c17, %c0_5, %c0_6], %0 {strides = array<i32>} : memref<1x18x18x4xbf16, #tpu.memory_space<vmem>>, vector<1x1x18x4xbf16>,
    %c0_7 = arith.constant 0 : index
    %c0_8 = arith.constant 0 : index
    %c0_9 = arith.constant 0 : index
    %c0_10 = arith.constant 0 : index
    %4 = vector.load %arg4[%c0_7, %c0_8, %c0_9, %c0_10] : memref<1x18x18x4xbf16, #tpu.memory_space<vmem>>, vector<1x18x1x4xbf16>
    tpu.vector_store %arg4[%c0_7, %c0_8, %c0_9, %c0_10], %1 {strides = array<i32>} : memref<1x18x18x4xbf16, #tpu.memory_space<vmem>>, vector<1x18x1x4xbf16>,
    %c0_11 = arith.constant 0 : index
    %c0_12 = arith.constant 0 : index
    %c17_13 = arith.constant 17 : index
    %c0_14 = arith.constant 0 : index
    %5 = vector.load %arg4[%c0_11, %c0_12, %c17_13, %c0_14] : memref<1x18x18x4xbf16, #tpu.memory_space<vmem>>, vector<1x18x1x4xbf16>
    tpu.vector_store %arg4[%c0_11, %c0_12, %c17_13, %c0_14], %1 {strides = array<i32>} : memref<1x18x18x4xbf16, #tpu.memory_space<vmem>>, vector<1x18x1x4xbf16>,
    %c0_15 = arith.constant 0 : index
    %c0_16 = arith.constant 0 : index
    %c0_17 = arith.constant 0 : index
    %c0_18 = arith.constant 0 : index
    %6 = vector.load %arg1[%c0_15, %c0_16, %c0_17, %c0_18] : memref<1x16x16x4xbf16, #tpu.memory_space<vmem>>, vector<1x16x16x4xbf16>
    %c0_19 = arith.constant 0 : index
    %c1 = arith.constant 1 : index
    %c1_20 = arith.constant 1 : index
    %c0_21 = arith.constant 0 : index
    %7 = vector.load %arg4[%c0_19, %c1, %c1_20, %c0_21] : memref<1x18x18x4xbf16, #tpu.memory_space<vmem>>, vector<1x16x16x4xbf16>
    tpu.vector_store %arg4[%c0_19, %c1, %c1_20, %c0_21], %6 {strides = array<i32>} : memref<1x18x18x4xbf16, #tpu.memory_space<vmem>>, vector<1x16x16x4xbf16>,
    %c0_22 = arith.constant 0 : index
    %c0_23 = arith.constant 0 : index
    %c0_24 = arith.constant 0 : index
    %c0_25 = arith.constant 0 : index
    %8 = vector.load %arg4[%c0_22, %c0_23, %c0_24, %c0_25] : memref<1x18x18x4xbf16, #tpu.memory_space<vmem>>, vector<1x16x16x4xbf16>
    %c0_26 = arith.constant 0 : index
    %c0_27 = arith.constant 0 : index
    %c1_28 = arith.constant 1 : index
    %c0_29 = arith.constant 0 : index
    %9 = vector.load %arg4[%c0_26, %c0_27, %c1_28, %c0_29] : memref<1x18x18x4xbf16, #tpu.memory_space<vmem>>, vector<1x16x16x4xbf16>
    %c0_30 = arith.constant 0 : index
    %c0_31 = arith.constant 0 : index
    %c2 = arith.constant 2 : index
    %c0_32 = arith.constant 0 : index
    %10 = vector.load %arg4[%c0_30, %c0_31, %c2, %c0_32] : memref<1x18x18x4xbf16, #tpu.memory_space<vmem>>, vector<1x16x16x4xbf16>
    %c0_33 = arith.constant 0 : index
    %c1_34 = arith.constant 1 : index
    %c0_35 = arith.constant 0 : index
    %c0_36 = arith.constant 0 : index
    %11 = vector.load %arg4[%c0_33, %c1_34, %c0_35, %c0_36] : memref<1x18x18x4xbf16, #tpu.memory_space<vmem>>, vector<1x16x16x4xbf16>
    %c0_37 = arith.constant 0 : index
    %c1_38 = arith.constant 1 : index
    %c1_39 = arith.constant 1 : index
    %c0_40 = arith.constant 0 : index
    %12 = vector.load %arg4[%c0_37, %c1_38, %c1_39, %c0_40] : memref<1x18x18x4xbf16, #tpu.memory_space<vmem>>, vector<1x16x16x4xbf16>
    %c0_41 = arith.constant 0 : index
    %c1_42 = arith.constant 1 : index
    %c2_43 = arith.constant 2 : index
    %c0_44 = arith.constant 0 : index
    %13 = vector.load %arg4[%c0_41, %c1_42, %c2_43, %c0_44] : memref<1x18x18x4xbf16, #tpu.memory_space<vmem>>, vector<1x16x16x4xbf16>
    %c0_45 = arith.constant 0 : index
    %c2_46 = arith.constant 2 : index
    %c0_47 = arith.constant 0 : index
    %c0_48 = arith.constant 0 : index
    %14 = vector.load %arg4[%c0_45, %c2_46, %c0_47, %c0_48] : memref<1x18x18x4xbf16, #tpu.memory_space<vmem>>, vector<1x16x16x4xbf16>
    %c0_49 = arith.constant 0 : index
    %c2_50 = arith.constant 2 : index
    %c1_51 = arith.constant 1 : index
    %c0_52 = arith.constant 0 : index
    %15 = vector.load %arg4[%c0_49, %c2_50, %c1_51, %c0_52] : memref<1x18x18x4xbf16, #tpu.memory_space<vmem>>, vector<1x16x16x4xbf16>
    %c0_53 = arith.constant 0 : index
    %c2_54 = arith.constant 2 : index
    %c2_55 = arith.constant 2 : index
    %c0_56 = arith.constant 0 : index
    %16 = vector.load %arg4[%c0_53, %c2_54, %c2_55, %c0_56] : memref<1x18x18x4xbf16, #tpu.memory_space<vmem>>, vector<1x16x16x4xbf16>
    %17 = tpu.concatenate %8, %9, %10, %11, %12, %13, %14, %15, %16 in 3 : vector<1x16x16x4xbf16>, vector<1x16x16x4xbf16>, vector<1x16x16x4xbf16>, vector<1x16x16x4xbf16>, vector<1x16x16x4xbf16>, vector<1x16x16x4xbf16>, vector<1x16x16x4xbf16>, vector<1x16x16x4xbf16>, vector<1x16x16x4xbf16> -> vector<1x16x16x36xbf16>
    %18 = vector.shape_cast %17 : vector<1x16x16x36xbf16> to vector<256x36xbf16>
    %c0_57 = arith.constant 0 : index
    %c0_58 = arith.constant 0 : index
    %19 = vector.load %arg2[%c0_57, %c0_58] : memref<36x8xbf16, #tpu.memory_space<vmem>>, vector<36x8xbf16>
    %cst_59 = arith.constant dense<0.000000e+00> : vector<256x8xf32>
    %20 = tpu.matmul %18, %19, %cst_59 {dimension_numbers = #tpu.dot_dimension_numbers<[1], [0], [0], [1], [0, 0, 1, 1], [], []>} : vector<256x36xbf16>, vector<36x8xbf16>, vector<256x8xf32> -> vector<256x8xf32>
    %cst_60 = arith.constant 0.000000e+00 : f32
    %21 = vector.broadcast %cst_60 : f32 to vector<256x8xf32>
    %22 = arith.maximumf %20, %21 : vector<256x8xf32>
    %23 = vector.shape_cast %22 : vector<256x8xf32> to vector<1x16x16x8xf32>
    %24 = vector.extract_strided_slice %23 {offsets = [0, 0, 0, 0], sizes = [1, 15, 16, 8], strides = [1, 1, 1, 1]} : vector<1x16x16x8xf32> to vector<1x15x16x8xf32>
    %25 = vector.shape_cast %24 : vector<1x15x16x8xf32> to vector<1x5x3x16x8xf32>
    %cst_61 = arith.constant dense<0xFF800000> : vector<1x5x16x8xf32>
    %26 = vector.multi_reduction <maximumf>, %25, %cst_61 [2] : vector<1x5x3x16x8xf32> to vector<1x5x16x8xf32>
    %27 = vector.extract_strided_slice %26 {offsets = [0, 0, 0, 0], sizes = [1, 5, 3, 8], strides = [1, 1, 1, 1]} : vector<1x5x16x8xf32> to vector<1x5x3x8xf32>
    %cst_62 = arith.constant dense<0xFF800000> : vector<1x5x8xf32>
    %28 = vector.multi_reduction <maximumf>, %27, %cst_62 [2] : vector<1x5x3x8xf32> to vector<1x5x8xf32>
    %29 = vector.shape_cast %28 : vector<1x5x8xf32> to vector<1x5x1x8xf32>
    %30 = vector.extract_strided_slice %26 {offsets = [0, 0, 3, 0], sizes = [1, 5, 3, 8], strides = [1, 1, 1, 1]} : vector<1x5x16x8xf32> to vector<1x5x3x8xf32>
    %cst_63 = arith.constant dense<0xFF800000> : vector<1x5x8xf32>
    %31 = vector.multi_reduction <maximumf>, %30, %cst_63 [2] : vector<1x5x3x8xf32> to vector<1x5x8xf32>
    %32 = vector.shape_cast %31 : vector<1x5x8xf32> to vector<1x5x1x8xf32>
    %33 = vector.extract_strided_slice %26 {offsets = [0, 0, 6, 0], sizes = [1, 5, 3, 8], strides = [1, 1, 1, 1]} : vector<1x5x16x8xf32> to vector<1x5x3x8xf32>
    %cst_64 = arith.constant dense<0xFF800000> : vector<1x5x8xf32>
    %34 = vector.multi_reduction <maximumf>, %33, %cst_64 [2] : vector<1x5x3x8xf32> to vector<1x5x8xf32>
    %35 = vector.shape_cast %34 : vector<1x5x8xf32> to vector<1x5x1x8xf32>
    %36 = vector.extract_strided_slice %26 {offsets = [0, 0, 9, 0], sizes = [1, 5, 3, 8], strides = [1, 1, 1, 1]} : vector<1x5x16x8xf32> to vector<1x5x3x8xf32>
    %cst_65 = arith.constant dense<0xFF800000> : vector<1x5x8xf32>
    %37 = vector.multi_reduction <maximumf>, %36, %cst_65 [2] : vector<1x5x3x8xf32> to vector<1x5x8xf32>
    %38 = vector.shape_cast %37 : vector<1x5x8xf32> to vector<1x5x1x8xf32>
    %39 = vector.extract_strided_slice %26 {offsets = [0, 0, 12, 0], sizes = [1, 5, 3, 8], strides = [1, 1, 1, 1]} : vector<1x5x16x8xf32> to vector<1x5x3x8xf32>
    %cst_66 = arith.constant dense<0xFF800000> : vector<1x5x8xf32>
    %40 = vector.multi_reduction <maximumf>, %39, %cst_66 [2] : vector<1x5x3x8xf32> to vector<1x5x8xf32>
    %41 = vector.shape_cast %40 : vector<1x5x8xf32> to vector<1x5x1x8xf32>
    %42 = tpu.concatenate %29, %32, %35, %38, %41 in 3 : vector<1x5x1x8xf32>, vector<1x5x1x8xf32>, vector<1x5x1x8xf32>, vector<1x5x1x8xf32>, vector<1x5x1x8xf32> -> vector<1x5x1x40xf32>
    %c0_67 = arith.constant 0 : index
    %c0_68 = arith.constant 0 : index
    %c0_69 = arith.constant 0 : index
    %c0_70 = arith.constant 0 : index
    %43 = vector.load %arg3[%c0_67, %c0_68, %c0_69, %c0_70] : memref<1x5x1x40xf32, #tpu.memory_space<vmem>>, vector<1x5x1x40xf32>
    tpu.vector_store %arg3[%c0_67, %c0_68, %c0_69, %c0_70], %42 {strides = array<i32>} : memref<1x5x1x40xf32, #tpu.memory_space<vmem>>, vector<1x5x1x40xf32>,
    return
  }
  func.func @transform_0(%arg0: i32) -> (i32, i32, i32, i32) {
    %c0_i32 = arith.constant 0 : i32
    %c0_i32_0 = arith.constant 0 : i32
    %c0_i32_1 = arith.constant 0 : i32
    %c0_i32_2 = arith.constant 0 : i32
    return %arg0, %c0_i32, %c0_i32_0, %c0_i32_1 : i32, i32, i32, i32
  }
  func.func @transform_1(%arg0: i32) -> (i32, i32) {
    %c0_i32 = arith.constant 0 : i32
    %c0_i32_0 = arith.constant 0 : i32
    %c0_i32_1 = arith.constant 0 : i32
    return %c0_i32, %c0_i32_0 : i32, i32
  }
  func.func @transform_2(%arg0: i32) -> (i32, i32, i32, i32) {
    %c0_i32 = arith.constant 0 : i32
    %c0_i32_0 = arith.constant 0 : i32
    %c0_i32_1 = arith.constant 0 : i32
    %c0_i32_2 = arith.constant 0 : i32
    return %arg0, %c0_i32, %c0_i32_0, %c0_i32_1 : i32, i32, i32, i32
  }
}

</mosaic_0001>

<bundles_post_ra>
// kernel: tpu_custom_call.1
= control target key start
LH: loop header
LB: loop body
LE: loop exit
PB: predicated region body
PF: predicated region fallthrough
CT: control target
= control target key end

     0   :  { %7 = vsyncpa [#allocation4], 0  ;;  %s5563_s0 = inlined_call_operand.vmem [shape: bf16[2,16,16,4], index: 0, kind: input, shape index: {}]   ;;  %s5564_s1 = inlined_call_operand.vmem [shape: bf16[36,8], index: 1, kind: input, shape index: {}]   ;;  %s5565_s2 = inlined_call_operand.hbm [shape: f32[2,5,1,40], index: 2, kind: output, shape index: {}]  }
   0x1   :  { %9 = vsyncpa [#allocation4 + $0x1], 0  ;;  %s3884_s9 = smov 0   ;;  %s3886_s10 = smov 0  }
   0x2   :  { %s3888_s11 = smov 0   ;;  %s3890_s12 = smov 0  }
   0x3 LB: > { %s3905_s13 = sadd.s32 4294967295, %s3856_s12   ;;  %s3366_s14 = sadd.s32 4294967294, %s3856_s12   ;;  %s3856_s12 = sphi %s3890_s12, %s5579_s12   ;;  %s3852_s11 = sphi %s3888_s11, %s5578_s11   ;;  %s3848_s10 = sphi %s3886_s10, %s5577_s10   ;;  %s3844_s9 = sphi %s3884_s9, %s5576_s9  }
   0x4   : > { %s3909_s15 = sadd.s32 1, %s3856_s12   ;;  %s69_s16 = sadd.s32 1, %s3852_s11 }
   0x5   : > { %s66_s17 = ssub.s32 %s3856_s12, %s3909_s15  ;;  %p79_p0 = scmp.ne.s32.totalorder %s3852_s11, %s3848_s10 }
   0x6   : > { %p67_p1 = scmp.eq.s32.totalorder %s66_s17, 0  ;;  %p80_p2 = scmp.eq.s32.totalorder %s3905_s13, 1 }
   0x7   : > { %p85_p3 = scmp.ne.s32.totalorder %s3848_s10, %s3844_s9  ;;  %p86_p4 = scmp.eq.s32.totalorder %s3366_s14, 1 }
   0x8   : > { %s3920_s18 = scalar_select %p67_p1, %s3852_s11, %s69_s16  }
   0x9   : > { %p3922_p5 = por %p80_p2, %p79_p0  ;;  %p3926_p6 = por %p86_p4, %p85_p3 }
   0xa   : > { %p3369_p7 = scmp.ge.s32.totalorder %s3856_s12, 1  ;;  %p115_p8 = scmp.lt.s32.totalorder %s3856_s12, 3 }
   0xc   : > { %p116_p9 = pnand %p3369_p7, %p115_p8 }
   0xd   : > { %p137_p10 = scmp.lt.s32.totalorder (!%p116_p9), %s3905_s13, 1  ;;  %s3859_s26 = smov (!%p116_p9), 8  }
   0xe   : > { %119 = sbr.rel (%p116_p9) target bundleno = 791 (0x317), region = 28  ;;  %s3860_s27 = smov (!%p116_p9), 12  }
   0xf   : > { %s3861_s28 = smov (!%p116_p9), 4   ;;  %s3862_s29 = smov (!%p116_p9), 20  }
  0x10   : > { %s3863_s30 = smov (!%p116_p9), 16   ;;  %s3864_s3 = smov (!%p116_p9), 24  }
  0x11   : > { %s3865_s4 = smov (!%p116_p9), 28   ;;  %s3866_s5 = smov (!%p116_p9), 32  }
  0x12   : > { %s3605_s24 = smul.u32 (!%p116_p9), 80, %s3905_s13 }
  0x13   : > { %vm143_vm0 = vcmask 27648   ;;  %vm146_vm1 = vcmask 24576   ;;  %vm153_vm2 = vsmask.f32 256  ;;  %v3858_v0 = vmov 0   ;;  %s138_s21 = scalar_select %p137_p10, %s3905_s13, 1 }
  0x14   : > { %144 = vst.msk [vmem:[#allocation2] sm:$0xf] %vm143_vm0, %v3858_v0  ;;  %145 = vst.msk [vmem:[#allocation2 + $0x4] sm:$0xf] %vm143_vm0, %v3858_v0  ;;  %v161_v2 = vld [vmem:[#allocation2 + $0x18] sm:$0x1] }
  0x15   : > { %147 = vst.msk [vmem:[#allocation2 + $0x8] sm:$0x1] %vm146_vm1, %v3858_v0  ;;  %vm3937_vm3 = vmand %vm146_vm1, %vm153_vm2  ;;  %vm209_vm4 = vsmask.f32 7938  ;;  %v158_v4 = vld [vmem:[#allocation2 + $0xc] sm:$0x1] }
  0x16   : > { %149 = vst.msk [vmem:[#allocation2 + $0xcc] sm:$0xf] %vm143_vm0, %v3858_v0  ;;  %150 = vst.msk [vmem:[#allocation2 + $0xd0] sm:$0xf] %vm143_vm0, %v3858_v0  ;;  %v162_v3 = vsel %vm3937_vm3, 0, %v161_v2  ;;  %v159_v5 = vsel %vm3937_vm3, 0, %v158_v4 }
  0x17   : > { %151 = vst.msk [vmem:[#allocation2 + $0xd4] sm:$0x1] %vm146_vm1, %v3858_v0  ;;  %163 = vst [vmem:[#allocation2 + $0x18] sm:$0x1] %v162_v3  ;;  %v185_v6 = vld [vmem:[#allocation2 + $0x78] sm:$0x1] }
  0x18   : > { %v182_v7 = vld [vmem:[#allocation2 + $0x6c] sm:$0x1]  ;;  %160 = vst [vmem:[#allocation2 + $0xc] sm:$0x1] %v159_v5  ;;  %v186_v8 = vsel %vm3937_vm3, 0, %v185_v6  ;;  %vm3956_vm5 = vmand %vm146_vm1, %vm209_vm4  ;;  %s3538_s22 = sshll.u32 %s138_s21, 7 }
  0x19   : > { %v183_v9 = vsel %vm3937_vm3, 0, %v182_v7  ;;  %187 = vst [vmem:[#allocation2 + $0x78] sm:$0x1] %v186_v8  ;;  %v179_v11 = vld [vmem:[#allocation2 + $0x60] sm:$0x1]  ;;  %s3963_s25 = scalar_lea.vmem %s5563_s0, %s3538_s22  ;;  %vm3981_vm7 = vmand %vm143_vm0, %vm209_vm4  ;;  %vm1328_vm9 = vcmask 1046528  }
  0x1a   : > { %184 = vst [vmem:[#allocation2 + $0x6c] sm:$0x1] %v183_v9  ;;  %v235_v12 = vld [vmem:[#allocation2 + $0x68] sm:$0x1]  ;;  %vm297_vm6 = vsmask.f32 4368 }
  0x1b   : > { %v180_v13 = vsel %vm3937_vm3, 0, %v179_v11  ;;  %v236_v14 = vsel %vm3956_vm5, 0, %v235_v12  ;;  %v214_v15 = vld [vmem:[#allocation2 + $0x14] sm:$0x1]  ;;  %v267_v16 = vld [vmem:[%s3963_s25 + $0x8] sm:$0xf]  ;;  %vm3989_vm8 = vmor %vm153_vm2, %vm297_vm6 }
  0x1c   : > { %v268_v17 = vld [vmem:[%s3963_s25 + $0xc] sm:$0xf]  ;;  %v265_v18 = vld [vmem:[%s3963_s25] sm:$0xf]  ;;  %181 = vst [vmem:[#allocation2 + $0x60] sm:$0x1] %v180_v13 }
  0x1d   : > { %237 = vst [vmem:[#allocation2 + $0x68] sm:$0x1] %v236_v14  ;;  %v211_v19 = vld [vmem:[#allocation2 + $0x8] sm:$0x1]  ;;  %v735_v20 = vld [vmem:[#allocation2 + $0x4] sm:$0xf] }
  0x1e   : > { %v782_v21 = vld [vmem:[#allocation2] sm:$0xe]  ;;  %v238_v22 = vld [vmem:[#allocation2 + $0x74] sm:$0x1]  ;;  %v212_v23 = vsel %vm3956_vm5, 0, %v211_v19  ;;  %v317_v25 = vshrl.u32 %v267_v16, 16 }
  0x1f   : > { %v155_v24 = vld [vmem:[#allocation2] sm:$0x1]  ;;  %v320_v26 = vshll.u32 %v267_v16, 16  ;;  %213 = vst [vmem:[#allocation2 + $0x8] sm:$0x1] %v212_v23  ;;  %v325_v28 = vshrl.u32 %v268_v17, 16  ;;  %v3404_v42 = vcombine.low %v782_v21, %v735_v20 }
  0x20   : > { %v156_v27 = vsel %vm3937_vm3, 0, %v155_v24  ;;  %v328_v29 = vshll.u32 %v268_v17, 16  ;;  %v629_v30 = vld [vmem:[#allocation2 + $0x18] sm:$0xf]  ;;  %v300_v31 = vshrl.u32 %v265_v18, 16  ;;  %v319_v32 = vrot.slane %v317_v25, 7 }
  0x21   : > { %157 = vst [vmem:[#allocation2] sm:$0x1] %v156_v27  ;;  %v266_v33 = vld [vmem:[%s3963_s25 + $0x4] sm:$0xf]  ;;  %v303_v34 = vshll.u32 %v265_v18, 16  ;;  %v215_v35 = vsel %vm3956_vm5, 0, %v214_v15 }
  0x22   : > { %v3985_v37 = vrot.slane %v325_v28, 7  ;;  %v302_v38 = vrot.slane %v300_v31, 7  ;;  %v308_v39 = vshrl.u32 %v266_v33, 16  ;;  %v311_v40 = vshll.u32 %v266_v33, 16  ;;  %v622_v41 = vld [vmem:[#allocation2 + $0xc] sm:$0xf] }
  0x23   : > { %216 = vst [vmem:[#allocation2 + $0x14] sm:$0x1] %v215_v35  ;;  %v322_v44 = vor.u32 %v320_v26, %v319_v32  ;;  %v323_v45 = vrot.slane %v319_v32, 4  ;;  %v283_v46 = vld [vmem:[%s3963_s25 + $0x48] sm:$0xf]  ;;  %v239_v48 = vsel %vm3956_vm5, 0, %v238_v22 }
  0x24   : > { %v284_v47 = vld [vmem:[%s3963_s25 + $0x4c] sm:$0xf]  ;;  %v330_v49 = vor.u32 %v328_v29, %v3985_v37  ;;  %v305_v50 = vor.u32 %v303_v34, %v302_v38  ;;  %v306_v51 = vrot.slane %v302_v38, 4  ;;  %240 = vst [vmem:[#allocation2 + $0x74] sm:$0x1] %v239_v48  ;;  %v310_v53 = vrot.slane %v308_v39, 7 }
  0x25   : > { %v630_v52 = vsel %vm3981_vm7, %v322_v44, %v629_v30  ;;  %v453_v54 = vshrl.u32 %v283_v46, 16  ;;  %v456_v55 = vshll.u32 %v283_v46, 16  ;;  %v281_v56 = vld [vmem:[%s3963_s25 + $0x40] sm:$0xf]  ;;  %v461_v59 = vshrl.u32 %v284_v47, 16  ;;  %s134_s21 = sand.u32 1, %s3848_s10  }
  0x26   : > { %v331_v57 = vsel %vm3989_vm8, %v323_v45, %v330_v49  ;;  %631 = vst [vmem:[#allocation2 + $0x18] sm:$0xf] %v630_v52  ;;  %v623_v58 = vsel %vm3981_vm7, %v305_v50, %v622_v41  ;;  %v464_v60 = vshll.u32 %v284_v47, 16  ;;  %v282_v61 = vld [vmem:[%s3963_s25 + $0x44] sm:$0xf]  ;;  %v1329_v63 = vrot.slane %v3404_v42, 1 }
  0x27   : > { %v4006_v62 = vld [vmem:[#allocation2 + $0x8] ss:$0 sps:$4 sm:$0x11]   ;;  %632 = vst.msk [vmem:[#allocation2 + $0x1c] sm:$0xf] %vm143_vm0, %v331_v57  ;;  %v313_v0 = vor.u32 %v311_v40, %v310_v53  ;;  %v455_v3 = vrot.slane %v453_v54, 7 }
  0x28   : > { %624 = vst [vmem:[#allocation2 + $0xc] sm:$0xf] %v623_v58  ;;  %v734_v2 = vld [vmem:[#allocation2] sm:$0xf]  ;;  %v4009_v4 = vrot.slane %v461_v59, 7  ;;  %v436_v5 = vshrl.u32 %v281_v56, 16 }
  0x29   : > { %v439_v6 = vshll.u32 %v281_v56, 16  ;;  %v1330_v7 = vrot.slane %v4006_v62, 1  ;;  %v4012_v8 = vcombine.low %v734_v2, %v735_v20  ;;  %v314_v9 = vsel %vm3989_vm8, %v306_v51, %v313_v0  ;;  %v685_v11 = vld [vmem:[#allocation2 + $0x78] sm:$0xf]  ;;  %v678_v24 = vld [vmem:[#allocation2 + $0x6c] sm:$0xf] }
  0x2a   : > { %v444_v12 = vshrl.u32 %v282_v61, 16  ;;  %v315_v13 = vrot.slane %v310_v53, 4  ;;  %625 = vst.msk [vmem:[#allocation2 + $0x10] sm:$0xf] %vm143_vm0, %v314_v9  ;;  %v458_v14 = vor.u32 %v456_v55, %v455_v3  ;;  %v459_v15 = vrot.slane %v455_v3, 4  ;;  %s3604_s22 = smul.u32 5, %s134_s21 }
  0x2b   : > { %v466_v16 = vor.u32 %v464_v60, %v4009_v4  ;;  %v1331_v17 = vsel %vm1328_vm9, %v1329_v63, %v1330_v7  ;;  %v438_v18 = vrot.slane %v436_v5, 7  ;;  %v447_v21 = vshll.u32 %v282_v61, 16  ;;  %v626_v20 = vld [vmem:[#allocation2 + $0x14] sm:$0x1]  ;;  %v279_v31 = vld [vmem:[%s3963_s25 + $0x38] sm:$0xf] }
  0x2c   : > { %v446_v19 = vrot.slane %v444_v12, 7  ;;  %1377 = vrot.lane.b32.xlu1 %v1331_v17, %s3859_s26  ;;  %v686_v23 = vsel %vm3981_vm7, %v458_v14, %v685_v11  ;;  %v1059_v25 = vshll.u32 %v4012_v8, 16  ;;  %v280_v33 = vld [vmem:[%s3963_s25 + $0x3c] sm:$0xf]  ;;  %v627_v34 = vsel %vm3937_vm3, %v315_v13, %v626_v20  ;;  %v682_v35 = vld [vmem:[#allocation2 + $0x74] sm:$0x1] }
  0x2d   : > { %v467_v22 = vsel %vm3989_vm8, %v459_v15, %v466_v16  ;;  %v800_v26 = vld [vmem:[#allocation2 + $0x18] sm:$0xf]  ;;  %687 = vst [vmem:[#allocation2 + $0x78] sm:$0xf] %v686_v23  ;;  %v441_v27 = vor.u32 %v439_v6, %v438_v18  ;;  %v442_v28 = vrot.slane %v438_v18, 4  ;;  %v1057_v42 = vshrl.u32 %v4012_v8, 16 }
  0x2e   : > { %688 = vst.msk [vmem:[#allocation2 + $0x7c] sm:$0xf] %vm143_vm0, %v467_v22  ;;  %v449_v29 = vor.u32 %v447_v21, %v446_v19  ;;  %v451_v30 = vrot.slane %v446_v19, 4  ;;  %v4027_v32 = vld [vmem:[#allocation2 + $0x1c] sm:$0xf]  ;;  %v1061_v45 = vrot.slane %v1059_v25, 1 }
  0x2f   : > { %v4033_v38 = vcombine.low %v800_v26, %v4027_v32  ;;  %v798_v39 = vld [vmem:[#allocation2 + $0xc] sm:$0xf]  ;;  %v679_v41 = vsel %vm3981_vm7, %v441_v27, %v678_v24  ;;  %628 = vst [vmem:[#allocation2 + $0x14] sm:$0x1] %v627_v34  ;;  %v1064_v46 = vshll.u32 %v4006_v62, 16  ;;  %v419_v47 = vshrl.u32 %v279_v31, 16 }
  0x30   : > { %v450_v40 = vsel %vm3989_vm8, %v442_v28, %v449_v29  ;;  %v783_v44 = vld [vmem:[#allocation2 + $0xc] sm:$0xe]  ;;  %680 = vst [vmem:[#allocation2 + $0x6c] sm:$0xf] %v679_v41  ;;  %v422_v50 = vshll.u32 %v279_v31, 16  ;;  %v427_v51 = vshrl.u32 %v280_v33, 16  ;;  %v683_v53 = vsel %vm3937_vm3, %v451_v30, %v682_v35 }
  0x31   : > { %681 = vst.msk [vmem:[#allocation2 + $0x70] sm:$0xf] %vm143_vm0, %v450_v40  ;;  %v736_v48 = vld [vmem:[#allocation2 + $0xc] sm:$0xf]  ;;  %1491 = vrot.lane.b32.xlu0 %v4033_v38, %s3860_s27  ;;  %v4044_v49 = vld [vmem:[#allocation2 + $0x10] sm:$0xf]  ;;  %v1062_v56 = vor.u32 %v1061_v45, %v1057_v42 }
  0x32   : > { %v430_v52 = vshll.u32 %v280_v33, 16  ;;  %v4049_v54 = vcombine.low %v798_v39, %v4044_v49  ;;  %vm1055_vm10 = vsmask.f32 7424  ;;  %v737_v55 = vld [vmem:[#allocation2 + $0x10] sm:$0xf]  ;;  %v1066_v57 = vrot.slane %v1064_v46, 1 }
  0x33   : > { %684 = vst [vmem:[#allocation2 + $0x74] sm:$0x1] %v683_v53  ;;  %v421_v58 = vrot.slane %v419_v47, 7  ;;  %v429_v59 = vrot.slane %v427_v51, 7  ;;  %v671_v62 = vld [vmem:[#allocation2 + $0x60] sm:$0xf]  ;;  %v3405_v63 = vcombine.low %v783_v44, %v737_v55  ;;  %v4055_v0 = vcombine.low %v736_v48, %v737_v55 }
  0x34   : > { %1489 = vrot.lane.b32.xlu1 %v4049_v54, %s3860_s27  ;;  %v816_v60 = vld [vmem:[#allocation2 + $0x78] sm:$0xf]  ;;  %v675_v7 = vld [vmem:[#allocation2 + $0x68] sm:$0x1]  ;;  %v1067_v14 = vsel %vm1055_vm10, %v1062_v56, %v1066_v57  ;;  %v846_v20 = vld [vmem:[#allocation2 + $0xc] sm:$0xe] }
  0x35   : > { %v4053_v61 = vld [vmem:[#allocation2 + $0x7c] sm:$0xf]  ;;  %v424_v3 = vor.u32 %v422_v50, %v421_v58  ;;  %v425_v5 = vrot.slane %v421_v58, 4  ;;  %v432_v6 = vor.u32 %v430_v52, %v429_v59  ;;  %v434_v9 = vrot.slane %v429_v59, 4  ;;  %s5468_s23 = scalar_lea.vmem [#allocation3], %s3604_s22 }
  0x36   : > { %v4058_v2 = vcombine.low %v816_v60, %v4053_v61  ;;  %v3668_v11 = vld [vmem:[#allocation2 + $0x14] ss:$0 sps:$4 sm:$0x11]   ;;  %v1332_v19 = vrot.slane %v3405_v63, 1  ;;  %v1071_v23 = vshll.u32 %v4055_v0, 16  ;;  %v1069_v29 = vshrl.u32 %v4055_v0, 16 }
  0x37   : > { %v814_v12 = vld [vmem:[#allocation2 + $0x6c] sm:$0xf]  ;;  %v433_v15 = vsel %vm3989_vm8, %v425_v5, %v432_v6  ;;  %v672_v16 = vsel %vm3981_vm7, %v424_v3, %v671_v62  ;;  %v676_v18 = vsel %vm3937_vm3, %v434_v9, %v675_v7  ;;  %v1333_v21 = vrot.slane %v3668_v11, 1  ;;  %v3671_v35 = vld [vmem:[#allocation2 + $0x14] ss:$0 sps:$4 sm:$0x11]  }
  0x38   : > { %1507 = vrot.lane.b32.xlu0 %v4058_v2, %s3860_s27  ;;  %v4062_v13 = vld [vmem:[#allocation2 + $0x70] sm:$0xf]  ;;  %673 = vst [vmem:[#allocation2 + $0x60] sm:$0xf] %v672_v16  ;;  %674 = vst.msk [vmem:[#allocation2 + $0x64] sm:$0xf] %vm143_vm0, %v433_v15  ;;  %v3452_v34 = vcombine.low %v846_v20, %v4044_v49 }
  0x39   : > { %v4070_v17 = vcombine.low %v814_v12, %v4062_v13  ;;  %677 = vst [vmem:[#allocation2 + $0x68] sm:$0x1] %v676_v18  ;;  %v752_v22 = vld [vmem:[#allocation2 + $0x6c] sm:$0xf]  ;;  %v753_v24 = vld [vmem:[#allocation2 + $0x70] sm:$0xf]  ;;  %v1334_v30 = vsel %vm1328_vm9, %v1332_v19, %v1333_v21 }
  0x3a   : > { %v1076_v25 = vshll.u32 %v3668_v11, 16  ;;  %v791_v26 = vld [vmem:[#allocation2 + $0x6c] sm:$0xe]  ;;  %v4079_v27 = vcombine.low %v752_v22, %v753_v24  ;;  %v3673_v28 = vld [vmem:[#allocation2 + $0x74] ss:$0 sps:$4 sm:$0x11]  }
  0x3b   : > { %1505 = vrot.lane.b32.xlu1 %v4070_v17, %s3860_s27  ;;  %v3413_v31 = vcombine.low %v791_v26, %v753_v24  ;;  %v1073_v33 = vrot.slane %v1071_v23, 1  ;;  %v1357_v39 = vrot.slane %v3673_v28, 1  ;;  %v1572_v40 = vshll.u32 %v4049_v54, 16  ;;  %v217_v3 = vld [vmem:[#allocation2 + $0x20] sm:$0x1] }
  0x3c   : > { %1248 = vrot.lane.b32.xlu0 %v1067_v14, %s3861_s28  ;;  %v1078_v42 = vrot.slane %v1076_v25, 1  ;;  %v1167_v44 = vshll.u32 %v4079_v27, 16  ;;  %v1165_v53 = vshrl.u32 %v4079_v27, 16  ;;  %v1841_v55 = vrot.slane %v3452_v34, 1  ;;  %v241_v21 = vld [vmem:[#allocation2 + $0x80] sm:$0x1] }
  0x3d   : > { %v1356_v41 = vrot.slane %v3413_v31, 1  ;;  %v1074_v48 = vor.u32 %v1073_v33, %v1069_v29  ;;  %v1842_v56 = vrot.slane %v3671_v35, 1  ;;  %v1172_v58 = vshll.u32 %v3673_v28, 16  ;;  %v4102_v24 = vld [vmem:[#allocation2 + $0x74] ss:$0 sps:$4 sm:$0x11]  }
  0x3e   : > { %v1169_v57 = vrot.slane %v1167_v44, 1  ;;  %v1668_v5 = vshll.u32 %v4070_v17, 16  ;;  %v1570_v15 = vshrl.u32 %v4049_v54, 16  ;;  %v1574_v16 = vrot.slane %v1572_v40, 1  ;;  %v4104_v25 = vld [vmem:[#allocation2 + $0x18] sm:$0xe] }
  0x3f   : > { %v750_v45 = vld [vmem:[#allocation2 + $0x60] sm:$0xf]  ;;  %v751_v46 = vld [vmem:[#allocation2 + $0x64] sm:$0xf]  ;;  %v1358_v49 = vsel %vm1328_vm9, %v1356_v41, %v1357_v39  ;;  %v1079_v7 = vsel %vm1055_vm10, %v1074_v48, %v1078_v42  ;;  %v1174_v14 = vrot.slane %v1172_v58, 1  ;;  %v1577_v18 = vshll.u32 %v3671_v35, 16 }
  0x40   : > { %v790_v47 = vld [vmem:[#allocation2 + $0x60] sm:$0xe]  ;;  %1379 = vrot.lane.b32.xlu0 %v1334_v30, %s3859_s26  ;;  %v4087_v50 = vcombine.low %v750_v45, %v751_v46  ;;  %v3666_v51 = vld [vmem:[#allocation2 + $0x68] ss:$0 sps:$4 sm:$0x11]   ;;  %v1170_v12 = vor.u32 %v1169_v57, %v1165_v53  ;;  %v218_v19 = vsel %vm3956_vm5, 0, %v217_v3  ;;  %v1843_v20 = vsel %vm1328_vm9, %v1841_v55, %v1842_v56 }
  0x41   : > { %v3412_v52 = vcombine.low %v790_v47, %v751_v46  ;;  %v1354_v60 = vrot.slane %v3666_v51, 1  ;;  %v1160_v6 = vshll.u32 %v3666_v51, 16  ;;  %219 = vst [vmem:[#allocation2 + $0x20] sm:$0x1] %v218_v19  ;;  %v164_v26 = vld [vmem:[#allocation2 + $0x24] sm:$0x1]  ;;  %v1575_v34 = vor.u32 %v1574_v16, %v1570_v15 }
  0x42   : > { %v1153_v62 = vshrl.u32 %v4087_v50, 16  ;;  %v1155_v63 = vshll.u32 %v4087_v50, 16  ;;  %v269_v54 = vld [vmem:[%s3963_s25 + $0x10] sm:$0xf]  ;;  %v332_v28 = vrot.slane %v3985_v37, 4  ;;  %v1175_v29 = vsel %vm1055_vm10, %v1170_v12, %v1174_v14 }
  0x43   : > { %v1353_v59 = vrot.slane %v3412_v52, 1  ;;  %v1162_v23 = vrot.slane %v1160_v6, 1  ;;  %v863_v30 = vld [vmem:[#allocation2 + $0x18] sm:$0xf]  ;;  %v242_v31 = vsel %vm3956_vm5, 0, %v241_v21  ;;  %v1579_v35 = vrot.slane %v1577_v18, 1 }
  0x44   : > { %1395 = vrot.lane.b32.xlu0 %v1358_v49, %s3859_s26  ;;  %v1157_v11 = vrot.slane %v1155_v63, 1  ;;  %v270_v33 = vld [vmem:[%s3963_s25 + $0x14] sm:$0xf]  ;;  %v1666_v39 = vshrl.u32 %v4070_v17, 16  ;;  %v1670_v40 = vrot.slane %v1668_v5, 1  ;;  %v1673_v42 = vshll.u32 %v4102_v24, 16 }
  0x45   : > { %v1355_v9 = vsel %vm1328_vm9, %v1353_v59, %v1354_v60  ;;  %v4115_v41 = vld [vmem:[#allocation2 + $0x1c] sm:$0xf]  ;;  %243 = vst [vmem:[#allocation2 + $0x80] sm:$0x1] %v242_v31  ;;  %v165_v44 = vsel %vm3937_vm3, 0, %v164_v26  ;;  %v334_v45 = vshrl.u32 %v269_v54, 16  ;;  %v3453_v49 = vcombine.low %v4104_v25, %v4027_v32 }
  0x46   : > { %1393 = vrot.lane.b32.xlu1 %v1355_v9, %s3859_s26  ;;  %v1158_v22 = vor.u32 %v1157_v11, %v1153_v62  ;;  %v220_v46 = vld [vmem:[#allocation2 + $0x2c] sm:$0x1]  ;;  %v468_v47 = vrot.slane %v4009_v4, 4  ;;  %166 = vst [vmem:[#allocation2 + $0x24] sm:$0x1] %v165_v44  ;;  %v337_v17 = vshll.u32 %v269_v54, 16  ;;  %v4127_v56 = vcombine.low %v863_v30, %v4115_v41 }
  0x47   : > { %v342_v48 = vshrl.u32 %v270_v33, 16  ;;  %v345_v51 = vshll.u32 %v270_v33, 16  ;;  %v188_v52 = vld [vmem:[#allocation2 + $0x84] sm:$0x1]  ;;  %v1584_v53 = vshll.u32 %v4033_v38, 16  ;;  %v336_v57 = vrot.slane %v334_v45, 7 }
  0x48   : > { %1250 = vrot.lane.b32.xlu0 %v1079_v7, %s3861_s28  ;;  %v1163_v37 = vsel %vm1055_vm10, %v1158_v22, %v1162_v23  ;;  %v854_v55 = vld [vmem:[#allocation2 + $0x6c] sm:$0xe]  ;;  %v285_v58 = vld [vmem:[%s3963_s25 + $0x50] sm:$0xf]  ;;  %v1580_v4 = vsel %vm1055_vm10, %v1575_v34, %v1579_v35  ;;  %v1671_v59 = vor.u32 %v1670_v40, %v1666_v39  ;;  %v633_v60 = vld [vmem:[#allocation2 + $0x20] sm:$0x1] }
  0x49   : > { %v344_v62 = vrot.slane %v342_v48, 7  ;;  %v221_v63 = vsel %vm3956_vm5, 0, %v220_v46  ;;  %v286_v3 = vld [vmem:[%s3963_s25 + $0x54] sm:$0xf]  ;;  %v1675_v32 = vrot.slane %v1673_v42, 1  ;;  %v634_v5 = vsel %vm3937_vm3, %v332_v28, %v633_v60 }
  0x4a   : > { %1889 = vrot.lane.b32.xlu1 %v1843_v20, %s3862_s29  ;;  %v340_v6 = vrot.slane %v336_v57, 4  ;;  %222 = vst [vmem:[#allocation2 + $0x2c] sm:$0x1] %v221_v63  ;;  %v189_v7 = vsel %vm3937_vm3, 0, %v188_v52  ;;  %v1680_v9 = vshll.u32 %v4058_v2, 16  ;;  %v339_v11 = vor.u32 %v337_v17, %v336_v57 }
  0x4b   : > { %635 = vst [vmem:[#allocation2 + $0x20] sm:$0x1] %v634_v5  ;;  %v347_v12 = vor.u32 %v345_v51, %v344_v62  ;;  %190 = vst [vmem:[#allocation2 + $0x84] sm:$0x1] %v189_v7  ;;  %v470_v14 = vshrl.u32 %v285_v58, 16  ;;  %v3460_v15 = vcombine.low %v854_v55, %v4062_v13  ;;  %v2084_v16 = vshll.u32 %v4127_v56, 16 }
  0x4c   : > { %1266 = vrot.lane.b32.xlu0 %v1175_v29, %s3861_s28  ;;  %v689_v18 = vld [vmem:[#allocation2 + $0x80] sm:$0x1]  ;;  %v478_v19 = vshrl.u32 %v286_v3, 16  ;;  %v481_v21 = vshll.u32 %v286_v3, 16  ;;  %v473_v25 = vshll.u32 %v285_v58, 16  ;;  %v1676_v26 = vsel %vm1055_vm10, %v1671_v59, %v1675_v32 }
  0x4d   : > { %v690_v20 = vsel %vm3937_vm3, %v468_v47, %v689_v18  ;;  %v348_v22 = vsel %vm3989_vm8, %v340_v6, %v347_v12  ;;  %v472_v23 = vrot.slane %v470_v14, 7  ;;  %v349_v13 = vrot.slane %v344_v62, 4  ;;  %v636_v54 = vld [vmem:[#allocation2 + $0x24] sm:$0xf]  ;;  %v244_v29 = vld [vmem:[#allocation2 + $0x8c] sm:$0x1] }
  0x4e   : > { %1264 = vrot.lane.b32.xlu1 %v1163_v37, %s3861_s28  ;;  %691 = vst [vmem:[#allocation2 + $0x80] sm:$0x1] %v690_v20  ;;  %639 = vst.msk [vmem:[#allocation2 + $0x28] sm:$0xf] %vm143_vm0, %v348_v22  ;;  %v4149_v28 = vrot.slane %v478_v19, 7  ;;  %v1582_v30 = vshrl.u32 %v4033_v38, 16  ;;  %v637_v33 = vsel %vm3981_vm7, %v339_v11, %v636_v54 }
  0x4f   : > { %v1586_v31 = vrot.slane %v1584_v53, 1  ;;  %v476_v34 = vrot.slane %v472_v23, 4  ;;  %v167_v35 = vld [vmem:[#allocation2 + $0x30] sm:$0x1]  ;;  %v1844_v39 = vrot.slane %v3453_v49, 1  ;;  %v1865_v40 = vrot.slane %v3460_v15, 1 }
  0x50   : > { %v1866_v37 = vrot.slane %v4102_v24, 1  ;;  %638 = vst [vmem:[#allocation2 + $0x24] sm:$0xf] %v637_v33  ;;  %v483_v42 = vor.u32 %v481_v21, %v4149_v28  ;;  %v2082_v44 = vshrl.u32 %v4127_v56, 16  ;;  %v2086_v45 = vrot.slane %v2084_v16, 1 }
  0x51   : > { %v640_v46 = vld [vmem:[#allocation2 + $0x2c] sm:$0x1]  ;;  %v475_v38 = vor.u32 %v473_v25, %v472_v23  ;;  %v245_v47 = vsel %vm3956_vm5, 0, %v244_v29  ;;  %v911_v48 = vld [vmem:[#allocation2 + $0x18] sm:$0xe]  ;;  %v168_v53 = vsel %vm3937_vm3, 0, %v167_v35  ;;  %v1587_v58 = vor.u32 %v1586_v31, %v1582_v30 }
  0x52   : > { %1761 = vrot.lane.b32.xlu1 %v1580_v4, %s3863_s30  ;;  %v3676_v17 = vld [vmem:[#allocation2 + $0x20] ss:$0 sps:$4 sm:$0x11]   ;;  %v641_v51 = vsel %vm3937_vm3, %v349_v13, %v640_v46  ;;  %v484_v24 = vsel %vm3989_vm8, %v476_v34, %v483_v42  ;;  %v738_v52 = vld [vmem:[#allocation2 + $0x18] sm:$0xf]  ;;  %v1678_v55 = vshrl.u32 %v4058_v2, 16  ;;  %v1867_v7 = vsel %vm1328_vm9, %v1865_v40, %v1866_v37 }
  0x53   : > { %v4164_v49 = vld [vmem:[#allocation2 + $0x1c] sm:$0xf]  ;;  %246 = vst [vmem:[#allocation2 + $0x8c] sm:$0x1] %v245_v47  ;;  %642 = vst [vmem:[#allocation2 + $0x2c] sm:$0x1] %v641_v51  ;;  %v3500_v12 = vcombine.low %v911_v48, %v4115_v41 }
  0x54   : > { %v4169_v57 = vld [vmem:[#allocation2 + $0x20] ss:$0 sps:$4 sm:$0x11]   ;;  %695 = vst.msk [vmem:[#allocation2 + $0x88] sm:$0xf] %vm143_vm0, %v484_v24  ;;  %v1589_v4 = vshll.u32 %v3676_v17, 16  ;;  %v4187_v16 = vcombine.low %v738_v52, %v4164_v49 }
  0x55   : > { %169 = vst [vmem:[#allocation2 + $0x30] sm:$0x1] %v168_v53  ;;  %v1682_v59 = vrot.slane %v1680_v9, 1  ;;  %v879_v60 = vld [vmem:[#allocation2 + $0x78] sm:$0xf]  ;;  %v2089_v2 = vshll.u32 %v4169_v57, 16  ;;  %v2087_v9 = vor.u32 %v2086_v45, %v2082_v44 }
  0x56   : > { %1777 = vrot.lane.b32.xlu1 %v1676_v26, %s3863_s30  ;;  %v4172_v62 = vld [vmem:[#allocation2 + $0x7c] sm:$0xf]  ;;  %v692_v63 = vld [vmem:[#allocation2 + $0x84] sm:$0xf]  ;;  %v1591_v5 = vrot.slane %v1589_v4, 1  ;;  %v1845_v6 = vrot.slane %v3676_v17, 1 }
  0x57   : > { %v4176_v3 = vld [vmem:[#allocation2 + $0x80] ss:$0 sps:$4 sm:$0x11]   ;;  %v693_v32 = vsel %vm3981_vm7, %v475_v38, %v692_v63  ;;  %v4182_v11 = vld [vmem:[#allocation2 + $0x28] sm:$0xf]  ;;  %v3476_v20 = vcombine.low %v879_v60, %v4172_v62  ;;  %v1683_v22 = vor.u32 %v1682_v59, %v1678_v55  ;;  %v2353_v54 = vrot.slane %v3500_v12, 1 }
  0x58   : > { %694 = vst [vmem:[#allocation2 + $0x84] sm:$0xf] %v693_v32  ;;  %v1685_v14 = vshll.u32 %v4176_v3, 16  ;;  %v865_v15 = vld [vmem:[#allocation2 + $0x24] sm:$0xf]  ;;  %v1592_v18 = vsel %vm1055_vm10, %v1587_v58, %v1591_v5  ;;  %v1846_v41 = vsel %vm1328_vm9, %v1844_v39, %v1845_v6  ;;  %v485_v29 = vrot.slane %v4149_v28, 4 }
  0x59   : > { %v855_v19 = vld [vmem:[#allocation2 + $0x78] sm:$0xe]  ;;  %1763 = vrot.lane.b32.xlu0 %v1592_v18, %s3863_s30  ;;  %v3469_v21 = vcombine.low %v865_v15, %v4182_v11  ;;  %v2180_v13 = vshll.u32 %v3476_v20, 16  ;;  %v1083_v30 = vshll.u32 %v4187_v16, 16  ;;  %v740_v34 = vld [vmem:[#allocation2 + $0x24] sm:$0xf] }
  0x5a   : > { %2001 = vrot.lane.b32.xlu1 %v4127_v56, %s3864_s3  ;;  %v2091_v56 = vrot.slane %v2089_v2, 1  ;;  %v1687_v23 = vrot.slane %v1685_v14, 1  ;;  %v919_v26 = vld [vmem:[#allocation2 + $0x78] sm:$0xe]  ;;  %v3461_v33 = vcombine.low %v855_v19, %v4053_v61  ;;  %v4199_v35 = vld [vmem:[#allocation2 + $0x28] sm:$0xf] }
  0x5b   : > { %v784_v31 = vld [vmem:[#allocation2 + $0x18] sm:$0xe]  ;;  %v912_v39 = vld [vmem:[#allocation2 + $0x24] sm:$0xe]  ;;  %v2096_v40 = vshll.u32 %v3469_v21, 16  ;;  %v3508_v28 = vcombine.low %v919_v26, %v4172_v62  ;;  %v2354_v44 = vrot.slane %v4169_v57, 1  ;;  %v4212_v17 = vcombine.low %v740_v34, %v4199_v35 }
  0x5c   : > { %v2092_v25 = vsel %vm1055_vm10, %v2087_v9, %v2091_v56  ;;  %v4203_v37 = vld [vmem:[#allocation2 + $0x2c] ss:$0 sps:$4 sm:$0x11]   ;;  %v1688_v42 = vsel %vm1055_vm10, %v1683_v22, %v1687_v23  ;;  %v4208_v45 = vld [vmem:[#allocation2 + $0x20] ss:$0 sps:$4 sm:$0x11]   ;;  %v3406_v47 = vcombine.low %v784_v31, %v4164_v49  ;;  %v3501_v51 = vcombine.low %v912_v39, %v4182_v11 }
  0x5d   : > { %1891 = vrot.lane.b32.xlu0 %v1846_v41, %s3862_s29  ;;  %v696_v61 = vld [vmem:[#allocation2 + $0x8c] sm:$0x1]  ;;  %v2178_v46 = vshrl.u32 %v3476_v20, 16  ;;  %v2182_v38 = vrot.slane %v2180_v13, 1  ;;  %v754_v48 = vld [vmem:[#allocation2 + $0x78] sm:$0xf]  ;;  %v2355_v62 = vsel %vm1328_vm9, %v2353_v54, %v2354_v44 }
  0x5e   : > { %1905 = vrot.lane.b32.xlu1 %v1867_v7, %s3862_s29  ;;  %v1868_v24 = vrot.slane %v3461_v33, 1  ;;  %v1081_v52 = vshrl.u32 %v4187_v16, 16  ;;  %v1085_v53 = vrot.slane %v1083_v30, 1  ;;  %v4216_v55 = vld [vmem:[#allocation2 + $0x80] ss:$0 sps:$4 sm:$0x11]   ;;  %v697_v4 = vsel %vm3937_vm3, %v485_v29, %v696_v61 }
  0x5f   : > { %v2094_v57 = vshrl.u32 %v3469_v21, 16  ;;  %v2098_v58 = vrot.slane %v2096_v40, 1  ;;  %v2101_v49 = vshll.u32 %v4203_v37, 16  ;;  %v4223_v59 = vld [vmem:[#allocation2 + $0x7c] sm:$0xf]  ;;  %v1869_v60 = vrot.slane %v4176_v3, 1 }
  0x60   : > { %v881_v63 = vld [vmem:[#allocation2 + $0x84] sm:$0xf]  ;;  %v4227_v2 = vld [vmem:[#allocation2 + $0x88] sm:$0xf]  ;;  %v1088_v32 = vshll.u32 %v4208_v45, 16  ;;  %v2183_v5 = vor.u32 %v2182_v38, %v2178_v46  ;;  %v1335_v6 = vrot.slane %v3406_v47, 1  ;;  %v4235_v3 = vcombine.low %v754_v48, %v4223_v59 }
  0x61   : > { %1779 = vrot.lane.b32.xlu0 %v1688_v42, %s3863_s30  ;;  %698 = vst [vmem:[#allocation2 + $0x8c] sm:$0x1] %v697_v4  ;;  %v4230_v7 = vld [vmem:[#allocation2 + $0x2c] ss:$0 sps:$4 sm:$0x11]   ;;  %v1095_v9 = vshll.u32 %v4212_v17, 16  ;;  %v2099_v56 = vor.u32 %v2098_v58, %v2094_v57  ;;  %v3477_v18 = vcombine.low %v881_v63, %v4227_v2  ;;  %v1870_v22 = vsel %vm1328_vm9, %v1868_v24, %v1869_v60 }
  0x62   : > { %2273 = vrot.lane.b32.xlu1 %v2092_v25, %s3865_s4  ;;  %v2356_v11 = vrot.slane %v3501_v51, 1  ;;  %v2185_v12 = vshll.u32 %v4216_v55, 16  ;;  %v2377_v14 = vrot.slane %v3508_v28, 1  ;;  %v2103_v15 = vrot.slane %v2101_v49, 1  ;;  %v271_v41 = vld [vmem:[%s3963_s25 + $0x18] sm:$0xf] }
  0x63   : > { %v2357_v19 = vrot.slane %v4203_v37, 1  ;;  %v920_v23 = vld [vmem:[#allocation2 + $0x84] sm:$0xe]  ;;  %v1086_v25 = vor.u32 %v1085_v53, %v1081_v52  ;;  %v1090_v26 = vrot.slane %v1088_v32, 1  ;;  %v1177_v13 = vshrl.u32 %v4235_v3, 16 }
  0x64   : > { %v1093_v54 = vshrl.u32 %v4212_v17, 16  ;;  %v1097_v29 = vrot.slane %v1095_v9, 1  ;;  %v1100_v30 = vshll.u32 %v4230_v7, 16  ;;  %v272_v31 = vld [vmem:[%s3963_s25 + $0x1c] sm:$0xf]  ;;  %v2187_v33 = vrot.slane %v2185_v12, 1 }
  0x65   : > { %2003 = vrot.lane.b32.xlu0 %v3469_v21, %s3864_s3  ;;  %v2192_v21 = vshll.u32 %v3477_v18, 16  ;;  %v1336_v34 = vrot.slane %v4208_v45, 1  ;;  %v4249_v40 = vld [vmem:[#allocation2 + $0x80] ss:$0 sps:$4 sm:$0x11]   ;;  %v351_v42 = vshrl.u32 %v271_v41, 16  ;;  %v2104_v28 = vsel %vm1055_vm10, %v2099_v56, %v2103_v15 }
  0x66   : > { %2017 = vrot.lane.b32.xlu1 %v3476_v20, %s3864_s3  ;;  %v785_v20 = vld [vmem:[#allocation2 + $0x24] sm:$0xe]  ;;  %v792_v37 = vld [vmem:[#allocation2 + $0x78] sm:$0xe]  ;;  %v3509_v44 = vcombine.low %v920_v23, %v4227_v2  ;;  %v2358_v61 = vsel %vm1328_vm9, %v2356_v11, %v2357_v19  ;;  %v4256_v38 = vld [vmem:[#allocation2 + $0x28] sm:$0xf]  ;;  %v1098_v51 = vor.u32 %v1097_v29, %v1093_v54  ;;  %v1091_v60 = vsel %vm1055_vm10, %v1086_v25, %v1090_v26 }
  0x67   : > { %v3407_v39 = vcombine.low %v785_v20, %v4199_v35  ;;  %v802_v46 = vld [vmem:[#allocation2 + $0x24] sm:$0xf]  ;;  %v2378_v45 = vrot.slane %v4216_v55, 1  ;;  %v2190_v35 = vshrl.u32 %v3477_v18, 16  ;;  %v1179_v47 = vshll.u32 %v4235_v3, 16 }
  0x68   : > { %v354_v48 = vshll.u32 %v271_v41, 16  ;;  %v1102_v24 = vrot.slane %v1100_v30, 1  ;;  %v2194_v52 = vrot.slane %v2192_v21, 1  ;;  %v1339_v53 = vrot.slane %v4230_v7, 1  ;;  %v643_v32 = vld [vmem:[#allocation2 + $0x30] sm:$0xf] }
  0x69   : > { %1907 = vrot.lane.b32.xlu0 %v1870_v22, %s3862_s29  ;;  %v1338_v57 = vrot.slane %v3407_v39, 1  ;;  %v1184_v58 = vshll.u32 %v4249_v40, 16  ;;  %v353_v49 = vrot.slane %v351_v42, 7  ;;  %v359_v4 = vshrl.u32 %v272_v31, 16  ;;  %v223_v56 = vld [vmem:[#allocation2 + $0x38] sm:$0x1] }
  0x6a   : > { %2401 = vrot.lane.b32.xlu1 %v2355_v62, %s3866_s5  ;;  %v1337_v55 = vsel %vm1328_vm9, %v1335_v6, %v1336_v34  ;;  %v4266_v62 = vld [vmem:[#allocation2 + $0x8c] ss:$0 sps:$4 sm:$0x11]   ;;  %v3414_v63 = vcombine.low %v792_v37, %v4223_v59  ;;  %v362_v2 = vshll.u32 %v272_v31, 16  ;;  %v2188_v7 = vsel %vm1055_vm10, %v2183_v5, %v2187_v33  ;;  %v191_v15 = vld [vmem:[#allocation2 + $0x90] sm:$0x1] }
  0x6b   : > { %v1181_v9 = vrot.slane %v1179_v47, 1  ;;  %v4271_v11 = vcombine.low %v802_v46, %v4256_v38  ;;  %v356_v12 = vor.u32 %v354_v48, %v353_v49  ;;  %v4274_v6 = vor.u32 %v2194_v52, %v2190_v35  ;;  %v756_v19 = vld [vmem:[#allocation2 + $0x84] sm:$0xf]  ;;  %v287_v59 = vld [vmem:[%s3963_s25 + $0x58] sm:$0xf] }
  0x6c   : > { %v357_v20 = vrot.slane %v353_v49, 4  ;;  %v4276_v41 = vrot.slane %v359_v4, 7  ;;  %v288_v22 = vld [vmem:[%s3963_s25 + $0x5c] sm:$0xf]  ;;  %v1103_v23 = vsel %vm1055_vm10, %v1098_v51, %v1102_v24  ;;  %v1340_v5 = vsel %vm1328_vm9, %v1338_v57, %v1339_v53  ;;  %v4282_v26 = vld [vmem:[#allocation2 + $0x88] sm:$0xf] }
  0x6d   : > { %2275 = vrot.lane.b32.xlu0 %v2104_v28, %s3865_s4  ;;  %v2380_v25 = vrot.slane %v3509_v44, 1  ;;  %v4284_v21 = vld [vmem:[#allocation2 + $0x2c] ss:$0 sps:$4 sm:$0x11]   ;;  %v2197_v54 = vshll.u32 %v4266_v62, 16  ;;  %v4291_v29 = vrot.slane %v1184_v58, 1  ;;  %v4298_v39 = vor.u32 %v1181_v9, %v1177_v13 }
  0x6e   : > { %2019 = vrot.lane.b32.xlu1 %v3477_v18, %s3864_s3  ;;  %v2379_v18 = vsel %vm1328_vm9, %v2377_v14, %v2378_v45  ;;  %v644_v14 = vsel %vm3981_vm7, %v356_v12, %v643_v32  ;;  %v4293_v30 = vrot.slane %v3414_v63, 1  ;;  %v364_v31 = vor.u32 %v362_v2, %v4276_v41  ;;  %v247_v33 = vld [vmem:[#allocation2 + $0x98] sm:$0x1]  ;;  %v170_v34 = vld [vmem:[#allocation2 + $0x3c] sm:$0x1] }
  0x6f   : > { %645 = vst [vmem:[#allocation2 + $0x30] sm:$0xf] %v644_v14  ;;  %v1596_v37 = vshll.u32 %v4271_v11, 16  ;;  %v1360_v42 = vrot.slane %v4249_v40, 1  ;;  %v224_v28 = vsel %vm3956_vm5, 0, %v223_v56  ;;  %v1594_v46 = vshrl.u32 %v4271_v11, 16 }
  0x70   : > { %v4305_v44 = vld [vmem:[%s3963_s25 + $0x20] sm:$0xf]  ;;  %v365_v45 = vsel %vm3989_vm8, %v357_v20, %v364_v31  ;;  %v818_v13 = vld [vmem:[#allocation2 + $0x84] sm:$0xf]  ;;  %225 = vst [vmem:[#allocation2 + $0x38] sm:$0x1] %v224_v28 }
  0x71   : > { %1252 = vrot.lane.b32.xlu0 %v1091_v60, %s3861_s28  ;;  %v192_v35 = vsel %vm3937_vm3, 0, %v191_v15  ;;  %v1601_v47 = vshll.u32 %v4284_v21, 16  ;;  %646 = vst.msk [vmem:[#allocation2 + $0x34] sm:$0xf] %vm143_vm0, %v365_v45  ;;  %v4317_v48 = vld [vmem:[#allocation2 + $0x88] sm:$0xf] }
  0x72   : > { %2403 = vrot.lane.b32.xlu1 %v2358_v61, %s3866_s5  ;;  %v4308_v61 = vcombine.low %v756_v19, %v4282_v26  ;;  %193 = vst [vmem:[#allocation2 + $0x90] sm:$0x1] %v192_v35  ;;  %v487_v51 = vshrl.u32 %v287_v59, 16  ;;  %v490_v24 = vshll.u32 %v287_v59, 16  ;;  %v495_v52 = vshrl.u32 %v288_v22, 16 }
  0x73   : > { %v4320_v53 = vld [vmem:[%s3963_s25 + $0x24] sm:$0xf]  ;;  %v2199_v57 = vrot.slane %v2197_v54, 1  ;;  %v2381_v58 = vrot.slane %v4266_v62, 1  ;;  %v498_v4 = vshll.u32 %v288_v22, 16  ;;  %v248_v32 = vsel %vm3956_vm5, 0, %v247_v33 }
  0x74   : > { %v1189_v49 = vshrl.u32 %v4308_v61, 16  ;;  %v226_v60 = vld [vmem:[#allocation2 + $0x44] sm:$0x1]  ;;  %v489_v63 = vrot.slane %v487_v51, 7  ;;  %v497_v2 = vrot.slane %v495_v52, 7  ;;  %v171_v9 = vsel %vm3937_vm3, 0, %v170_v34 }
  0x75   : > { %2289 = vrot.lane.b32.xlu0 %v2188_v7, %s3865_s4  ;;  %v1191_v7 = vshll.u32 %v4308_v61, 16  ;;  %v366_v12 = vrot.slane %v4276_v41, 4  ;;  %v4333_v56 = vcombine.low %v818_v13, %v4317_v48  ;;  %249 = vst [vmem:[#allocation2 + $0x98] sm:$0x1] %v248_v32  ;;  %172 = vst [vmem:[#allocation2 + $0x3c] sm:$0x1] %v171_v9  ;;  %v2382_v41 = vsel %vm1328_vm9, %v2380_v25, %v2381_v58 }
  0x76   : > { %1381 = vrot.lane.b32.xlu1 %v1337_v55, %s3859_s26  ;;  %v194_v55 = vld [vmem:[#allocation2 + $0x9c] sm:$0x1]  ;;  %v368_v62 = vshrl.u32 %v4305_v44, 16  ;;  %v4336_v15 = vld [vmem:[#allocation2 + $0x8c] ss:$0 sps:$4 sm:$0x11]   ;;  %v500_v20 = vor.u32 %v498_v4, %v497_v2  ;;  %v2200_v31 = vsel %vm1055_vm10, %v4274_v6, %v2199_v57  ;;  %v1187_v57 = vsel %vm1055_vm10, %v4298_v39, %v4291_v29 }
  0x77   : > { %v493_v19 = vrot.slane %v489_v63, 4  ;;  %v371_v59 = vshll.u32 %v4305_v44, 16  ;;  %v1598_v22 = vrot.slane %v1596_v37, 1  ;;  %v376_v54 = vshrl.u32 %v4320_v53, 16  ;;  %v647_v33 = vld [vmem:[#allocation2 + $0x38] sm:$0x1] }
  0x78   : > { %v370_v14 = vrot.slane %v368_v62, 7  ;;  %v227_v28 = vsel %vm3956_vm5, 0, %v226_v60  ;;  %v648_v25 = vsel %vm3937_vm3, %v366_v12, %v647_v33  ;;  %v502_v37 = vrot.slane %v497_v2, 4  ;;  %v848_v45 = vld [vmem:[#allocation2 + $0x24] sm:$0xe] }
  0x79   : > { %1254 = vrot.lane.b32.xlu0 %v1103_v23, %s3861_s28  ;;  %v501_v34 = vsel %vm3989_vm8, %v493_v19, %v500_v20  ;;  %v195_v23 = vsel %vm3937_vm3, 0, %v194_v55  ;;  %v699_v44 = vld [vmem:[#allocation2 + $0x90] sm:$0xf]  ;;  %v379_v6 = vshll.u32 %v4320_v53, 16  ;;  %228 = vst [vmem:[#allocation2 + $0x44] sm:$0x1] %v227_v28  ;;  %v1361_v58 = vsel %vm1328_vm9, %v4293_v30, %v1360_v42 }
  0x7a   : > { %2417 = vrot.lane.b32.xlu1 %v2379_v18, %s3866_s5  ;;  %v492_v18 = vor.u32 %v490_v24, %v489_v63  ;;  %702 = vst.msk [vmem:[#allocation2 + $0x94] sm:$0xf] %vm143_vm0, %v501_v34  ;;  %196 = vst [vmem:[#allocation2 + $0x9c] sm:$0x1] %v195_v23  ;;  %v1193_v13 = vrot.slane %v1191_v7, 1  ;;  %v1196_v35 = vshll.u32 %v4336_v15, 16  ;;  %v373_v51 = vor.u32 %v371_v59, %v370_v14 }
  0x7b   : > { %649 = vst [vmem:[#allocation2 + $0x38] sm:$0x1] %v648_v25  ;;  %v374_v24 = vrot.slane %v370_v14, 4  ;;  %v378_v52 = vrot.slane %v376_v54, 7  ;;  %v4361_v53 = vld [vmem:[%s3963_s25 + $0x60] sm:$0xf]  ;;  %v1599_v4 = vor.u32 %v1598_v22, %v1594_v46  ;;  %v3454_v2 = vcombine.low %v848_v45, %v4256_v38 }
  0x7c   : > { %v804_v60 = vld [vmem:[#allocation2 + $0x30] sm:$0xf]  ;;  %v4372_v55 = vld [vmem:[#allocation2 + $0x34] sm:$0xf]  ;;  %v703_v63 = vld [vmem:[#allocation2 + $0x98] sm:$0x1] }
  0x7d   : > { %2291 = vrot.lane.b32.xlu0 %v2200_v31, %s3865_s4  ;;  %v704_v32 = vsel %vm3937_vm3, %v502_v37, %v703_v63  ;;  %v381_v9 = vor.u32 %v379_v6, %v378_v52  ;;  %v383_v7 = vrot.slane %v378_v52, 4  ;;  %v650_v29 = vld [vmem:[#allocation2 + $0x3c] sm:$0xf]  ;;  %v290_v39 = vld [vmem:[%s3963_s25 + $0x64] sm:$0xf]  ;;  %v1692_v40 = vshll.u32 %v4333_v56, 16 }
  0x7e   : > { %1383 = vrot.lane.b32.xlu1 %v1340_v5, %s3859_s26  ;;  %v1603_v5 = vrot.slane %v1601_v47, 1  ;;  %v700_v47 = vsel %vm3981_vm7, %v492_v18, %v699_v44  ;;  %v793_v12 = vld [vmem:[#allocation2 + $0x84] sm:$0xe]  ;;  %v4379_v30 = vld [vmem:[#allocation2 + $0x8c] ss:$0 sps:$4 sm:$0x11]   ;;  %v651_v42 = vsel %vm3981_vm7, %v373_v51, %v650_v29  ;;  %v3423_v38 = vcombine.low %v804_v60, %v4372_v55 }
  0x7f   : > { %701 = vst [vmem:[#allocation2 + $0x90] sm:$0xf] %v700_v47  ;;  %705 = vst [vmem:[#allocation2 + $0x98] sm:$0x1] %v704_v32  ;;  %v382_v46 = vsel %vm3989_vm8, %v374_v24, %v381_v9  ;;  %v504_v62 = vshrl.u32 %v4361_v53, 16  ;;  %v1194_v18 = vor.u32 %v1193_v13, %v1189_v49  ;;  %v1198_v19 = vrot.slane %v1196_v35, 1 }
  0x80   : > { %652 = vst [vmem:[#allocation2 + $0x3c] sm:$0xf] %v651_v42  ;;  %v1604_v20 = vsel %vm1055_vm10, %v1599_v4, %v1603_v5  ;;  %653 = vst.msk [vmem:[#allocation2 + $0x40] sm:$0xf] %vm143_vm0, %v382_v46  ;;  %v654_v59 = vld [vmem:[#allocation2 + $0x44] sm:$0x1]  ;;  %v3415_v22 = vcombine.low %v793_v12, %v4282_v26 }
  0x81   : > { %1268 = vrot.lane.b32.xlu0 %v1187_v57, %s3861_s28  ;;  %v1847_v14 = vrot.slane %v3454_v2, 1  ;;  %v655_v54 = vsel %vm3937_vm3, %v383_v7, %v654_v59  ;;  %v1848_v31 = vrot.slane %v4284_v21, 1  ;;  %v1690_v33 = vshrl.u32 %v4333_v56, 16  ;;  %v867_v23 = vld [vmem:[#allocation2 + $0x30] sm:$0xf] }
  0x82   : > { %2419 = vrot.lane.b32.xlu1 %v2382_v41, %s3866_s5  ;;  %v512_v41 = vshrl.u32 %v290_v39, 16  ;;  %v1694_v34 = vrot.slane %v1692_v40, 1  ;;  %v1697_v49 = vshll.u32 %v4379_v30, 16  ;;  %656 = vst [vmem:[#allocation2 + $0x44] sm:$0x1] %v655_v54  ;;  %v1608_v28 = vshll.u32 %v3423_v38, 16 }
  0x83   : > { %v4402_v26 = vld [vmem:[#allocation2 + $0x34] sm:$0xf]  ;;  %v506_v5 = vrot.slane %v504_v62, 7  ;;  %v1199_v25 = vsel %vm1055_vm10, %v1194_v18, %v1198_v19  ;;  %v4405_v37 = vld [vmem:[#allocation2 + $0x38] ss:$0 sps:$4 sm:$0x11]   ;;  %v1849_v57 = vsel %vm1328_vm9, %v1847_v14, %v1848_v31 }
  0x84   : > { %v507_v21 = vshll.u32 %v4361_v53, 16  ;;  %v4408_v44 = vrot.slane %v512_v41, 7  ;;  %v515_v6 = vshll.u32 %v290_v39, 16  ;;  %v1362_v45 = vrot.slane %v3415_v22, 1  ;;  %v856_v47 = vld [vmem:[#allocation2 + $0x84] sm:$0xe] }
  0x85   : > { %1493 = vrot.lane.b32.xlu0 %v4271_v11, %s3860_s27  ;;  %v1363_v13 = vrot.slane %v4336_v15, 1  ;;  %v1695_v11 = vor.u32 %v1694_v34, %v1690_v33  ;;  %v1699_v35 = vrot.slane %v1697_v49, 1  ;;  %v1606_v51 = vshrl.u32 %v3423_v38, 16  ;;  %v4418_v15 = vld [vmem:[#allocation2 + $0x94] sm:$0xf] }
  0x86   : > { %1397 = vrot.lane.b32.xlu1 %v1361_v58, %s3859_s26  ;;  %v3470_v24 = vcombine.low %v867_v23, %v4402_v26  ;;  %v510_v52 = vrot.slane %v506_v5, 4  ;;  %v517_v53 = vor.u32 %v515_v6, %v4408_v44  ;;  %v1610_v58 = vrot.slane %v1608_v28, 1  ;;  %v820_v63 = vld [vmem:[#allocation2 + $0x90] sm:$0xf]  ;;  %v706_v2 = vld [vmem:[#allocation2 + $0x9c] sm:$0xf] }
  0x87   : > { %v1613_v4 = vshll.u32 %v4405_v37, 16  ;;  %v509_v60 = vor.u32 %v507_v21, %v506_v5  ;;  %v3462_v32 = vcombine.low %v856_v47, %v4317_v48  ;;  %v1700_v9 = vsel %vm1055_vm10, %v1695_v11, %v1699_v35  ;;  %v849_v39 = vld [vmem:[#allocation2 + $0x30] sm:$0xe]  ;;  %v4428_v46 = vld [vmem:[#allocation2 + $0x38] ss:$0 sps:$4 sm:$0x11]  }
  0x88   : > { %v2108_v7 = vshll.u32 %v3470_v24, 16  ;;  %v518_v29 = vsel %vm3989_vm8, %v510_v52, %v517_v53  ;;  %v1611_v40 = vor.u32 %v1610_v58, %v1606_v51  ;;  %v3431_v42 = vcombine.low %v820_v63, %v4418_v15  ;;  %v250_v59 = vld [vmem:[#allocation2 + $0xa4] sm:$0x1]  ;;  %v4438_v14 = vld [vmem:[#allocation2 + $0x98] ss:$0 sps:$4 sm:$0x11]  }
  0x89   : > { %1270 = vrot.lane.b32.xlu0 %v1199_v25, %s3861_s28  ;;  %v1615_v12 = vrot.slane %v1613_v4, 1  ;;  %v707_v48 = vsel %vm3981_vm7, %v509_v60, %v706_v2  ;;  %709 = vst.msk [vmem:[#allocation2 + $0xa0] sm:$0xf] %vm143_vm0, %v518_v29  ;;  %v1872_v62 = vrot.slane %v4379_v30, 1  ;;  %v3455_v18 = vcombine.low %v849_v39, %v4372_v55  ;;  %v913_v31 = vld [vmem:[#allocation2 + $0x30] sm:$0xe] }
  0x8a   : > { %1765 = vrot.lane.b32.xlu1 %v1604_v20, %s3863_s30  ;;  %708 = vst [vmem:[#allocation2 + $0x9c] sm:$0xf] %v707_v48  ;;  %v2106_v19 = vshrl.u32 %v3470_v24, 16  ;;  %v2110_v20 = vrot.slane %v2108_v7, 1  ;;  %v1704_v22 = vshll.u32 %v3431_v42, 16  ;;  %v2113_v54 = vshll.u32 %v4428_v46, 16 }
  0x8b   : > { %v1616_v41 = vsel %vm1055_vm10, %v1611_v40, %v1615_v12  ;;  %v869_v30 = vld [vmem:[#allocation2 + $0x3c] sm:$0xf]  ;;  %v4442_v34 = vld [vmem:[#allocation2 + $0x40] sm:$0xf]  ;;  %v742_v55 = vld [vmem:[#allocation2 + $0x30] sm:$0xf]  ;;  %v3502_v35 = vcombine.low %v913_v31, %v4402_v26 }
  0x8c   : > { %v4444_v49 = vld [vmem:[#allocation2 + $0x34] sm:$0xf]  ;;  %v1850_v28 = vrot.slane %v3455_v18, 1  ;;  %v1851_v23 = vrot.slane %v4405_v37, 1  ;;  %v2111_v5 = vor.u32 %v2110_v20, %v2106_v19  ;;  %v251_v25 = vsel %vm3956_vm5, 0, %v250_v59 }
  0x8d   : > { %1495 = vrot.lane.b32.xlu0 %v3423_v38, %s3860_s27  ;;  %v1871_v38 = vrot.slane %v3462_v32, 1  ;;  %v857_v21 = vld [vmem:[#allocation2 + $0x90] sm:$0xe]  ;;  %v1702_v6 = vshrl.u32 %v3431_v42, 16  ;;  %v2115_v11 = vrot.slane %v2113_v54, 1  ;;  %v4454_v47 = vcombine.low %v869_v30, %v4442_v34 }
  0x8e   : > { %1509 = vrot.lane.b32.xlu1 %v4333_v56, %s3860_s27  ;;  %v1364_v56 = vsel %vm1328_vm9, %v1362_v45, %v1363_v13  ;;  %v1706_v45 = vrot.slane %v1704_v22, 1  ;;  %v1709_v13 = vshll.u32 %v4438_v14, 16  ;;  %252 = vst [vmem:[#allocation2 + $0xa4] sm:$0x1] %v251_v25  ;;  %v3463_v51 = vcombine.low %v857_v21, %v4418_v15  ;;  %v4460_v52 = vld [vmem:[#allocation2 + $0x94] sm:$0xf] }
  0x8f   : > { %v1873_v33 = vsel %vm1328_vm9, %v1871_v38, %v1872_v62  ;;  %v1852_v37 = vsel %vm1328_vm9, %v1850_v28, %v1851_v23  ;;  %v4463_v53 = vcombine.low %v742_v55, %v4444_v49  ;;  %v2116_v58 = vsel %vm1055_vm10, %v2111_v5, %v2115_v11  ;;  %v4467_v15 = vld [vmem:[#allocation2 + $0x30] sm:$0xe]  ;;  %v173_v60 = vld [vmem:[#allocation2 + $0x48] sm:$0x1]  ;;  %v914_v63 = vld [vmem:[#allocation2 + $0x3c] sm:$0xe] }
  0x90   : > { %v1711_v26 = vrot.slane %v1709_v13, 1  ;;  %v519_v4 = vrot.slane %v4408_v44, 4  ;;  %v2120_v2 = vshll.u32 %v4454_v47, 16  ;;  %v2359_v32 = vrot.slane %v3502_v35, 1  ;;  %v4486_v62 = vld [vmem:[#allocation2 + $0x90] sm:$0xe] }
  0x91   : > { %1399 = vrot.lane.b32.xlu0 %v1364_v56, %s3859_s26  ;;  %v275_v56 = vld [vmem:[%s3963_s25 + $0x28] sm:$0xf]  ;;  %v4474_v7 = vld [vmem:[#allocation2 + $0x44] ss:$0 sps:$4 sm:$0x11]   ;;  %v1874_v44 = vrot.slane %v3463_v51, 1  ;;  %v3408_v12 = vcombine.low %v4467_v15, %v4444_v49  ;;  %v3503_v38 = vcombine.low %v914_v63, %v4442_v34 }
  0x92   : > { %1893 = vrot.lane.b32.xlu1 %v1849_v57, %s3862_s29  ;;  %v1707_v57 = vor.u32 %v1706_v45, %v1702_v6  ;;  %v4476_v29 = vld [vmem:[#allocation2 + $0x38] ss:$0 sps:$4 sm:$0x11]   ;;  %v2360_v39 = vrot.slane %v4428_v46, 1  ;;  %v1107_v40 = vshll.u32 %v4463_v53, 16  ;;  %v1875_v46 = vrot.slane %v4438_v14, 1 }
  0x93   : > { %v4489_v19 = vld [vmem:[#allocation2 + $0x98] ss:$0 sps:$4 sm:$0x11]   ;;  %v2118_v59 = vshrl.u32 %v4454_v47, 16  ;;  %v174_v22 = vsel %vm3937_vm3, 0, %v173_v60  ;;  %v2125_v31 = vshll.u32 %v4474_v7, 16  ;;  %v3510_v14 = vcombine.low %v4486_v62, %v4460_v52 }
  0x94   : > { %v1712_v48 = vsel %vm1055_vm10, %v1707_v57, %v1711_v26  ;;  %v276_v54 = vld [vmem:[%s3963_s25 + $0x2c] sm:$0xf]  ;;  %v1112_v30 = vshll.u32 %v4476_v29, 16  ;;  %v744_v34 = vld [vmem:[#allocation2 + $0x3c] sm:$0xf]  ;;  %v385_v55 = vshrl.u32 %v275_v56, 16  ;;  %v2361_v49 = vsel %vm1328_vm9, %v2359_v32, %v2360_v39 }
  0x95   : > { %1767 = vrot.lane.b32.xlu0 %v1616_v41, %s3863_s30  ;;  %v2122_v41 = vrot.slane %v2120_v2, 1  ;;  %175 = vst [vmem:[#allocation2 + $0x48] sm:$0x1] %v174_v22  ;;  %v4511_v5 = vld [vmem:[#allocation2 + $0xa0] sm:$0xf]  ;;  %v1109_v25 = vrot.slane %v1107_v40, 1 }
  0x96   : > { %1781 = vrot.lane.b32.xlu1 %v1700_v9, %s3863_s30  ;;  %v4513_v21 = vld [vmem:[#allocation2 + $0x40] sm:$0xf]  ;;  %v388_v6 = vshll.u32 %v275_v56, 16  ;;  %v885_v45 = vld [vmem:[#allocation2 + $0x9c] sm:$0xf]  ;;  %v2209_v13 = vshll.u32 %v4489_v19, 16 }
  0x97   : > { %v387_v11 = vrot.slane %v385_v55, 7  ;;  %v393_v35 = vshrl.u32 %v276_v54, 16  ;;  %v396_v51 = vshll.u32 %v276_v54, 16  ;;  %v4518_v26 = vld [vmem:[#allocation2 + $0x44] ss:$0 sps:$4 sm:$0x11]   ;;  %v4529_v2 = vcombine.low %v885_v45, %v4511_v5 }
  0x98   : > { %v2127_v63 = vrot.slane %v2125_v31, 1  ;;  %v2363_v32 = vrot.slane %v4474_v7, 1  ;;  %v787_v56 = vld [vmem:[#allocation2 + $0x3c] sm:$0xe]  ;;  %v1114_v39 = vrot.slane %v1112_v30, 1  ;;  %v2211_v40 = vrot.slane %v2209_v13, 1 }
  0x99   : > { %1511 = vrot.lane.b32.xlu0 %v3431_v42, %s3860_s27  ;;  %v710_v42 = vld [vmem:[#allocation2 + $0xa4] sm:$0x1]  ;;  %v391_v15 = vrot.slane %v387_v11, 4  ;;  %v4523_v60 = vrot.slane %v393_v35, 7  ;;  %v4541_v22 = vld [vmem:[#allocation2 + $0x94] sm:$0xf] }
  0x9a   : > { %2005 = vrot.lane.b32.xlu1 %v3470_v24, %s3864_s3  ;;  %v883_v24 = vld [vmem:[#allocation2 + $0x90] sm:$0xf]  ;;  %v711_v20 = vsel %vm3937_vm3, %v519_v4, %v710_v42  ;;  %v4521_v4 = vcombine.low %v744_v34, %v4513_v21  ;;  %v291_v30 = vld [vmem:[%s3963_s25 + $0x68] sm:$0xf]  ;;  %v922_v45 = vld [vmem:[#allocation2 + $0x9c] sm:$0xe] }
  0x9b   : > { %v4472_v9 = vcombine.low %v883_v24, %v4460_v52  ;;  %712 = vst [vmem:[#allocation2 + $0xa4] sm:$0x1] %v711_v20  ;;  %v2362_v24 = vrot.slane %v3503_v38, 1  ;;  %v398_v42 = vor.u32 %v396_v51, %v4523_v60  ;;  %v1342_v20 = vrot.slane %v4476_v29, 1 }
  0x9c   : > { %v1119_v7 = vshll.u32 %v4521_v4, 16  ;;  %v657_v31 = vld [vmem:[#allocation2 + $0x48] sm:$0xf]  ;;  %v2384_v35 = vrot.slane %v4489_v19, 1  ;;  %vm2750_vm11 = vcmask 1041408   ;;  %vm2433_vm12 = vcmask 31744  }
  0x9d   : > { %1895 = vrot.lane.b32.xlu0 %v1852_v37, %s3862_s29  ;;  %v2204_v18 = vshll.u32 %v4472_v9, 16  ;;  %v1876_v37 = vsel %vm1328_vm9, %v1874_v44, %v1875_v46  ;;  %v2202_v52 = vshrl.u32 %v4472_v9, 16  ;;  %v758_v46 = vld [vmem:[#allocation2 + $0x90] sm:$0xf]  ;;  %v399_v54 = vsel %vm3989_vm8, %v391_v15, %v398_v42 }
  0x9e   : > { %1909 = vrot.lane.b32.xlu1 %v1873_v33, %s3862_s29  ;;  %v1105_v33 = vshrl.u32 %v4463_v53, 16  ;;  %v4507_v28 = vpop.permute.xlu1 %1377  ;;  %660 = vst.msk [vmem:[#allocation2 + $0x4c] sm:$0xf] %vm143_vm0, %v399_v54  ;;  %v4567_v51 = vcombine.low %v758_v46, %v4541_v22  ;;  %v2216_v15 = vshll.u32 %v4529_v2, 16  ;;  %vm2466_vm13 = vcmask 64512  }
  0x9f   : > { %v2206_v57 = vrot.slane %v2204_v18, 1  ;;  %v1341_v18 = vrot.slane %v3408_v12, 1  ;;  %vm2499_vm14 = vcmask 97280   ;;  %vm2532_vm15 = vcmask 130048  }
  0xa0   : > { %v1110_v44 = vor.u32 %v1109_v25, %v1105_v33  ;;  %v197_v33 = vld [vmem:[#allocation2 + $0xa8] sm:$0x1]  ;;  %v2383_v25 = vrot.slane %v3510_v14, 1  ;;  %v1117_v14 = vshrl.u32 %v4521_v4, 16  ;;  %vm2565_vm1 = vcmask 162816  }
  0xa1   : > { %1783 = vrot.lane.b32.xlu0 %v1712_v48, %s3863_s30  ;;  %v229_v48 = vld [vmem:[#allocation2 + $0x50] sm:$0x1]  ;;  %vm2598_vm2 = vcmask 195584   ;;  %vm2631_vm4 = vcmask 228352   ;;  %vm2664_vm6 = vcmask 261120  }
  0xa2   : > { %2277 = vrot.lane.b32.xlu1 %v2116_v58, %s3865_s4  ;;  %v2123_v58 = vor.u32 %v2122_v41, %v2118_v59  ;;  %v1124_v59 = vshll.u32 %v4518_v26, 16  ;;  %v3409_v41 = vcombine.low %v787_v56, %v4513_v21  ;;  %v230_v12 = vsel %vm3956_vm5, 0, %v229_v48  ;;  %v292_v21 = vld [vmem:[%s3963_s25 + $0x6c] sm:$0xf]  ;;  %v4582_v56 = vld [vmem:[#allocation2 + $0x40] sm:$0xf] }
  0xa3   : > { %v4509_v23 = vpop.permute.xlu0 %1491  ;;  %v1115_v55 = vsel %vm1055_vm10, %v1110_v44, %v1114_v39  ;;  %231 = vst [vmem:[#allocation2 + $0x50] sm:$0x1] %v230_v12  ;;  %v521_v44 = vshrl.u32 %v291_v30, 16  ;;  %v4589_v39 = vld [vmem:[%s5564_s1 + $0x8] sm:$0xff]   ;;  %v400_v48 = vrot.slane %v4523_v60, 4  ;;  %v532_v46 = vshll.u32 %v292_v21, 16 }
  0xa4   : > { %v2128_v34 = vsel %vm1055_vm10, %v2123_v58, %v2127_v63  ;;  %v806_v58 = vld [vmem:[#allocation2 + $0x3c] sm:$0xf]  ;;  %v4592_v42 = vld [vmem:[#allocation2 + $0xa4] ss:$0 sps:$4 sm:$0x11]   ;;  %v2385_v54 = vsel %vm1328_vm9, %v2383_v25, %v2384_v35 }
  0xa5   : > { %2007 = vrot.lane.b32.xlu0 %v4454_v47, %s3864_s3  ;;  %v2207_v47 = vor.u32 %v2206_v57, %v2202_v52  ;;  %v4572_v52 = vrot.slane %v1124_v59, 1  ;;  %v1344_v57 = vrot.slane %v3409_v41, 1  ;;  %v4598_v59 = vcombine.low %v806_v58, %v4582_v56  ;;  %v3752_v58 = vld [vmem:[%s5564_s1] sm:$0xff]  }
  0xa6   : > { %2021 = vrot.lane.b32.xlu1 %v4472_v9, %s3864_s3  ;;  %v390_v9 = vor.u32 %v388_v6, %v387_v11  ;;  %v4533_v38 = vpop.permute.xlu1 %1489  ;;  %v3747_v6 = vld [vmem:[%s5564_s1 + $0x10] ss:$0 sps:$4 sm:$0x33]   ;;  %v1343_v11 = vsel %vm1328_vm9, %v1341_v18, %v1342_v20  ;;  %v1203_v18 = vshll.u32 %v4567_v51, 16  ;;  %v523_v20 = vrot.slane %v521_v44, 7 }
  0xa7   : > { %v4562_v13 = vsel %vm1055_vm10, %v2207_v47, %v2211_v40  ;;  %v3511_v40 = vcombine.low %v922_v45, %v4511_v5  ;;  %v524_v47 = vshll.u32 %v291_v30, 16  ;;  %3602 = vmatprep.subr.msk.bf16.mxu0 %vm2750_vm11, %v3747_v6  ;;  %v2752_v5 = vsel %vm2750_vm11, %v3747_v6, 0  ;;  %3603 = vmatprep.subr.msk.bf16.mxu1 %vm2750_vm11, %v3747_v6 }
  0xa8   : > { %v658_v29 = vsel %vm3981_vm7, %v390_v9, %v657_v31  ;;  %v198_v9 = vsel %vm3937_vm3, 0, %v197_v33  ;;  %v2214_v31 = vshrl.u32 %v4529_v2, 16  ;;  %v2218_v33 = vrot.slane %v2216_v15, 1  ;;  %3559 = vmatpush3.bf16.msra.mxu0 %v2752_v5  ;;  %3599 = vmatpush3.bf16.msra.mxu1 %v2752_v5 }
  0xa9   : > { %1911 = vrot.lane.b32.xlu0 %v1876_v37, %s3862_s29  ;;  %659 = vst [vmem:[#allocation2 + $0x48] sm:$0xf] %v658_v29  ;;  %v4569_v37 = vld [vmem:[#allocation2 + $0x98] ss:$0 sps:$4 sm:$0x11]   ;;  %v2221_v30 = vshll.u32 %v4592_v42, 16  ;;  %v526_v6 = vor.u32 %v524_v47, %v523_v20  ;;  %3560 = vmatprep.subr.bf16.mxu0 %v4589_v39 }
  0xaa   : > { %2405 = vrot.lane.b32.xlu1 %v2361_v49, %s3866_s5  ;;  %v4535_v62 = vpop.permute.xlu0 %1507  ;;  %v2364_v49 = vsel %vm1328_vm9, %v2362_v24, %v2363_v32  ;;  %v1121_v24 = vrot.slane %v1119_v7, 1  ;;  %v1345_v32 = vrot.slane %v4518_v26, 1  ;;  %199 = vst [vmem:[#allocation2 + $0xa8] sm:$0x1] %v198_v9  ;;  %v529_v26 = vshrl.u32 %v292_v21, 16  ;;  %3597 = vmatprep.subr.bf16.mxu1 %v4589_v39 }
  0xab   : > { %v1208_v7 = vshll.u32 %v4569_v37, 16  ;;  %v794_v29 = vld [vmem:[#allocation2 + $0x90] sm:$0xe]  ;;  %v661_v12 = vld [vmem:[#allocation2 + $0x50] sm:$0x1]  ;;  %v2386_v35 = vrot.slane %v3511_v40, 1 }
  0xac   : > { %v4600_v41 = vrot.slane %v529_v26, 7  ;;  %v1122_v60 = vor.u32 %v1121_v24, %v1117_v14  ;;  %v662_v21 = vsel %vm3937_vm3, %v400_v48, %v661_v12  ;;  %v253_v24 = vld [vmem:[#allocation2 + $0xb0] sm:$0x1]  ;;  %v1346_v15 = vsel %vm1328_vm9, %v1344_v57, %v1345_v32  ;;  %v176_v40 = vld [vmem:[#allocation2 + $0x54] sm:$0x1]  ;;  %3561 = vmatpush3.bf16.msra.mxu0 %v4589_v39  ;;  %3600 = vmatpush3.bf16.msra.mxu1 %v4589_v39 }
  0xad   : > { %2279 = vrot.lane.b32.xlu0 %v2128_v34, %s3865_s4  ;;  %v4577_v63 = vpop.permute.xlu1 %1505  ;;  %v760_v34 = vld [vmem:[#allocation2 + $0x9c] sm:$0xf]  ;;  %663 = vst [vmem:[#allocation2 + $0x50] sm:$0x1] %v662_v21  ;;  %v1210_v9 = vrot.slane %v1208_v7, 1  ;;  %v1620_v44 = vshll.u32 %v4598_v59, 16  ;;  %v3416_v48 = vcombine.low %v794_v29, %v4541_v22  ;;  %3562 = vmatprep.subr.bf16.mxu0 %v3752_v58 }
  0xae   : > { %2023 = vrot.lane.b32.xlu1 %v4529_v2, %s3864_s3  ;;  %v4579_v19 = vpop.permute.xlu0 %1248  ;;  %v1201_v2 = vshrl.u32 %v4567_v51, 16  ;;  %v534_v14 = vor.u32 %v532_v46, %v4600_v41  ;;  %v4626_v47 = vld [vmem:[%s3963_s25 + $0x30] sm:$0xf]  ;;  %v1127_v26 = vsel %vm1055_vm10, %v1122_v60, %v4572_v52  ;;  %v4637_v32 = vld [vmem:[#allocation2 + $0x44] ss:$0 sps:$4 sm:$0x11]   ;;  %v2219_v46 = vor.u32 %v2218_v33, %v2214_v31  ;;  %3598 = vmatprep.subr.bf16.mxu1 %v3752_v58 }
  0xaf   : > { %v2223_v7 = vrot.slane %v2221_v30, 1  ;;  %v822_v29 = vld [vmem:[#allocation2 + $0x9c] sm:$0xf]  ;;  %v4651_v31 = vld [vmem:[#allocation2 + $0xa0] sm:$0xf]  ;;  %v1365_v33 = vrot.slane %v3416_v48, 1 }
  0xb0   : > { %v1622_v12 = vrot.slane %v1620_v44, 1  ;;  %v177_v39 = vsel %vm3937_vm3, 0, %v176_v40  ;;  %v402_v30 = vshrl.u32 %v4626_v47, 16  ;;  %3563 = vmatpush3.bf16.msra.mxu0 %v3752_v58  ;;  %v405_v44 = vshll.u32 %v4626_v47, 16  ;;  %3601 = vmatpush3.bf16.msra.mxu1 %v3752_v58 }
  0xb1   : > { %1256 = vrot.lane.b32.xlu0 %v1115_v55, %s3861_s28  ;;  %v527_v55 = vrot.slane %v523_v20, 4  ;;  %v713_v20 = vld [vmem:[#allocation2 + $0xa8] sm:$0xf]  ;;  %178 = vst [vmem:[#allocation2 + $0x54] sm:$0x1] %v177_v39  ;;  %vm2717_vm11 = vcmask 293888  }
  0xb2   : > { %2407 = vrot.lane.b32.xlu1 %v2364_v49, %s3866_s5  ;;  %v4607_v49 = vld [vmem:[#allocation2 + $0xa0] sm:$0xf]  ;;  %v4613_v25 = vpop.permute.xlu0 %1379  ;;  %v714_v52 = vsel %vm3981_vm7, %v526_v6, %v713_v20  ;;  %v4663_v6 = vld [vmem:[#allocation2 + $0xa4] ss:$0 sps:$4 sm:$0x11]   ;;  %v536_v20 = vrot.slane %v4600_v41, 4 }
  0xb3   : > { %v4635_v57 = vcombine.low %v760_v34, %v4607_v49  ;;  %v535_v22 = vsel %vm3989_vm8, %v527_v55, %v534_v14  ;;  %715 = vst [vmem:[#allocation2 + $0xa8] sm:$0xf] %v714_v52  ;;  %v2224_v14 = vsel %vm1055_vm10, %v2219_v46, %v2223_v7 }
  0xb4   : > { %716 = vst.msk [vmem:[#allocation2 + $0xac] sm:$0xf] %vm143_vm0, %v535_v22  ;;  %v4676_v22 = vcombine.low %v822_v29, %v4651_v31  ;;  %v232_v29 = vld [vmem:[#allocation2 + $0x5c] sm:$0x1] }
  0xb5   : > { %2293 = vrot.lane.b32.xlu0 %v4562_v13, %s3865_s4  ;;  %v1366_v13 = vrot.slane %v4569_v37, 1  ;;  %v254_v37 = vsel %vm3956_vm5, 0, %v253_v24  ;;  %v1215_v55 = vshll.u32 %v4635_v57, 16  ;;  %v404_v24 = vrot.slane %v402_v30, 7 }
  0xb6   : > { %1385 = vrot.lane.b32.xlu1 %v1343_v11, %s3859_s26  ;;  %v1205_v11 = vrot.slane %v1203_v18, 1  ;;  %v2387_v18 = vrot.slane %v4592_v42, 1  ;;  %v278_v42 = vld [vmem:[%s3963_s25 + $0x34] sm:$0xf]  ;;  %255 = vst [vmem:[#allocation2 + $0xb0] sm:$0x1] %v254_v37  ;;  %v4659_v34 = vpop.permute.xlu0 %1395 }
  0xb7   : > { %v413_v48 = vshll.u32 %v278_v42, 16  ;;  %v1217_v47 = vrot.slane %v1215_v55, 1  ;;  %v408_v7 = vrot.slane %v404_v24, 4  ;;  %v1367_v52 = vsel %vm1328_vm9, %v1365_v33, %v1366_v13  ;;  %v4692_v33 = vld [vmem:[#allocation2 + $0xa4] ss:$0 sps:$4 sm:$0x11]  }
  0xb8   : > { %v4611_v45 = vpop.permute.xlu1 %1393  ;;  %v1206_v60 = vor.u32 %v1205_v11, %v1201_v2  ;;  %v2388_v21 = vsel %vm1328_vm9, %v2386_v35, %v2387_v18  ;;  %v1625_v2 = vshll.u32 %v4637_v32, 16  ;;  %v410_v11 = vshrl.u32 %v278_v42, 16  ;;  %v795_v42 = vld [vmem:[#allocation2 + $0x9c] sm:$0xe] }
  0xb9   : > { %1258 = vrot.lane.b32.xlu0 %v1127_v26, %s3861_s28  ;;  %v850_v26 = vld [vmem:[#allocation2 + $0x3c] sm:$0xe]  ;;  %v1213_v18 = vshrl.u32 %v4635_v57, 16  ;;  %v1716_v13 = vshll.u32 %v4676_v22, 16 }
  0xba   : > { %2421 = vrot.lane.b32.xlu1 %v2385_v54, %s3866_s5  ;;  %v1618_v54 = vshrl.u32 %v4598_v59, 16  ;;  %v1211_v35 = vsel %vm1055_vm10, %v1206_v60, %v1210_v9  ;;  %v1627_v46 = vrot.slane %v1625_v2, 1  ;;  %v1220_v9 = vshll.u32 %v4663_v6, 16  ;;  %v4684_v39 = vpop.permute.xlu0 %1250 }
  0xbb   : > { %v407_v60 = vor.u32 %v405_v44, %v404_v24  ;;  %v3456_v41 = vcombine.low %v850_v26, %v4582_v56  ;;  %v1218_v56 = vor.u32 %v1217_v47, %v1213_v18  ;;  %v200_v24 = vld [vmem:[#allocation2 + $0xb4] sm:$0x1]  ;;  %v293_v44 = vld [vmem:[%s3963_s25 + $0x70] sm:$0xf]  ;;  %v1854_v47 = vrot.slane %v4637_v32, 1 }
  0xbc   : > { %v4648_v5 = vpop.permute.xlu1 %1889  ;;  %v1623_v58 = vor.u32 %v1622_v12, %v1618_v54  ;;  %v4689_v54 = vld [vmem:[#allocation2 + $0x4c] sm:$0xf]  ;;  %v871_v32 = vld [vmem:[#allocation2 + $0x48] sm:$0xf] }
  0xbd   : > { %2295 = vrot.lane.b32.xlu0 %v2224_v14, %s3865_s4  ;;  %v717_v12 = vld [vmem:[#allocation2 + $0xb0] sm:$0x1]  ;;  %v1853_v18 = vrot.slane %v3456_v41, 1  ;;  %v4724_v41 = vld [vmem:[#allocation2 + $0x4c] sm:$0xf] }
  0xbe   : > { %1387 = vrot.lane.b32.xlu1 %v1346_v15, %s3859_s26  ;;  %v4671_v15 = vrot.slane %v410_v11, 7  ;;  %v718_v55 = vsel %vm3937_vm3, %v536_v20, %v717_v12  ;;  %v664_v11 = vld [vmem:[#allocation2 + $0x54] sm:$0xf]  ;;  %v1628_v14 = vsel %vm1055_vm10, %v1623_v58, %v1627_v46  ;;  %v3417_v20 = vcombine.low %v795_v42, %v4607_v49 }
  0xbf   : > { %719 = vst [vmem:[#allocation2 + $0xb0] sm:$0x1] %v718_v55  ;;  %v1714_v58 = vshrl.u32 %v4676_v22, 16  ;;  %v233_v46 = vsel %vm3956_vm5, 0, %v232_v29  ;;  %v201_v49 = vsel %vm3937_vm3, 0, %v200_v24  ;;  %v538_v42 = vshrl.u32 %v293_v44, 16 }
  0xc0   : > { %v4669_v40 = vpop.permute.xlu1 %1264  ;;  %v415_v37 = vor.u32 %v413_v48, %v4671_v15  ;;  %v1222_v48 = vrot.slane %v1220_v9, 1  ;;  %v1721_v9 = vshll.u32 %v4692_v33, 16  ;;  %234 = vst [vmem:[#allocation2 + $0x5c] sm:$0x1] %v233_v46  ;;  %202 = vst [vmem:[#allocation2 + $0xb4] sm:$0x1] %v201_v49 }
  0xc1   : > { %1272 = vrot.lane.b32.xlu0 %v1211_v35, %s3861_s28  ;;  %v294_v35 = vld [vmem:[%s3963_s25 + $0x74] sm:$0xf]  ;;  %v541_v29 = vshll.u32 %v293_v44, 16  ;;  %v4728_v55 = vld [vmem:[#allocation2 + $0x50] ss:$0 sps:$4 sm:$0x11]   ;;  %v2435_v44 = vsel %vm2433_vm12, %v4012_v8, %v4579_v19 }
  0xc2   : > { %2423 = vrot.lane.b32.xlu1 %v2388_v21, %s3866_s5  ;;  %v808_v21 = vld [vmem:[#allocation2 + $0x48] sm:$0xf]  ;;  %v416_v2 = vsel %vm3989_vm8, %v408_v7, %v415_v37  ;;  %v665_v7 = vsel %vm3981_vm7, %v407_v60, %v664_v11  ;;  %v4721_v60 = vpop.permute.xlu0 %1266  ;;  %v1223_v12 = vsel %vm1055_vm10, %v1218_v56, %v1222_v48  ;;  %v549_v11 = vshll.u32 %v294_v35, 16  ;;  %v858_v49 = vld [vmem:[#allocation2 + $0x9c] sm:$0xe] }
  0xc3   : > { %667 = vst.msk [vmem:[#allocation2 + $0x58] sm:$0xf] %vm143_vm0, %v416_v2  ;;  %v4704_v26 = vcombine.low %v808_v21, %v4689_v54  ;;  %666 = vst [vmem:[#allocation2 + $0x54] sm:$0xf] %v665_v7  ;;  %v546_v21 = vshrl.u32 %v294_v35, 16  ;;  %v540_v2 = vrot.slane %v538_v42, 7  ;;  %v1855_v56 = vsel %vm1328_vm9, %v1853_v18, %v1854_v47 }
  0xc4   : > { %v4687_v30 = vpop.permute.xlu1 %1761  ;;  %v1368_v24 = vrot.slane %v3417_v20, 1  ;;  %v4743_v20 = vcombine.low %v871_v32, %v4724_v41  ;;  %v1637_v18 = vshll.u32 %v4728_v55, 16  ;;  %v1723_v47 = vrot.slane %v1721_v9, 1  ;;  %v851_v9 = vld [vmem:[#allocation2 + $0x48] sm:$0xe] }
  0xc5   : > { %1497 = vrot.lane.b32.xlu0 %v4598_v59, %s3860_s27  ;;  %v4733_v7 = vrot.slane %v546_v21, 7  ;;  %v544_v46 = vrot.slane %v540_v2, 4  ;;  %v543_v35 = vor.u32 %v541_v29, %v540_v2  ;;  %v1630_v8 = vshrl.u32 %v4704_v26, 16 }
  0xc6   : > { %1401 = vrot.lane.b32.xlu1 %v1367_v52, %s3859_s26  ;;  %v1718_v52 = vrot.slane %v1716_v13, 1  ;;  %v1632_v13 = vshll.u32 %v4704_v26, 16  ;;  %v2468_v29 = vsel %vm2466_vm13, %v2435_v44, %v4507_v28 }
  0xc7   : > { %v551_v42 = vor.u32 %v549_v11, %v4733_v7  ;;  %v668_v32 = vld [vmem:[#allocation2 + $0x5c] sm:$0x1]  ;;  %v2132_v11 = vshll.u32 %v4743_v20, 16 }
  0xc8   : > { %v4710_v37 = vpop.permute.xlu1 %1777  ;;  %v1719_v48 = vor.u32 %v1718_v52, %v1714_v58  ;;  %v1634_v19 = vrot.slane %v1632_v13, 1  ;;  %v4749_v58 = vld [vmem:[#allocation2 + $0xac] sm:$0xf]  ;;  %v720_v13 = vld [vmem:[#allocation2 + $0xb4] sm:$0xf] }
  0xc9   : > { %1274 = vrot.lane.b32.xlu0 %v1223_v12, %s3861_s28  ;;  %v3464_v12 = vcombine.low %v858_v49, %v4651_v31  ;;  %v721_v31 = vsel %vm3981_vm7, %v543_v35, %v720_v13  ;;  %v1639_v49 = vrot.slane %v1637_v18, 1  ;;  %v1878_v35 = vrot.slane %v4692_v33, 1  ;;  %v4790_v33 = vld [vmem:[#allocation2 + $0xb0] ss:$0 sps:$4 sm:$0x11]  }
  0xca   : > { %1769 = vrot.lane.b32.xlu1 %v1628_v14, %s3863_s30  ;;  %v1369_v14 = vrot.slane %v4663_v6, 1  ;;  %v417_v6 = vrot.slane %v4671_v15, 4  ;;  %v552_v15 = vsel %vm3989_vm8, %v544_v46, %v551_v42  ;;  %v4766_v46 = vld [vmem:[#allocation2 + $0x50] ss:$0 sps:$4 sm:$0x11]   ;;  %v1635_v44 = vor.u32 %v1634_v19, %v1630_v8 }
  0xcb   : > { %v4751_v52 = vpop.permute.xlu0 %1763  ;;  %723 = vst.msk [vmem:[#allocation2 + $0xb8] sm:$0xf] %vm143_vm0, %v552_v15  ;;  %v1724_v42 = vsel %vm1055_vm10, %v1719_v48, %v1723_v47  ;;  %722 = vst [vmem:[#allocation2 + $0xb4] sm:$0xf] %v721_v31  ;;  %v3457_v15 = vcombine.low %v851_v9, %v4689_v54  ;;  %v2501_v8 = vsel %vm2499_vm14, %v2468_v29, %v4533_v38  ;;  %v2130_v48 = vshrl.u32 %v4743_v20, 16 }
  0xcc   : > { %v4730_v59 = vpop.permute.xlu1 %2001  ;;  %v1370_v2 = vsel %vm1328_vm9, %v1368_v24, %v1369_v14  ;;  %v669_v28 = vsel %vm3937_vm3, %v417_v6, %v668_v32  ;;  %v1877_v6 = vrot.slane %v3464_v12, 1  ;;  %v2134_v19 = vrot.slane %v2132_v11, 1  ;;  %v915_v12 = vld [vmem:[#allocation2 + $0x48] sm:$0xe] }
  0xcd   : > { %1499 = vrot.lane.b32.xlu0 %v4704_v26, %s3860_s27  ;;  %670 = vst [vmem:[#allocation2 + $0x5c] sm:$0x1] %v669_v28  ;;  %v2137_v18 = vshll.u32 %v4766_v46, 16  ;;  %v2534_v47 = vsel %vm2532_vm15, %v2501_v8, %v4687_v30  ;;  %v1640_v54 = vsel %vm1055_vm10, %v1635_v44, %v1639_v49  ;;  %v2437_v30 = vsel %vm2433_vm12, %v4055_v0, %v4684_v39  ;;  %v4808_v49 = vld [vmem:[#allocation2 + $0x4c] sm:$0xf] }
  0xce   : > { %1513 = vrot.lane.b32.xlu1 %v4676_v22, %s3860_s27  ;;  %v824_v22 = vld [vmem:[#allocation2 + $0xa8] sm:$0xf]  ;;  %v1856_v13 = vrot.slane %v3457_v15, 1  ;;  %v1879_v9 = vsel %vm1328_vm9, %v1877_v6, %v1878_v35  ;;  %v2567_v11 = vsel %vm2565_vm1, %v2534_v47, %v4648_v5  ;;  %v1857_v28 = vrot.slane %v4728_v55, 1  ;;  %v4815_v35 = vld [vmem:[#allocation2 + $0x58] sm:$0xf] }
  0xcf   : > { %v4774_v26 = vcombine.low %v824_v22, %v4749_v58  ;;  %v4776_v24 = vpop.permute.xlu0 %1891  ;;  %v2135_v31 = vor.u32 %v2134_v19, %v2130_v48  ;;  %v2139_v44 = vrot.slane %v2137_v18, 1  ;;  %v2600_v0 = vsel %vm2598_vm2, %v2567_v11, %v4730_v59  ;;  %v859_v59 = vld [vmem:[#allocation2 + $0xa8] sm:$0xe]  ;;  %v4857_v11 = vld [vmem:[#allocation2 + $0x50] ss:$0 sps:$4 sm:$0x11]  }
  0xd0   : > { %v4753_v21 = vpop.permute.xlu1 %1905  ;;  %v553_v55 = vrot.slane %v4733_v7, 4  ;;  %v2453_v8 = vsel %vm2433_vm12, %v4079_v27, %v4721_v60  ;;  %v3504_v48 = vcombine.low %v915_v12, %v4724_v41  ;;  %v2470_v47 = vsel %vm2466_vm13, %v2437_v30, %v4613_v25  ;;  %v4835_v60 = vld [vmem:[#allocation2 + $0xac] sm:$0xf]  ;;  %v4837_v41 = vld [vmem:[#allocation2 + $0x48] sm:$0xe] }
  0xd1   : > { %1403 = vrot.lane.b32.xlu0 %v1370_v2, %s3859_s26  ;;  %v1728_v22 = vshll.u32 %v4774_v26, 16  ;;  %v746_v2 = vld [vmem:[#allocation2 + $0x48] sm:$0xf]  ;;  %v1726_v39 = vshrl.u32 %v4774_v26, 16  ;;  %v1858_v27 = vsel %vm1328_vm9, %v1856_v13, %v1857_v28 }
  0xd2   : > { %1897 = vrot.lane.b32.xlu1 %v1855_v56, %s3862_s29  ;;  %v256_v56 = vld [vmem:[#allocation2 + $0xbc] sm:$0x1]  ;;  %v4824_v18 = vcombine.low %v746_v2, %v4808_v49  ;;  %v887_v25 = vld [vmem:[#allocation2 + $0xa8] sm:$0xf]  ;;  %v2503_v2 = vsel %vm2499_vm14, %v2470_v47, %v4509_v23  ;;  %v2365_v23 = vrot.slane %v3504_v48, 1  ;;  %v1136_v47 = vshll.u32 %v4857_v11, 16 }
  0xd3   : > { %v257_v38 = vsel %vm3956_vm5, 0, %v256_v56  ;;  %v4794_v32 = vpop.permute.xlu0 %1779  ;;  %v1733_v56 = vshll.u32 %v4790_v33, 16 }
  0xd4   : > { %v2274_v14 = vpop.permute.xlu1 %2273  ;;  %258 = vst [vmem:[#allocation2 + $0xbc] sm:$0x1] %v257_v38  ;;  %v3465_v38 = vcombine.low %v859_v59, %v4749_v58  ;;  %v1131_v28 = vshll.u32 %v4824_v18, 16  ;;  %v2536_v58 = vsel %vm2532_vm15, %v2503_v2, %v4751_v52  ;;  %v762_v59 = vld [vmem:[#allocation2 + $0xa8] sm:$0xf] }
  0xd5   : > { %1771 = vrot.lane.b32.xlu0 %v1640_v54, %s3863_s30  ;;  %v2633_v5 = vsel %vm2631_vm4, %v2600_v0, %v2274_v14  ;;  %v2451_v14 = vsel %vm2433_vm12, %v4087_v50, %v4669_v40  ;;  %v1735_v54 = vrot.slane %v1733_v56, 1  ;;  %v2140_v50 = vsel %vm1055_vm10, %v2135_v31, %v2139_v44  ;;  %v4866_v31 = vld [vmem:[#allocation2 + $0xa8] sm:$0xe] }
  0xd6   : > { %1785 = vrot.lane.b32.xlu1 %v1724_v42, %s3863_s30  ;;  %v1730_v42 = vrot.slane %v1728_v22, 1  ;;  %v2366_v44 = vrot.slane %v4766_v46, 1  ;;  %v2569_v0 = vsel %vm2565_vm1, %v2536_v58, %v4776_v24 }
  0xd7   : > { %v2004_v15 = vpop.permute.xlu0 %2003 }
  0xd8   : > { %v4796_v29 = vpop.permute.xlu1 %2017  ;;  %v1731_v7 = vor.u32 %v1730_v42, %v1726_v39  ;;  %v916_v42 = vld [vmem:[#allocation2 + $0x54] sm:$0xe] }
  0xd9   : > { %1515 = vrot.lane.b32.xlu0 %v4774_v26, %s3860_s27  ;;  %v2486_v26 = vsel %vm2466_vm13, %v2453_v8, %v4659_v34  ;;  %v3410_v34 = vcombine.low %v4837_v41, %v4808_v49  ;;  %v1880_v8 = vrot.slane %v3465_v38, 1  ;;  %v789_v49 = vld [vmem:[#allocation2 + $0x54] sm:$0xe] }
  0xda   : > { %2009 = vrot.lane.b32.xlu1 %v4743_v20, %s3864_s3  ;;  %v873_v20 = vld [vmem:[#allocation2 + $0x54] sm:$0xf]  ;;  %v4876_v39 = vsel %vm2499_vm14, %v2486_v26, %v4535_v62  ;;  %v1736_v52 = vsel %vm1055_vm10, %v1731_v7, %v1735_v54  ;;  %v4886_v62 = vld [vmem:[#allocation2 + $0xac] sm:$0xf]  ;;  %v1881_v7 = vrot.slane %v4790_v33, 1  ;;  %v2367_v26 = vsel %vm1328_vm9, %v2365_v23, %v2366_v44 }
  0xdb   : > { %v4842_v40 = vcombine.low %v873_v20, %v4815_v35  ;;  %v724_v22 = vld [vmem:[#allocation2 + $0xbc] sm:$0x1]  ;;  %v4847_v30 = vpop.permute.xlu0 %1907  ;;  %v2602_v20 = vsel %vm2598_vm2, %v2569_v0, %v2004_v15  ;;  %v203_v23 = vld [vmem:[#allocation2 + $0xc0] sm:$0x1] }
  0xdc   : > { %v2402_v6 = vpop.permute.xlu1 %2401  ;;  %v725_v13 = vsel %vm3937_vm3, %v553_v55, %v724_v22  ;;  %v3512_v22 = vcombine.low %v4866_v31, %v4835_v60  ;;  %v4917_v31 = vcombine.low %v762_v59, %v4886_v62 }
  0xdd   : > { %v2666_v19 = vsel %vm2664_vm6, %v2633_v5, %v2402_v6  ;;  %726 = vst [vmem:[#allocation2 + $0xbc] sm:$0x1] %v725_v13  ;;  %1899 = vrot.lane.b32.xlu0 %v1858_v27, %s3862_s29  ;;  %v2144_v56 = vshll.u32 %v4842_v40, 16  ;;  %v4880_v5 = vld [vmem:[#allocation2 + $0x5c] ss:$0 sps:$4 sm:$0x11]  }
  0xde   : > { %1913 = vrot.lane.b32.xlu1 %v1879_v9, %s3862_s29  ;;  %3564 = vmatprep.mubr.msk.bf16.mxu0 %vm2717_vm11, %v2666_v19  ;;  %v2484_v9 = vsel %vm2466_vm13, %v2451_v14, %v4611_v45  ;;  %v4869_v45 = vcombine.low %v887_v25, %v4835_v60  ;;  %v1129_v19 = vshrl.u32 %v4824_v18, 16  ;;  %v1133_v14 = vrot.slane %v1131_v28, 1  ;;  %v4891_v27 = vld [vmem:[#allocation2 + $0xb0] ss:$0 sps:$4 sm:$0x11]  }
  0xdf   : > { %v2517_v6 = vsel %vm2499_vm14, %v2484_v9, %v4577_v63  ;;  %v2276_v46 = vpop.permute.xlu0 %2275  ;;  %v3505_v63 = vcombine.low %v916_v42, %v4815_v35  ;;  %v2142_v54 = vshrl.u32 %v4842_v40, 16  ;;  %v4900_v25 = vld [vmem:[#allocation2 + $0x58] sm:$0xf]  ;;  %v2146_v35 = vrot.slane %v2144_v56, 1  ;;  %v889_v13 = vld [vmem:[#allocation2 + $0xb4] sm:$0xf] }
  0xe0   : > { %v4849_v12 = vpop.permute.xlu1 %2019  ;;  %v2228_v24 = vshll.u32 %v4869_v45, 16  ;;  %v2635_v48 = vsel %vm2631_vm4, %v2602_v20, %v2276_v46  ;;  %v2149_v38 = vshll.u32 %v4880_v5, 16  ;;  %v4907_v9 = vld [vmem:[#allocation2 + $0xb8] sm:$0xf]  ;;  %v2550_v33 = vsel %vm2532_vm15, %v2517_v6, %v4710_v37 }
  0xe1   : > { %1787 = vrot.lane.b32.xlu0 %v1736_v52, %s3863_s30  ;;  %v2226_v60 = vshrl.u32 %v4869_v45, 16  ;;  %v2583_v44 = vsel %vm2565_vm1, %v2550_v33, %v4753_v21  ;;  %v1134_v0 = vor.u32 %v1133_v14, %v1129_v19  ;;  %v1138_v52 = vrot.slane %v1136_v47, 1  ;;  %v295_v56 = vld [vmem:[%s3963_s25 + $0x78] sm:$0xf]  ;;  %v296_v14 = vld [vmem:[%s3963_s25 + $0x7c] sm:$0xf] }
  0xe2   : > { %2281 = vrot.lane.b32.xlu1 %v2140_v50, %s3865_s4  ;;  %v748_v50 = vld [vmem:[#allocation2 + $0x54] sm:$0xf]  ;;  %v2230_v58 = vrot.slane %v2228_v24, 1  ;;  %v2233_v42 = vshll.u32 %v4891_v27, 16  ;;  %v4927_v37 = vcombine.low %v889_v13, %v4907_v9  ;;  %v2369_v6 = vrot.slane %v4880_v5, 1  ;;  %s3304_s25 = sshll.u32 %s5468_s23, 4  ;;  %s5508_s25 = int_to_ptr.vmem [resolvable:$true] %s3304_s25 }
  0xe3   : > { %v4911_v2 = vpop.permute.xlu0 %1252  ;;  %v4931_v20 = vcombine.low %v748_v50, %v4900_v25  ;;  %v1882_v21 = vsel %vm1328_vm9, %v1880_v8, %v1881_v7  ;;  %v2147_v46 = vor.u32 %v2146_v35, %v2142_v54  ;;  %v1347_v24 = vrot.slane %v3410_v34, 1  ;;  %v4953_v50 = vld [vmem:[#allocation2 + $0x5c] ss:$0 sps:$4 sm:$0x11]  }
  0xe4   : > { %v2404_v55 = vpop.permute.xlu1 %2403  ;;  %v1348_v19 = vrot.slane %v4857_v11, 1  ;;  %v204_v5 = vsel %vm3937_vm3, 0, %v203_v23  ;;  %v555_v47 = vshrl.u32 %v295_v56, 16  ;;  %v2235_v7 = vrot.slane %v2233_v42, 1 }
  0xe5   : > { %v2668_v15 = vsel %vm2664_vm6, %v2635_v48, %v2404_v55  ;;  %2011 = vrot.lane.b32.xlu0 %v4842_v40, %s3864_s3  ;;  %v2151_v55 = vrot.slane %v2149_v38, 1  ;;  %v2616_v40 = vsel %vm2598_vm2, %v2583_v44, %v4796_v29  ;;  %205 = vst [vmem:[#allocation2 + $0xc0] sm:$0x1] %v204_v5  ;;  %v1143_v11 = vshll.u32 %v4931_v20, 16  ;;  %v259_v44 = vld [vmem:[#allocation2 + $0xc8] sm:$0x1] }
  0xe6   : > { %2025 = vrot.lane.b32.xlu1 %v4869_v45, %s3864_s3  ;;  %3565 = vmatmul.mubr.msk.bf16.vlgmr.msra.gmra.mxu0 %vm2717_vm11, %v2668_v15  ;;  %v2368_v45 = vrot.slane %v3505_v63, 1  ;;  %v1139_v63 = vsel %vm1055_vm10, %v1134_v0, %v1138_v52  ;;  %v2231_v15 = vor.u32 %v2230_v58, %v2226_v60  ;;  %v2389_v34 = vrot.slane %v3512_v22, 1 }
  0xe7   : > { %v2290_v59 = vpop.permute.xlu0 %2289  ;;  %v2152_v54 = vsel %vm1055_vm10, %v2147_v46, %v2151_v55  ;;  %v558_v35 = vshll.u32 %v295_v56, 16  ;;  %v563_v38 = vshrl.u32 %v296_v14, 16  ;;  %v1349_v60 = vsel %vm1328_vm9, %v1347_v24, %v1348_v19  ;;  %v810_v46 = vld [vmem:[#allocation2 + $0x54] sm:$0xf] }
  0xe8   : > { %v4913_v28 = vpop.permute.xlu1 %1381  ;;  %v2649_v8 = vsel %vm2631_vm4, %v2616_v40, %v2290_v59  ;;  %v2370_v41 = vsel %vm1328_vm9, %v2368_v45, %v2369_v6  ;;  %v2390_v58 = vrot.slane %v4891_v27, 1  ;;  %v3411_v23 = vcombine.low %v789_v49, %v4900_v25  ;;  %v924_v6 = vld [vmem:[#allocation2 + $0xb4] sm:$0xe]  ;;  %v4975_v40 = vld [vmem:[#allocation2 + $0xbc] ss:$0 sps:$4 sm:$0x11]  }
  0xe9   : > { %1915 = vrot.lane.b32.xlu0 %v1882_v21, %s3862_s29  ;;  %v566_v22 = vshll.u32 %v296_v14, 16  ;;  %v1141_v0 = vshrl.u32 %v4931_v20, 16  ;;  %v4963_v45 = vrot.slane %v563_v38, 7  ;;  %v2552_v56 = vsel %vm2532_vm15, %v4876_v39, %v4794_v32  ;;  %v206_v59 = vld [vmem:[#allocation2 + $0xcc] sm:$0x1] }
  0xea   : > { %2409 = vrot.lane.b32.xlu1 %v2367_v26, %s3866_s5  ;;  %v557_v26 = vrot.slane %v555_v47, 7  ;;  %v2240_v21 = vshll.u32 %v4927_v37, 16  ;;  %v2236_v27 = vsel %vm1055_vm10, %v2231_v15, %v2235_v7  ;;  %v1145_v25 = vrot.slane %v1143_v11, 1  ;;  %v262_v11 = vld [vmem:[#allocation2 + $0xd4] sm:$0x1] }
  0xeb   : > { %v4955_v13 = vpop.permute.xlu0 %1254  ;;  %v2585_v55 = vsel %vm2565_vm1, %v2552_v56, %v4847_v30  ;;  %v1148_v24 = vshll.u32 %v4953_v50, 16  ;;  %v568_v32 = vor.u32 %v566_v22, %v4963_v45  ;;  %v260_v39 = vsel %vm3956_vm5, 0, %v259_v44 }
  0xec   : > { %v2418_v48 = vpop.permute.xlu1 %2417  ;;  %v560_v52 = vor.u32 %v558_v35, %v557_v26  ;;  %v561_v42 = vrot.slane %v557_v26, 4  ;;  %v2391_v14 = vsel %vm1328_vm9, %v2389_v34, %v2390_v58  ;;  %v1350_v47 = vrot.slane %v3411_v23, 1  ;;  %v727_v15 = vld [vmem:[#allocation2 + $0xc0] sm:$0xf]  ;;  %261 = vst [vmem:[#allocation2 + $0xc8] sm:$0x1] %v260_v39 }
  0xed   : > { %v2682_v29 = vsel %vm2664_vm6, %v2649_v8, %v2418_v48  ;;  %2283 = vrot.lane.b32.xlu0 %v2152_v54, %s3865_s4  ;;  %v2618_v48 = vsel %vm2598_vm2, %v2585_v55, %v4849_v12  ;;  %v1227_v30 = vshll.u32 %v4917_v31, 16  ;;  %v4984_v8 = vld [vmem:[#allocation2 + $0x58] sm:$0xf]  ;;  %v3513_v49 = vcombine.low %v924_v6, %v4907_v9  ;;  %v796_v35 = vld [vmem:[#allocation2 + $0xa8] sm:$0xe] }
  0xee   : > { %2027 = vrot.lane.b32.xlu1 %v4927_v37, %s3864_s3  ;;  %3580 = vmatprep.mubr.msk.bf16.mxu1 %vm2717_vm11, %v2682_v29  ;;  %v4988_v29 = vld [vmem:[#allocation2 + $0xb0] ss:$0 sps:$4 sm:$0x11]   ;;  %v569_v12 = vsel %vm3989_vm8, %v561_v42, %v568_v32  ;;  %v2238_v54 = vshrl.u32 %v4927_v37, 16  ;;  %v2242_v26 = vrot.slane %v2240_v21, 1  ;;  %v1351_v9 = vrot.slane %v4953_v50, 1 }
  0xef   : > { %v2292_v19 = vpop.permute.xlu0 %2291  ;;  %730 = vst.msk [vmem:[#allocation2 + $0xc4] sm:$0xf] %vm143_vm0, %v569_v12  ;;  %v1146_v36 = vor.u32 %v1145_v25, %v1141_v0  ;;  %v1150_v43 = vrot.slane %v1148_v24, 1  ;;  %v2245_v38 = vshll.u32 %v4975_v40, 16  ;;  %v764_v58 = vld [vmem:[#allocation2 + $0xb4] sm:$0xf]  ;;  %v3418_v56 = vcombine.low %v796_v35, %v4886_v62 }
  0xf0   : > { %v4957_v33 = vpop.permute.xlu1 %1383  ;;  %v2651_v7 = vsel %vm2631_vm4, %v2618_v48, %v2292_v19  ;;  %v570_v50 = vrot.slane %v4963_v45, 4  ;;  %v207_v22 = vsel %vm3937_vm3, 0, %v206_v59  ;;  %v263_v44 = vsel %vm3956_vm5, 0, %v262_v11  ;;  %v5025_v25 = vld [vmem:[#allocation2 + $0x5c] ss:$0 sps:$4 sm:$0x11]  }
  0xf1   : > { %1260 = vrot.lane.b32.xlu0 %v1139_v63, %s3861_s28  ;;  %v5003_v63 = vcombine.low %v810_v46, %v4984_v8  ;;  %v1225_v0 = vshrl.u32 %v4917_v31, 16  ;;  %v1232_v42 = vshll.u32 %v4988_v29, 16  ;;  %208 = vst [vmem:[#allocation2 + $0xcc] sm:$0x1] %v207_v22  ;;  %264 = vst [vmem:[#allocation2 + $0xd4] sm:$0x1] %v263_v44  ;;  %v2243_v45 = vor.u32 %v2242_v26, %v2238_v54 }
  0xf2   : > { %2411 = vrot.lane.b32.xlu1 %v2370_v41, %s3866_s5  ;;  %v728_v41 = vsel %vm3981_vm7, %v560_v52, %v727_v15  ;;  %v1229_v52 = vrot.slane %v1227_v30, 1  ;;  %v2392_v6 = vrot.slane %v3513_v49, 1  ;;  %v1352_v21 = vsel %vm1328_vm9, %v1350_v47, %v1351_v9  ;;  %v826_v15 = vld [vmem:[#allocation2 + $0xb4] sm:$0xf]  ;;  %v812_v9 = vld [vmem:[#allocation2 + $0x60] sm:$0xf] }
  0xf3   : > { %729 = vst [vmem:[#allocation2 + $0xc0] sm:$0xf] %v728_v41  ;;  %v5007_v37 = vpop.permute.xlu0 %1268  ;;  %v1151_v46 = vsel %vm1055_vm10, %v1146_v36, %v1150_v43  ;;  %v2247_v55 = vrot.slane %v2245_v38, 1  ;;  %v2393_v62 = vrot.slane %v4975_v40, 1  ;;  %v1644_v24 = vshll.u32 %v5003_v63, 16 }
  0xf4   : > { %v2420_v5 = vpop.permute.xlu1 %2419  ;;  %v731_v32 = vld [vmem:[#allocation2 + $0xc8] sm:$0x1]  ;;  %v1230_v48 = vor.u32 %v1229_v52, %v1225_v0  ;;  %v1234_v19 = vrot.slane %v1232_v42, 1  ;;  %v1371_v40 = vrot.slane %v3418_v56, 1  ;;  %v1642_v47 = vshrl.u32 %v5003_v63, 16 }
  0xf5   : > { %v2684_v34 = vsel %vm2664_vm6, %v2651_v7, %v2420_v5  ;;  %2297 = vrot.lane.b32.xlu0 %v2236_v27, %s3865_s4  ;;  %v732_v59 = vsel %vm3937_vm3, %v570_v50, %v731_v32  ;;  %v5036_v5 = vld [vmem:[#allocation2 + $0xb8] sm:$0xf]  ;;  %v1649_v30 = vshll.u32 %v5025_v25, 16  ;;  %v2248_v1 = vsel %vm1055_vm10, %v2243_v45, %v2247_v55  ;;  %v5045_v49 = vld [vmem:[#allocation2 + $0xbc] ss:$0 sps:$4 sm:$0x11]  }
  0xf6   : > { %1389 = vrot.lane.b32.xlu1 %v1349_v60, %s3859_s26  ;;  %3581 = vmatmul.mubr.msk.bf16.vlgmr.msra.gmra.mxu1 %vm2717_vm11, %v2684_v34  ;;  %v5005_v60 = vld [vmem:[#allocation2 + $0xb8] sm:$0xf]  ;;  %733 = vst [vmem:[#allocation2 + $0xc8] sm:$0x1] %v732_v59  ;;  %v2394_v7 = vsel %vm1328_vm9, %v2392_v6, %v2393_v62  ;;  %v1646_v41 = vrot.slane %v1644_v24, 1  ;;  %v3434_v36 = vcombine.low %v826_v15, %v5036_v5  ;;  %v1244_v38 = vshll.u32 %v5045_v49, 16 }
  0xf7   : > { %v5023_v10 = vcombine.low %v764_v58, %v5005_v60  ;;  %v5030_v39 = vpop.permute.xlu0 %1493  ;;  %v5057_v35 = vld [vmem:[#allocation2 + $0x64] sm:$0xf]  ;;  %v1651_v50 = vrot.slane %v1649_v30, 1  ;;  %v852_v22 = vld [vmem:[#allocation2 + $0x54] sm:$0xe]  ;;  %vm3029_vm0 = vcmask 62467  }
  0xf8   : > { %v5009_v23 = vpop.permute.xlu1 %1397  ;;  %v1647_v58 = vor.u32 %v1646_v41, %v1642_v47  ;;  %v3427_v52 = vcombine.low %v812_v9, %v5057_v35  ;;  %v797_v42 = vld [vmem:[#allocation2 + $0xb4] sm:$0xe]  ;;  %v3458_v56 = vcombine.low %v852_v22, %v4984_v8  ;;  %v1246_v45 = vrot.slane %v1244_v38, 1  ;;  %v5076_v32 = vld [vmem:[#allocation2 + $0x68] ss:$0 sps:$4 sm:$0x11]  }
  0xf9   : > { %1262 = vrot.lane.b32.xlu0 %v1151_v46, %s3861_s28  ;;  %v1239_v12 = vshll.u32 %v5023_v10, 16  ;;  %v1237_v26 = vshrl.u32 %v5023_v10, 16  ;;  %v5070_v46 = vld [vmem:[#allocation2 + $0xbc] ss:$0 sps:$4 sm:$0x11]   ;;  %v1740_v55 = vshll.u32 %v3434_v36, 16  ;;  %v3419_v8 = vcombine.low %v797_v42, %v5005_v60 }
  0xfa   : > { %2425 = vrot.lane.b32.xlu1 %v2391_v14, %s3866_s5  ;;  %v1372_v14 = vrot.slane %v4988_v29, 1  ;;  %v1235_v29 = vsel %vm1055_vm10, %v1230_v48, %v1234_v19  ;;  %v875_v59 = vld [vmem:[#allocation2 + $0x60] sm:$0xf]  ;;  %v1859_v48 = vrot.slane %v3458_v56, 1  ;;  %v1860_v19 = vrot.slane %v5025_v25, 1 }
  0xfb   : > { %v5048_v11 = vpop.permute.xlu0 %1270  ;;  %v1241_v43 = vrot.slane %v1239_v12, 1  ;;  %v1738_v30 = vshrl.u32 %v3434_v36, 16  ;;  %v1742_v15 = vrot.slane %v1740_v55, 1  ;;  %v1374_v60 = vrot.slane %v3419_v8, 1  ;;  %v828_v22 = vld [vmem:[#allocation2 + $0xc0] sm:$0xf] }
  0xfc   : > { %v5032_v27 = vpop.permute.xlu1 %1765  ;;  %v1373_v54 = vsel %vm1328_vm9, %v1371_v40, %v1372_v14  ;;  %v1656_v40 = vshll.u32 %v3427_v52, 16  ;;  %v5083_v14 = vld [vmem:[#allocation2 + $0x64] sm:$0xf]  ;;  %v1861_v25 = vsel %vm1328_vm9, %v1859_v48, %v1860_v19  ;;  %v1654_v41 = vshrl.u32 %v3427_v52, 16 }
  0xfd   : > { %2299 = vrot.lane.b32.xlu0 %v2248_v1, %s3865_s4  ;;  %v1242_v6 = vor.u32 %v1241_v43, %v1237_v26  ;;  %v1745_v1 = vshll.u32 %v5070_v46, 16  ;;  %v1375_v26 = vrot.slane %v5045_v49, 1  ;;  %v1743_v43 = vor.u32 %v1742_v15, %v1738_v30  ;;  %v5099_v42 = vld [vmem:[#allocation2 + $0xc4] sm:$0xf] }
  0xfe   : > { %1391 = vrot.lane.b32.xlu1 %v1352_v21, %s3859_s26  ;;  %v1652_v21 = vsel %vm1055_vm10, %v1647_v58, %v1651_v50  ;;  %v1658_v9 = vrot.slane %v1656_v40, 1  ;;  %v3435_v8 = vcombine.low %v828_v22, %v5099_v42  ;;  %vm3112_vm3 = vcmask 60417  }
  0xff   : > { %v5061_v44 = vpop.permute.xlu0 %1495  ;;  %v1247_v47 = vsel %vm1055_vm10, %v1242_v6, %v1246_v45  ;;  %v1747_v38 = vrot.slane %v1745_v1, 1  ;;  %v5104_v45 = vld [vmem:[#allocation2 + $0x68] ss:$0 sps:$4 sm:$0x11]   ;;  %vm3148_vm5 = vcmask 63492   ;;  %vm3067_vm7 = vcmask 57344  }
 0x100   : > { %v5050_v34 = vpop.permute.xlu1 %1509  ;;  %v1659_v55 = vor.u32 %v1658_v9, %v1654_v41  ;;  %v2161_v1 = vshll.u32 %v5104_v45, 16  ;;  %v5122_v41 = vld [vmem:[#allocation2 + $0xc8] ss:$0 sps:$4 sm:$0x11]   ;;  %vm3065_vm8 = vcmask 64518  }
 0x101   : > { %1276 = vrot.lane.b32.xlu0 %v1235_v29, %s3861_s28  ;;  %v1661_v29 = vshll.u32 %v5076_v32, 16 }
 0x102   : > { %2427 = vrot.lane.b32.xlu1 %v2394_v7, %s3866_s5 }
 0x103   : > { %v5072_v62 = vpop.permute.xlu0 %1399  ;;  %v1663_v6 = vrot.slane %v1661_v29, 1  ;;  %v5124_v29 = vld [vmem:[#allocation2 + $0xc4] sm:$0xf] }
 0x104   : > { %v5063_v0 = vpop.permute.xlu1 %1893 }
 0x105   : > { %1501 = vrot.lane.b32.xlu0 %v5003_v63, %s3860_s27  ;;  %v3474_v63 = vcombine.low %v875_v59, %v5083_v14  ;;  %v1748_v59 = vsel %vm1055_vm10, %v1743_v43, %v1747_v38  ;;  %v877_v38 = vld [vmem:[#allocation2 + $0x6c] sm:$0xf] }
 0x106   : > { %1405 = vrot.lane.b32.xlu1 %v1373_v54, %s3859_s26  ;;  %v860_v54 = vld [vmem:[#allocation2 + $0xb4] sm:$0xe] }
 0x107   : > { %v5087_v7 = vpop.permute.xlu0 %1767  ;;  %v3466_v56 = vcombine.low %v860_v54, %v5036_v5  ;;  %v2156_v49 = vshll.u32 %v3474_v63, 16  ;;  %v2154_v30 = vshrl.u32 %v3474_v63, 16 }
 0x108   : > { %v5074_v24 = vpop.permute.xlu1 %1781 }
 0x109   : > { %1278 = vrot.lane.b32.xlu0 %v1247_v47, %s3861_s28  ;;  %v1883_v40 = vrot.slane %v3466_v56, 1  ;;  %v2439_v47 = vsel %vm2433_vm12, %v4187_v16, %v4911_v2  ;;  %v2158_v15 = vrot.slane %v2156_v49, 1  ;;  %v5140_v56 = vld [vmem:[#allocation2 + $0x70] sm:$0xf]  ;;  %v1750_v49 = vshrl.u32 %v3435_v8, 16  ;;  %s5521_s28 = scalar_lea.sflag [#allocation4], %s134_s21 }
 0x10a   : > { %1773 = vrot.lane.b32.xlu1 %v1652_v21, %s3863_s30  ;;  %v1376_v21 = vsel %vm1328_vm9, %v1374_v60, %v1375_v26  ;;  %v891_v60 = vld [vmem:[#allocation2 + $0xc0] sm:$0xf] }
 0x10b   : > { %v5095_v58 = vpop.permute.xlu0 %1511 }
 0x10c   : > { %v2006_v12 = vpop.permute.xlu1 %2005 }
 0x10d   : > { %1503 = vrot.lane.b32.xlu0 %v3427_v52, %s3860_s27  ;;  %v1884_v52 = vrot.slane %v5070_v46, 1  ;;  %v1752_v46 = vshll.u32 %v3435_v8, 16 }
 0x10e   : > { %1517 = vrot.lane.b32.xlu1 %v3434_v36, %s3860_s27  ;;  %v853_v36 = vld [vmem:[#allocation2 + $0x60] sm:$0xe] }
 0x10f   : > { %v5109_v48 = vpop.permute.xlu0 %1895  ;;  %v3459_v5 = vcombine.low %v853_v36, %v5057_v35  ;;  %v1664_v35 = vsel %vm1055_vm10, %v1659_v55, %v1663_v6  ;;  %v1885_v43 = vsel %vm1328_vm9, %v1883_v40, %v1884_v52  ;;  %v2163_v36 = vrot.slane %v2161_v1, 1  ;;  %v893_v40 = vld [vmem:[#allocation2 + $0xcc] sm:$0xf] }
 0x110   : > { %v5097_v50 = vpop.permute.xlu1 %1909  ;;  %v5143_v6 = vcombine.low %v891_v60, %v5124_v29  ;;  %v1757_v55 = vshll.u32 %v5122_v41, 16 }
 0x111   : > { %1407 = vrot.lane.b32.xlu0 %v1376_v21, %s3859_s26  ;;  %v1862_v9 = vrot.slane %v3459_v5, 1  ;;  %v1754_v21 = vrot.slane %v1752_v46, 1 }
 0x112   : > { %1901 = vrot.lane.b32.xlu1 %v1861_v25, %s3862_s29  ;;  %v2472_v25 = vsel %vm2466_vm13, %v2439_v47, %v4913_v28  ;;  %v1863_v28 = vrot.slane %v5076_v32, 1  ;;  %v5152_v47 = vcombine.low %v877_v38, %v5140_v56  ;;  %v1759_v60 = vrot.slane %v1757_v55, 1 }
 0x113   : > { %v2505_v16 = vsel %vm2499_vm14, %v2472_v25, %v5030_v39  ;;  %v5128_v2 = vpop.permute.xlu0 %1783  ;;  %v2159_v39 = vor.u32 %v2158_v15, %v2154_v30  ;;  %v2252_v15 = vshll.u32 %v5143_v6, 16  ;;  %v1755_v1 = vor.u32 %v1754_v21, %v1750_v49 }
 0x114   : > { %v2278_v19 = vpop.permute.xlu1 %2277  ;;  %v2538_v26 = vsel %vm2532_vm15, %v2505_v16, %v5032_v27  ;;  %v917_v27 = vld [vmem:[#allocation2 + $0x60] sm:$0xe]  ;;  %v5175_v16 = vld [vmem:[#allocation2 + $0x74] ss:$0 sps:$4 sm:$0x11]  }
 0x115   : > { %v2571_v22 = vsel %vm2565_vm1, %v2538_v26, %v5063_v0  ;;  %1775 = vrot.lane.b32.xlu0 %v1664_v35, %s3863_s30  ;;  %v3506_v30 = vcombine.low %v917_v27, %v5083_v14  ;;  %v2164_v25 = vsel %vm1055_vm10, %v2159_v39, %v2163_v36  ;;  %v861_v35 = vld [vmem:[#allocation2 + $0xc0] sm:$0xe]  ;;  %v5164_v14 = vld [vmem:[#allocation2 + $0xc8] ss:$0 sps:$4 sm:$0x11]   ;;  %v2254_v39 = vrot.slane %v2252_v15, 1 }
 0x116   : > { %1789 = vrot.lane.b32.xlu1 %v1748_v59, %s3863_s30  ;;  %v2604_v32 = vsel %vm2598_vm2, %v2571_v22, %v2006_v12  ;;  %v2441_v12 = vsel %vm2433_vm12, %v4212_v17, %v4955_v13  ;;  %v2250_v22 = vshrl.u32 %v5143_v6, 16  ;;  %v5187_v36 = vld [vmem:[#allocation2 + $0xd4] ss:$0 sps:$4 sm:$0x11]   ;;  %v2257_v27 = vshll.u32 %v5164_v14, 16 }
 0x117   : > { %v2637_v0 = vsel %vm2631_vm4, %v2604_v32, %v2278_v19  ;;  %v2008_v59 = vpop.permute.xlu0 %2007  ;;  %v1864_v19 = vsel %vm1328_vm9, %v1862_v9, %v1863_v28  ;;  %v2474_v17 = vsel %vm2466_vm13, %v2441_v12, %v4957_v33  ;;  %v2371_v9 = vrot.slane %v3506_v30, 1 }
 0x118   : > { %v5130_v54 = vpop.permute.xlu1 %2021  ;;  %v2507_v26 = vsel %vm2499_vm14, %v2474_v17, %v5061_v44  ;;  %v2372_v28 = vrot.slane %v5104_v45, 1  ;;  %v3467_v33 = vcombine.low %v861_v35, %v5099_v42  ;;  %v1760_v45 = vsel %vm1055_vm10, %v1755_v1, %v1759_v60 }
 0x119   : > { %1519 = vrot.lane.b32.xlu0 %v3435_v8, %s3860_s27  ;;  %v2540_v38 = vsel %vm2532_vm15, %v2507_v26, %v5087_v7  ;;  %v2166_v42 = vshrl.u32 %v5152_v47, 16  ;;  %v2173_v55 = vshll.u32 %v5175_v16, 16  ;;  %v2269_v12 = vshll.u32 %v5187_v36, 16  ;;  %s5513_s27 = scalar_lea.hbm %s5565_s2, %s3605_s24 }
 0x11a   : > { %2013 = vrot.lane.b32.xlu1 %v3474_v63, %s3864_s3  ;;  %v5148_v63 = vld [vmem:[#allocation2 + $0xd0] sm:$0xf]  ;;  %v2573_v44 = vsel %vm2565_vm1, %v2540_v38, %v5109_v48  ;;  %v2259_v15 = vrot.slane %v2257_v27, 1 }
 0x11b   : > { %v5167_v46 = vcombine.low %v893_v40, %v5148_v63  ;;  %v5171_v13 = vpop.permute.xlu0 %1911  ;;  %v2606_v32 = vsel %vm2598_vm2, %v2573_v44, %v2008_v59  ;;  %v1886_v59 = vrot.slane %v3467_v33, 1 }
 0x11c   : > { %v2406_v5 = vpop.permute.xlu1 %2405 }
 0x11d   : > { %v2670_v52 = vsel %vm2664_vm6, %v2637_v0, %v2406_v5  ;;  %1903 = vrot.lane.b32.xlu0 %v1864_v19, %s3862_s29  ;;  %v2264_v7 = vshll.u32 %v5167_v46, 16  ;;  %v2455_v0 = vsel %vm2433_vm12, %v4235_v3, %v5007_v37  ;;  %v2373_v5 = vsel %vm1328_vm9, %v2371_v9, %v2372_v28  ;;  %v926_v19 = vld [vmem:[#allocation2 + $0xcc] sm:$0xe] }
 0x11e   : > { %1917 = vrot.lane.b32.xlu1 %v1885_v43, %s3862_s29  ;;  %3568 = vmatprep.mubr.msk.bf16.mxu0 %vm2717_vm11, %v2670_v52  ;;  %v2168_v43 = vshll.u32 %v5152_v47, 16  ;;  %v2262_v30 = vshrl.u32 %v5167_v46, 16  ;;  %v1887_v3 = vrot.slane %v5122_v41, 1  ;;  %v2255_v37 = vor.u32 %v2254_v39, %v2250_v22 }
 0x11f   : > { %v2280_v49 = vpop.permute.xlu0 %2279  ;;  %v2266_v1 = vrot.slane %v2264_v7, 1  ;;  %v2488_v60 = vsel %vm2466_vm13, %v2455_v0, %v5009_v23  ;;  %v3515_v17 = vcombine.low %v926_v19, %v5148_v63  ;;  %v2175_v9 = vrot.slane %v2173_v55, 1  ;;  %v918_v63 = vld [vmem:[#allocation2 + $0x6c] sm:$0xe] }
 0x120   : > { %v5173_v8 = vpop.permute.xlu1 %2023  ;;  %v2639_v48 = vsel %vm2631_vm4, %v2606_v32, %v2280_v49  ;;  %v2170_v40 = vrot.slane %v2168_v43, 1  ;;  %v2271_v23 = vrot.slane %v2269_v12, 1  ;;  %v1888_v43 = vsel %vm1328_vm9, %v1886_v59, %v1887_v3 }
 0x121   : > { %1791 = vrot.lane.b32.xlu0 %v1760_v45, %s3863_s30  ;;  %v2267_v38 = vor.u32 %v2266_v1, %v2262_v30  ;;  %v2398_v44 = vrot.slane %v3515_v17, 1  ;;  %v2457_v45 = vsel %vm2433_vm12, %v4308_v61, %v5048_v11  ;;  %v2399_v7 = vrot.slane %v5187_v36, 1 }
 0x122   : > { %2285 = vrot.lane.b32.xlu1 %v2164_v25, %s3865_s4  ;;  %v2171_v41 = vor.u32 %v2170_v40, %v2166_v42  ;;  %v2490_v32 = vsel %vm2466_vm13, %v2457_v45, %v5072_v62  ;;  %v925_v42 = vld [vmem:[#allocation2 + $0xc0] sm:$0xe]  ;;  %v2375_v55 = vrot.slane %v5175_v16, 1 }
 0x123   : > { %v5212_v25 = vpop.permute.xlu0 %1256  ;;  %v2400_v62 = vsel %vm1328_vm9, %v2398_v44, %v2399_v7  ;;  %v3514_v0 = vcombine.low %v925_v42, %v5124_v29  ;;  %v2396_v29 = vrot.slane %v5164_v14, 1 }
 0x124   : > { %v2408_v21 = vpop.permute.xlu1 %2407  ;;  %v2176_v27 = vsel %vm1055_vm10, %v2171_v41, %v2175_v9  ;;  %v2443_v9 = vsel %vm2433_vm12, %v4463_v53, %v5212_v25 }
 0x125   : > { %v2672_v52 = vsel %vm2664_vm6, %v2639_v48, %v2408_v21  ;;  %2015 = vrot.lane.b32.xlu0 %v5152_v47, %s3864_s3  ;;  %v2395_v16 = vrot.slane %v3514_v0, 1 }
 0x126   : > { %2029 = vrot.lane.b32.xlu1 %v5143_v6, %s3864_s3  ;;  %3569 = vmatmul.mubr.msk.bf16.gmra.mxu0 %vm2717_vm11, %v2672_v52  ;;  %v2521_v6 = vsel %vm2499_vm14, %v2488_v60, %v5050_v34  ;;  %v2260_v34 = vsel %vm1055_vm10, %v2255_v37, %v2259_v15 }
 0x127   : > { %v2554_v26 = vsel %vm2532_vm15, %v2521_v6, %v5074_v24  ;;  %v2294_v33 = vpop.permute.xlu0 %2293  ;;  %v2397_v59 = vsel %vm1328_vm9, %v2395_v16, %v2396_v29 }
 0x128   : > { %v5214_v35 = vpop.permute.xlu1 %1385  ;;  %v2587_v28 = vsel %vm2565_vm1, %v2554_v26, %v5097_v50  ;;  %v3507_v50 = vcombine.low %v918_v63, %v5140_v56  ;;  %v2523_v56 = vsel %vm2499_vm14, %v2490_v32, %v5095_v58 }
 0x129   : > { %v2620_v24 = vsel %vm2598_vm2, %v2587_v28, %v5130_v54  ;;  %1919 = vrot.lane.b32.xlu0 %v1888_v43, %s3862_s29  ;;  %v2272_v54 = vsel %vm1055_vm10, %v2267_v38, %v2271_v23  ;;  %v2556_v61 = vsel %vm2532_vm15, %v2523_v56, %v5128_v2  ;;  %v2476_v23 = vsel %vm2466_vm13, %v2443_v9, %v5214_v35  ;;  %s3796_s29 = scalar_lea.vmem %s5508_s25, 80 }
 0x12a   : > { %2413 = vrot.lane.b32.xlu1 %v2373_v5, %s3866_s5  ;;  %v2653_v47 = vsel %vm2631_vm4, %v2620_v24, %v2294_v33  ;;  %v2374_v11 = vrot.slane %v3507_v50, 1  ;;  %v2589_v36 = vsel %vm2565_vm1, %v2556_v61, %v5171_v13  ;;  %vm3284_vm10 = vcmask 319488   ;;  %p3797_p11 = scmp.ne.s32.totalorder %s5508_s25, %s3796_s29 }
 0x12b   : > { %v1259_v49 = vpop.permute.xlu0 %1258  ;;  %v2622_v58 = vsel %vm2598_vm2, %v2589_v36, %v5173_v8 }
 0x12c   : > { %v2422_v22 = vpop.permute.xlu1 %2421  ;;  %v2376_v13 = vsel %vm1328_vm9, %v2374_v11, %v2375_v55  ;;  %v2445_v53 = vsel %vm2433_vm12, %v4521_v4, %v1259_v49  ;;  %vm2993_vm9 = vcmask 59392   ;;  %p3798_p12 = pnand %p3797_p11, %p3922_p5 }
 0x12d   : > { %v2686_v39 = vsel %vm2664_vm6, %v2653_v47, %v2422_v22  ;;  %2287 = vrot.lane.b32.xlu0 %v2176_v27, %s3865_s4 }
 0x12e   : > { %2301 = vrot.lane.b32.xlu1 %v2260_v34, %s3865_s4  ;;  %3584 = vmatprep.mubr.msk.bf16.mxu1 %vm2717_vm11, %v2686_v39  ;;  %p3799_p13 = pneg %p3798_p12 }
 0x12f   : > { %v2296_v48 = vpop.permute.xlu0 %2295 }
 0x130   : > { %v1388_v21 = vpop.permute.xlu1 %1387  ;;  %v2655_v2 = vsel %vm2631_vm4, %v2622_v58, %v2296_v48 }
 0x131   : > { %2031 = vrot.lane.b32.xlu0 %v5167_v46, %s3864_s3  ;;  %v2478_v25 = vsel %vm2466_vm13, %v2445_v53, %v1388_v21 }
 0x132   : > { %2303 = vrot.lane.b32.xlu1 %v2272_v54, %s3865_s4 }
 0x133   : > { %v1273_v52 = vpop.permute.xlu0 %1272 }
 0x134   : > { %v2424_v5 = vpop.permute.xlu1 %2423  ;;  %v2459_v4 = vsel %vm2433_vm12, %v4567_v51, %v1273_v52 }
 0x135   : > { %v2688_v40 = vsel %vm2664_vm6, %v2655_v2, %v2424_v5  ;;  %2415 = vrot.lane.b32.xlu0 %v2376_v13, %s3866_s5 }
 0x136   : > { %2431 = vrot.lane.b32.xlu1 %v2400_v62, %s3866_s5  ;;  %3585 = vmatmul.mubr.msk.bf16.gmra.mxu1 %vm2717_vm11, %v2688_v40 }
 0x137   : > { %v1498_v30 = vpop.permute.xlu0 %1497 }
 0x138   : > { %v1402_v8 = vpop.permute.xlu1 %1401  ;;  %v2509_v28 = vsel %vm2499_vm14, %v2476_v23, %v1498_v30 }
 0x139   : > { %2429 = vrot.lane.b32.xlu0 %v2397_v59, %s3866_s5  ;;  %v2492_v49 = vsel %vm2466_vm13, %v2459_v4, %v1402_v8 }
 0x13b   : > { %v1275_v46 = vpop.permute.xlu0 %1274 }
 0x13c   : > { %v1770_v12 = vpop.permute.xlu1 %1769  ;;  %v2461_v5 = vsel %vm2433_vm12, %v4635_v57, %v1275_v46 }
 0x13d   : > { %v2542_v38 = vsel %vm2532_vm15, %v2509_v28, %v1770_v12 }
 0x13f   : > { %v1500_v3 = vpop.permute.xlu0 %1499 }
 0x140   : > { %v1514_v19 = vpop.permute.xlu1 %1513  ;;  %v2511_v44 = vsel %vm2499_vm14, %v2478_v25, %v1500_v3 }
 0x141   : > { %v2525_v11 = vsel %vm2499_vm14, %v2492_v49, %v1514_v19 }
 0x143   : > { %v1404_v15 = vpop.permute.xlu0 %1403 }
 0x144   : > { %v1898_v37 = vpop.permute.xlu1 %1897  ;;  %v2494_v2 = vsel %vm2466_vm13, %v2461_v5, %v1404_v15 }
 0x145   : > { %v2575_v63 = vsel %vm2565_vm1, %v2542_v38, %v1898_v37 }
 0x147   : > { %v1772_v60 = vpop.permute.xlu0 %1771 }
 0x148   : > { %v1786_v1 = vpop.permute.xlu1 %1785  ;;  %v2544_v45 = vsel %vm2532_vm15, %v2511_v44, %v1772_v60 }
 0x149   : > { %v2558_v36 = vsel %vm2532_vm15, %v2525_v11, %v1786_v1 }
 0x14b   : > { %v1516_v17 = vpop.permute.xlu0 %1515 }
 0x14c   : > { %v2010_v6 = vpop.permute.xlu1 %2009  ;;  %v2527_v16 = vsel %vm2499_vm14, %v2494_v2, %v1516_v17 }
 0x14d   : > { %v2608_v24 = vsel %vm2598_vm2, %v2575_v63, %v2010_v6 }
 0x14f   : > { %v1900_v26 = vpop.permute.xlu0 %1899 }
 0x150   : > { %v1914_v14 = vpop.permute.xlu1 %1913  ;;  %v2577_v27 = vsel %vm2565_vm1, %v2544_v45, %v1900_v26 }
 0x151   : > { %v2591_v55 = vsel %vm2565_vm1, %v2558_v36, %v1914_v14 }
 0x153   : > { %v1788_v43 = vpop.permute.xlu0 %1787 }
 0x154   : > { %v2282_v41 = vpop.permute.xlu1 %2281  ;;  %v2560_v29 = vsel %vm2532_vm15, %v2527_v16, %v1788_v43 }
 0x155   : > { %v2641_v33 = vsel %vm2631_vm4, %v2608_v24, %v2282_v41 }
 0x157   : > { %v2012_v22 = vpop.permute.xlu0 %2011 }
 0x158   : > { %v2026_v34 = vpop.permute.xlu1 %2025  ;;  %v2610_v54 = vsel %vm2598_vm2, %v2577_v27, %v2012_v22 }
 0x159   : > { %v2624_v62 = vsel %vm2598_vm2, %v2591_v55, %v2026_v34 }
 0x15b   : > { %v1916_v35 = vpop.permute.xlu0 %1915 }
 0x15c   : > { %v2410_v47 = vpop.permute.xlu1 %2409  ;;  %v2593_v52 = vsel %vm2565_vm1, %v2560_v29, %v1916_v35 }
 0x15d   : > { %v2674_v39 = vsel %vm2664_vm6, %v2641_v33, %v2410_v47 }
 0x15e   : > { %3572 = vmatprep.mubr.msk.bf16.mxu0 %vm2717_vm11, %v2674_v39 }
 0x15f   : > { %v2284_v7 = vpop.permute.xlu0 %2283 }
 0x160   : > { %v2028_v50 = vpop.permute.xlu1 %2027  ;;  %v2643_v42 = vsel %vm2631_vm4, %v2610_v54, %v2284_v7 }
 0x161   : > { %v2626_v8 = vsel %vm2598_vm2, %v2593_v52, %v2028_v50 }
 0x163   : > { %v1261_v21 = vpop.permute.xlu0 %1260 }
 0x164   : > { %v2412_v32 = vpop.permute.xlu1 %2411  ;;  %v2447_v34 = vsel %vm2433_vm12, %v4824_v18, %v1261_v21 }
 0x165   : > { %v2676_v56 = vsel %vm2664_vm6, %v2643_v42, %v2412_v32 }
 0x166   : > { %3573 = vmatmul.mubr.msk.bf16.gmra.mxu0 %vm2717_vm11, %v2676_v56 }
 0x167   : > { %v2298_v0 = vpop.permute.xlu0 %2297 }
 0x168   : > { %v1390_v61 = vpop.permute.xlu1 %1389  ;;  %v2657_v48 = vsel %vm2631_vm4, %v2624_v62, %v2298_v0 }
 0x169   : > { %v2480_v38 = vsel %vm2466_vm13, %v2447_v34, %v1390_v61 }
 0x16b   : > { %v1263_v40 = vpop.permute.xlu0 %1262 }
 0x16c   : > { %v2426_v58 = vpop.permute.xlu1 %2425  ;;  %v2449_v27 = vsel %vm2433_vm12, %v4931_v20, %v1263_v40 }
 0x16d   : > { %v2690_v51 = vsel %vm2664_vm6, %v2657_v48, %v2426_v58 }
 0x16e   : > { %3588 = vmatprep.mubr.msk.bf16.mxu1 %vm2717_vm11, %v2690_v51 }
 0x16f   : > { %v2300_v59 = vpop.permute.xlu0 %2299 }
 0x170   : > { %v1392_v13 = vpop.permute.xlu1 %1391  ;;  %v2659_v12 = vsel %vm2631_vm4, %v2626_v8, %v2300_v59 }
 0x171   : > { %v2482_v54 = vsel %vm2466_vm13, %v2449_v27, %v1392_v13 }
 0x173   : > { %v1277_v46 = vpop.permute.xlu0 %1276 }
 0x174   : > { %v2428_v30 = vpop.permute.xlu1 %2427  ;;  %v2463_v49 = vsel %vm2433_vm12, %v4917_v31, %v1277_v46 }
 0x175   : > { %v2692_v57 = vsel %vm2664_vm6, %v2659_v12, %v2428_v30 }
 0x176   : > { %3589 = vmatmul.mubr.msk.bf16.gmra.mxu1 %vm2717_vm11, %v2692_v57 }
 0x177   : > { %v1502_v3 = vpop.permute.xlu0 %1501 }
 0x178   : > { %v1406_v19 = vpop.permute.xlu1 %1405  ;;  %v2513_v63 = vsel %vm2499_vm14, %v2480_v38, %v1502_v3 }
 0x179   : > { %v2496_v20 = vsel %vm2466_vm13, %v2463_v49, %v1406_v19 }
 0x17b   : > { %v1279_v15 = vpop.permute.xlu0 %1278 }
 0x17c   : > { %v1774_v37 = vpop.permute.xlu1 %1773  ;;  %v2465_v42 = vsel %vm2433_vm12, %v5023_v10, %v1279_v15 }
 0x17d   : > { %v2546_v22 = vsel %vm2532_vm15, %v2513_v63, %v1774_v37 }
 0x17f   : > { %v1504_v60 = vpop.permute.xlu0 %1503 }
 0x180   : > { %v1518_v1 = vpop.permute.xlu1 %1517  ;;  %v2515_v7 = vsel %vm2499_vm14, %v2482_v54, %v1504_v60 }
 0x181   : > { %v2529_v55 = vsel %vm2499_vm14, %v2496_v20, %v1518_v1 }
 0x183   : > { %v1408_v17 = vpop.permute.xlu0 %1407 }
 0x184   : > { %v1902_v6 = vpop.permute.xlu1 %1901  ;;  %v2498_v21 = vsel %vm2466_vm13, %v2465_v42, %v1408_v17 }
 0x185   : > { %v2579_v47 = vsel %vm2565_vm1, %v2546_v22, %v1902_v6 }
 0x187   : > { %v1776_v26 = vpop.permute.xlu0 %1775 }
 0x188   : > { %v1790_v14 = vpop.permute.xlu1 %1789  ;;  %v2548_v56 = vsel %vm2532_vm15, %v2515_v7, %v1776_v26 }
 0x189   : > { %v2562_v58 = vsel %vm2532_vm15, %v2529_v55, %v1790_v14 }
 0x18b   : > { %v1520_v9 = vpop.permute.xlu0 %1519 }
 0x18c   : > { %v2014_v41 = vpop.permute.xlu1 %2013  ;;  %v2531_v11 = vsel %vm2499_vm14, %v2498_v21, %v1520_v9 }
 0x18d   : > { %v2612_v39 = vsel %vm2598_vm2, %v2579_v47, %v2014_v41 }
 0x18f   : > { %v1904_v28 = vpop.permute.xlu0 %1903 }
 0x190   : > { %v1918_v23 = vpop.permute.xlu1 %1917  ;;  %v2581_v61 = vsel %vm2565_vm1, %v2548_v56, %v1904_v28 }
 0x191   : > { %v2595_v51 = vsel %vm2565_vm1, %v2562_v58, %v1918_v23 }
 0x193   : > { %v1792_v24 = vpop.permute.xlu0 %1791 }
 0x194   : > { %v2286_v43 = vpop.permute.xlu1 %2285  ;;  %v2564_v10 = vsel %vm2532_vm15, %v2531_v11, %v1792_v24 }
 0x195   : > { %v2645_v53 = vsel %vm2631_vm4, %v2612_v39, %v2286_v43 }
 0x197   : > { %v2016_v25 = vpop.permute.xlu0 %2015 }
 0x198   : > { %v2030_v33 = vpop.permute.xlu1 %2029  ;;  %v2614_v36 = vsel %vm2598_vm2, %v2581_v61, %v2016_v25 }
 0x199   : > { %v2628_v2 = vsel %vm2598_vm2, %v2595_v51, %v2030_v33 }
 0x19b   : > { %v1920_v18 = vpop.permute.xlu0 %1919 }
 0x19c   : > { %v2414_v35 = vpop.permute.xlu1 %2413  ;;  %v2597_v31 = vsel %vm2565_vm1, %v2564_v10, %v1920_v18 }
 0x19d   : > { %v2678_v50 = vsel %vm2664_vm6, %v2645_v53, %v2414_v35 }
 0x19e   : > { %3576 = vmatprep.mubr.msk.bf16.mxu0 %vm2717_vm11, %v2678_v50 }
 0x19f   : > { %v2288_v45 = vpop.permute.xlu0 %2287 }
 0x1a0   : > { %v2302_v44 = vpop.permute.xlu1 %2301  ;;  %v2647_v62 = vsel %vm2631_vm4, %v2614_v36, %v2288_v45 }
 0x1a1   : > { %v2661_v13 = vsel %vm2631_vm4, %v2628_v2, %v2302_v44 }
 0x1a3   : > { %v2032_v32 = vpop.permute.xlu0 %2031 }
 0x1a4   : > { %v2304_v4 = vpop.permute.xlu1 %2303  ;;  %v2630_v5 = vsel %vm2598_vm2, %v2597_v31, %v2032_v32 }
 0x1a5   : > { %v2663_v29 = vsel %vm2631_vm4, %v2630_v5, %v2304_v4 }
 0x1a6   : > { %v3566_v59 = vpop.f32.mrf.mxu0 }
 0x1a7   : > { %v2416_v0 = vpop.permute.xlu0 %2415  ;;  %v2915_v19 = vmax.f32 %v3566_v59, 0.0 }
 0x1a8   : > { %v2680_v48 = vsel %vm2664_vm6, %v2647_v62, %v2416_v0  ;;  %v2432_v40 = vpop.permute.xlu1 %2431  ;;  %v2788_v30 = vpop.f32.mrf.mxu0 }
 0x1a9   : > { %3577 = vmatmul.mubr.msk.bf16.gmra.mxu0 %vm2717_vm11, %v2680_v48  ;;  %v2696_v8 = vsel %vm2664_vm6, %v2663_v29, %v2432_v40  ;;  %v2913_v57 = vmax.f32 %v2788_v30, 0.0  ;;  %v2944_v6 = vsel %vm2466_vm13, %v2915_v19, -inf }
 0x1aa   : > { %v3567_v12 = vpop.f32.mrf.mxu0 }
 0x1ab   : > { %v2430_v16 = vpop.permute.xlu0 %2429  ;;  %v2943_v37 = vsel %vm2466_vm13, %v2913_v57, -inf  ;;  %v2916_v17 = vmax.f32 %v3567_v12, 0.0 }
 0x1ac   : > { %v2694_v52 = vsel %vm2664_vm6, %v2661_v13, %v2430_v16  ;;  %v2791_v46 = vpop.f32.mrf.mxu0  ;;  %v2945_v26 = vmax.f32 %v2943_v37, %v2944_v6 }
 0x1ad   : > { %3592 = vmatprep.mubr.msk.bf16.mxu1 %vm2717_vm11, %v2694_v52  ;;  %v2914_v15 = vmax.f32 %v2791_v46, 0.0  ;;  %v2949_v38 = vsel %vm2466_vm13, %v2916_v17, -inf }
 0x1ae   : > { %3593 = vmatmul.mubr.msk.bf16.gmra.mxu1 %vm2717_vm11, %v2696_v8 }
 0x1af   : > { %v2948_v9 = vsel %vm2466_vm13, %v2914_v15, -inf }
 0x1b0   : > { %v2950_v24 = vmax.f32 %v2948_v9, %v2949_v38 }
 0x1b6   : > { %v3582_v1 = vpop.f32.mrf.mxu1 }
 0x1b7   : > { %v2931_v54 = vmax.f32 %v3582_v1, 0.0 }
 0x1b8   : > { %v5358_v28 = vpop.f32.mrf.mxu1 }
 0x1b9   : > { %v2973_v11 = vsel %vm2466_vm13, %v2931_v54, -inf }
 0x1ba   : > { %v3583_v39 = vpop.f32.mrf.mxu1 }
 0x1bb   : > { %v2932_v0 = vmax.f32 %v3583_v39, 0.0 }
 0x1bc   : > { %v5367_v44 = vpop.f32.mrf.mxu1 }
 0x1bd   : > { %v2978_v8 = vsel %vm2466_vm13, %v2932_v0, -inf }
 0x1e6   : > { %v5350_v3 = vpop.f32.mrf.mxu0 }
 0x1e8   : > { %v2804_v60 = vpop.f32.mrf.mxu0 }
 0x1e9   : > { %v2917_v14 = vmax.f32 %v2804_v60, 0.0 }
 0x1ea   : > { %v5354_v41 = vpop.f32.mrf.mxu0 }
 0x1eb   : > { %v2946_v23 = vsel %vm2466_vm13, %v2917_v14, -inf }
 0x1ec   : > { %v5360_v43 = vmax.f32 %v2945_v26, %v2946_v23  ;;  %v2807_v34 = vpop.f32.mrf.mxu0 }
 0x1ed   : > { %v2918_v63 = vmax.f32 %v2807_v34, 0.0 }
 0x1ee   : > { %v3030_v33 = vsel %vm3029_vm0, %v5360_v43, -inf  ;;  %v3066_v36 = vsel %vm3065_vm8, %v5360_v43, -inf }
 0x1ef   : > { %v3031_v22 = vrot.slane %v3030_v33, 4  ;;  %v2951_v47 = vsel %vm2466_vm13, %v2918_v63, -inf }
 0x1f0   : > { %v2952_v53 = vmax.f32 %v2950_v24, %v2951_v47 }
 0x1f1   : > { %v3032_v25 = vmax.f32 %v3030_v33, %v3031_v22 }
 0x1f2   : > { %v3113_v35 = vsel %vm3112_vm3, %v2952_v53, -inf  ;;  %v3149_v42 = vsel %vm3148_vm5, %v2952_v53, -inf  ;;  %v3068_v56 = vsel %vm3067_vm7, %v2952_v53, -inf }
 0x1f3   : > { %v3033_v50 = vrot.slane %v3032_v25, 2  ;;  %v3114_v18 = vrot.slane %v3113_v35, 4  ;;  %v3150_v55 = vrot.slane %v3149_v42, 4  ;;  %v3069_v58 = vmax.f32 %v3066_v36, %v3068_v56 }
 0x1f5   : > { %v3115_v45 = vmax.f32 %v3113_v35, %v3114_v18  ;;  %v3034_v27 = vmax.f32 %v3032_v25, %v3033_v50  ;;  %v3151_v29 = vmax.f32 %v3149_v42, %v3150_v55  ;;  %v3070_v59 = vrot.slane %v3069_v58, 4 }
 0x1f6   : > { %v3586_v7 = vpop.f32.mrf.mxu1 }
 0x1f7   : > { %v3116_v32 = vrot.slane %v3115_v45, 2  ;;  %v3035_v49 = vrot.slane %v3034_v27, 1  ;;  %v2935_v21 = vmax.f32 %v3586_v7, 0.0  ;;  %v3152_v37 = vrot.slane %v3151_v29, 2 }
 0x1f8   : > { %v2868_v4 = vpop.f32.mrf.mxu1  ;;  %v3071_v1 = vmax.f32 %v3069_v58, %v3070_v59 }
 0x1f9   : > { %v2933_v61 = vmax.f32 %v2868_v4, 0.0  ;;  %v3117_v20 = vmax.f32 %v3115_v45, %v3116_v32  ;;  %v3036_v62 = vmax.f32 %v3034_v27, %v3035_v49  ;;  %v2976_v2 = vsel %vm2466_vm13, %v2935_v21, -inf }
 0x1fa   : > { %v3587_v10 = vpop.f32.mrf.mxu1  ;;  %v3153_v34 = vmax.f32 %v3151_v29, %v3152_v37  ;;  %v3072_v33 = vrot.slane %v3071_v1, 2  ;;  %v2919_v21 = vmax.f32 %v5350_v3, 0.0 }
 0x1fb   : > { %v2974_v31 = vsel %vm2466_vm13, %v2933_v61, -inf  ;;  %v3118_v48 = vrot.slane %v3117_v20, 1  ;;  %3189 = vrot.lane.b32.xlu0 %v3036_v62, %s3859_s26  ;;  %v2936_v40 = vmax.f32 %v3587_v10, 0.0  ;;  %v2920_v10 = vmax.f32 %v5354_v41, 0.0 }
 0x1fc   : > { %v2975_v51 = vmax.f32 %v2973_v11, %v2974_v31  ;;  %v2871_v5 = vpop.f32.mrf.mxu1  ;;  %v3154_v39 = vrot.slane %v3153_v34, 1  ;;  %v3073_v35 = vmax.f32 %v3071_v1, %v3072_v33  ;;  %v2953_v55 = vsel %vm2466_vm13, %v2919_v21, -inf }
 0x1fd   : > { %v2934_v13 = vmax.f32 %v2871_v5, 0.0  ;;  %v3119_v16 = vmax.f32 %v3117_v20, %v3118_v48  ;;  %v2981_v19 = vsel %vm2466_vm13, %v2936_v40, -inf  ;;  %v2958_v3 = vsel %vm2466_vm13, %v2920_v10, -inf }
 0x1fe   : > { %v5377_v52 = vmax.f32 %v2975_v51, %v2976_v2  ;;  %v3155_v45 = vmax.f32 %v3153_v34, %v3154_v39  ;;  %v3074_v54 = vrot.slane %v3073_v35, 1 }
 0x1ff   : > { %v2979_v30 = vsel %vm2466_vm13, %v2934_v13, -inf  ;;  %3229 = vrot.lane.b32.xlu0 %v3119_v16, %s3864_s3 }
 0x200   : > { %v3051_v12 = vsel %vm3029_vm0, %v5377_v52, -inf  ;;  %v2980_v57 = vmax.f32 %v2978_v8, %v2979_v30  ;;  %v3094_v6 = vsel %vm3065_vm8, %v5377_v52, -inf  ;;  %v3075_v42 = vmax.f32 %v3073_v35, %v3074_v54 }
 0x201   : > { %v3052_v46 = vrot.slane %v3051_v12, 4 }
 0x202   : > { %v5385_v15 = vmax.f32 %v2980_v57, %v2981_v19 }
 0x203   : > { %v3053_v60 = vmax.f32 %v3051_v12, %v3052_v46 }
 0x204   : > { %v3095_v17 = vsel %vm3067_vm7, %v5385_v15, -inf  ;;  %v3134_v14 = vsel %vm3112_vm3, %v5385_v15, -inf }
 0x205   : > { %v3096_v26 = vmax.f32 %v3094_v6, %v3095_v17  ;;  %v3135_v9 = vrot.slane %v3134_v14, 4  ;;  %v3054_v23 = vrot.slane %v3053_v60, 2 }
 0x207   : > { %v3097_v38 = vrot.slane %v3096_v26, 4  ;;  %v3136_v63 = vmax.f32 %v3134_v14, %v3135_v9  ;;  %v3055_v24 = vmax.f32 %v3053_v60, %v3054_v23 }
 0x209   : > { %v3056_v22 = vrot.slane %v3055_v24, 1  ;;  %v3098_v47 = vmax.f32 %v3096_v26, %v3097_v38  ;;  %v3137_v50 = vrot.slane %v3136_v63, 2 }
 0x20b   : > { %v3057_v53 = vmax.f32 %v3055_v24, %v3056_v22  ;;  %v3099_v25 = vrot.slane %v3098_v47, 2  ;;  %v3138_v7 = vmax.f32 %v3136_v63, %v3137_v50 }
 0x20d   : > { %3195 = vrot.lane.b32.xlu1 %v3057_v53, %s3859_s26  ;;  %v3100_v18 = vmax.f32 %v3098_v47, %v3099_v25  ;;  %v3139_v56 = vrot.slane %v3138_v7, 1 }
 0x20f   : > { %v3101_v27 = vrot.slane %v3100_v18, 1  ;;  %v3140_v4 = vmax.f32 %v3138_v7, %v3139_v56  ;;  %v2994_v7 = vsel %vm2993_vm9, %v5360_v43, -inf }
 0x211   : > { %3249 = vrot.lane.b32.xlu1 %v3155_v45, %s3866_s5  ;;  %v3102_v32 = vmax.f32 %v3100_v18, %v3101_v27  ;;  %v3015_v45 = vsel %vm2993_vm9, %v5377_v52, -inf }
 0x212   : > { %v3016_v54 = vrot.slane %v3015_v45, 4 }
 0x213   : > { %3215 = vrot.lane.b32.xlu0 %v3102_v32, %s3863_s30 }
 0x215   : > { %3209 = vrot.lane.b32.xlu1 %v3075_v42, %s3863_s30  ;;  %v2995_v42 = vrot.slane %v2994_v7, 4 }
 0x219   : > { %3235 = vrot.lane.b32.xlu1 %v3140_v4, %s3864_s3  ;;  %v3017_v4 = vmax.f32 %v3015_v45, %v3016_v54 }
 0x226   : > { %v3574_v49 = vpop.f32.mrf.mxu0 }
 0x227   : > { %v2923_v20 = vmax.f32 %v3574_v49, 0.0 }
 0x228   : > { %v2820_v61 = vpop.f32.mrf.mxu0 }
 0x229   : > { %v2921_v11 = vmax.f32 %v2820_v61, 0.0  ;;  %v2956_v31 = vsel %vm2466_vm13, %v2923_v20, -inf  ;;  %v2929_v61 = vmax.f32 %v5358_v28, 0.0 }
 0x22a   : > { %v3575_v36 = vpop.f32.mrf.mxu0 }
 0x22b   : > { %v2954_v62 = vsel %vm2466_vm13, %v2921_v11, -inf  ;;  %v2924_v48 = vmax.f32 %v3575_v36, 0.0 }
 0x22c   : > { %v2955_v0 = vmax.f32 %v2953_v55, %v2954_v62  ;;  %v2823_v58 = vpop.f32.mrf.mxu0  ;;  %v2996_v55 = vmax.f32 %v2994_v7, %v2995_v42  ;;  %v3018_v62 = vrot.slane %v3017_v4, 2  ;;  %v3170_v7 = vsel %vm3148_vm5, %v5385_v15, -inf }
 0x22d   : > { %v2922_v51 = vmax.f32 %v2823_v58, 0.0  ;;  %v2961_v41 = vsel %vm2466_vm13, %v2924_v48, -inf }
 0x22e   : > { %v5403_v5 = vmax.f32 %v2955_v0, %v2956_v31 }
 0x22f   : > { %v2959_v2 = vsel %vm2466_vm13, %v2922_v51, -inf }
 0x230   : > { %v3037_v40 = vsel %vm3029_vm0, %v5403_v5, -inf  ;;  %v2960_v13 = vmax.f32 %v2958_v3, %v2959_v2  ;;  %v3076_v59 = vsel %vm3065_vm8, %v5403_v5, -inf  ;;  %v2966_v3 = vsel %vm2466_vm13, %v2929_v61, -inf }
 0x231   : > { %v3038_v16 = vrot.slane %v3037_v40, 4  ;;  %v2930_v2 = vmax.f32 %v5367_v44, 0.0 }
 0x232   : > { %v2962_v29 = vmax.f32 %v2960_v13, %v2961_v41  ;;  %v2997_v41 = vrot.slane %v2996_v55, 2 }
 0x233   : > { %v3039_v8 = vmax.f32 %v3037_v40, %v3038_v16 }
 0x234   : > { %v3077_v30 = vsel %vm3067_vm7, %v2962_v29, -inf  ;;  %v3120_v12 = vsel %vm3112_vm3, %v2962_v29, -inf  ;;  %v3156_v57 = vsel %vm3148_vm5, %v2962_v29, -inf }
 0x235   : > { %v3078_v46 = vmax.f32 %v3076_v59, %v3077_v30  ;;  %v3121_v19 = vrot.slane %v3120_v12, 4  ;;  %v3157_v37 = vrot.slane %v3156_v57, 4  ;;  %v3040_v1 = vrot.slane %v3039_v8, 2 }
 0x236   : > { %v3590_v18 = vpop.f32.mrf.mxu1 }
 0x237   : > { %v3079_v60 = vrot.slane %v3078_v46, 4  ;;  %v3122_v6 = vmax.f32 %v3120_v12, %v3121_v19  ;;  %v3158_v17 = vmax.f32 %v3156_v57, %v3157_v37  ;;  %v3041_v14 = vmax.f32 %v3039_v8, %v3040_v1 }
 0x238   : > { %v2884_v27 = vpop.f32.mrf.mxu1  ;;  %v2939_v52 = vmax.f32 %v3590_v18, 0.0  ;;  %v3019_v8 = vmax.f32 %v3017_v4, %v3018_v62 }
 0x239   : > { %v3159_v26 = vrot.slane %v3158_v17, 2  ;;  %v3123_v9 = vrot.slane %v3122_v6, 2  ;;  %v3042_v23 = vrot.slane %v3041_v14, 1  ;;  %v3080_v34 = vmax.f32 %v3078_v46, %v3079_v60 }
 0x23a   : > { %v3591_v32 = vpop.f32.mrf.mxu1  ;;  %v2937_v20 = vmax.f32 %v2884_v27, 0.0  ;;  %v2984_v59 = vsel %vm2466_vm13, %v2939_v52, -inf  ;;  %v2971_v60 = vsel %vm2466_vm13, %v2930_v2, -inf }
 0x23b   : > { %v3160_v38 = vmax.f32 %v3158_v17, %v3159_v26  ;;  %v3124_v63 = vmax.f32 %v3122_v6, %v3123_v9  ;;  %v3043_v24 = vmax.f32 %v3041_v14, %v3042_v23  ;;  %v3081_v33 = vrot.slane %v3080_v34, 2 }
 0x23c   : > { %v2887_v11 = vpop.f32.mrf.mxu1  ;;  %v2983_v28 = vsel %vm2466_vm13, %v2937_v20, -inf  ;;  %v2940_v37 = vmax.f32 %v3591_v32, 0.0  ;;  %v2998_v9 = vmax.f32 %v2996_v55, %v2997_v41 }
 0x23d   : > { %v3161_v22 = vrot.slane %v3160_v38, 1  ;;  %v3125_v47 = vrot.slane %v3124_v63, 1  ;;  %3191 = vrot.lane.b32.xlu1 %v3043_v24, %s3859_s26  ;;  %v3082_v39 = vmax.f32 %v3080_v34, %v3081_v33  ;;  %v2938_v30 = vmax.f32 %v2887_v11, 0.0 }
 0x23e   : > { %v2985_v19 = vmax.f32 %v2983_v28, %v2984_v59  ;;  %v2989_v24 = vsel %vm2466_vm13, %v2940_v37, -inf  ;;  %v2999_v45 = vrot.slane %v2998_v9, 1 }
 0x23f   : > { %v3162_v53 = vmax.f32 %v3160_v38, %v3161_v22  ;;  %v3126_v25 = vmax.f32 %v3124_v63, %v3125_v47  ;;  %v3083_v35 = vrot.slane %v3082_v39, 1  ;;  %v2988_v38 = vsel %vm2466_vm13, %v2938_v30, -inf }
 0x240   : > { %v3020_v63 = vrot.slane %v3019_v8, 1  ;;  %v2990_v18 = vmax.f32 %v2988_v38, %v2989_v24 }
 0x241   : > { %3251 = vrot.lane.b32.xlu0 %v3162_v53, %s3866_s5  ;;  %3231 = vrot.lane.b32.xlu1 %v3126_v25, %s3864_s3  ;;  %v3084_v50 = vmax.f32 %v3082_v39, %v3083_v35 }
 0x245   : > { %3211 = vrot.lane.b32.xlu0 %v3084_v50, %s3863_s30 }
 0x269   : > { %v3578_v56 = vpop.f32.mrf.mxu0 }
 0x26a   : > { %v2927_v49 = vmax.f32 %v3578_v56, 0.0  ;;  %v3021_v56 = vmax.f32 %v3019_v8, %v3020_v63  ;;  %v3000_v8 = vmax.f32 %v2998_v9, %v2999_v45 }
 0x26b   : > { %v2836_v21 = vpop.f32.mrf.mxu0 }
 0x26c   : > { %v2925_v36 = vmax.f32 %v2836_v21, 0.0  ;;  %v2964_v0 = vsel %vm2466_vm13, %v2927_v49, -inf }
 0x26d   : > { %v3579_v10 = vpop.f32.mrf.mxu0  ;;  %v3190_v39 = vpop.permute.xlu0 %3189 }
 0x26e   : > { %v2963_v58 = vsel %vm2466_vm13, %v2925_v36, -inf  ;;  %v2928_v43 = vmax.f32 %v3579_v10, 0.0  ;;  %v3594_v31 = vpop.f32.mrf.mxu1 }
 0x26f   : > { %v2965_v48 = vmax.f32 %v2963_v58, %v2964_v0  ;;  %v2839_v51 = vpop.f32.mrf.mxu0 }
 0x270   : > { %v2926_v40 = vmax.f32 %v2839_v51, 0.0  ;;  %v2900_v13 = vpop.f32.mrf.mxu1  ;;  %v2969_v12 = vsel %vm2466_vm13, %v2928_v43, -inf }
 0x271   : > { %v5429_v16 = vmax.f32 %v2965_v48, %v2966_v3  ;;  %v2941_v29 = vmax.f32 %v2900_v13, 0.0  ;;  %v3230_v52 = vpop.permute.xlu0 %3229  ;;  %v3171_v3 = vrot.slane %v3170_v7, 4 }
 0x272   : > { %v2968_v57 = vsel %vm2466_vm13, %v2926_v40, -inf  ;;  %v3595_v46 = vpop.f32.mrf.mxu1 }
 0x273   : > { %v3044_v44 = vsel %vm3029_vm0, %v5429_v16, -inf  ;;  %v2970_v1 = vmax.f32 %v2968_v57, %v2969_v12  ;;  %v2986_v17 = vsel %vm2466_vm13, %v2941_v29, -inf  ;;  %v3085_v33 = vsel %vm3065_vm8, %v5429_v16, -inf }
 0x274   : > { %v3045_v6 = vrot.slane %v3044_v44, 4  ;;  %v2903_v14 = vpop.f32.mrf.mxu1  ;;  %v5438_v23 = vmax.f32 %v2985_v19, %v2986_v17 }
 0x275   : > { %v2972_v26 = vmax.f32 %v2970_v1, %v2971_v60  ;;  %v2942_v34 = vmax.f32 %v2903_v14, 0.0  ;;  %v3172_v1 = vmax.f32 %v3170_v7, %v3171_v3  ;;  %v3264_v60 = vsel %vm2466_vm13, %v3000_v8, %v3190_v39 }
 0x276   : > { %v3046_v53 = vmax.f32 %v3044_v44, %v3045_v6  ;;  %v3058_v27 = vsel %vm3029_vm0, %v5438_v23, -inf  ;;  %v3103_v21 = vsel %vm3065_vm8, %v5438_v23, -inf }
 0x277   : > { %v3086_v22 = vsel %vm3067_vm7, %v2972_v26, -inf  ;;  %v3163_v47 = vsel %vm3148_vm5, %v2972_v26, -inf  ;;  %v3127_v35 = vsel %vm3112_vm3, %v2972_v26, -inf  ;;  %v2991_v54 = vsel %vm2466_vm13, %v2942_v34, -inf }
 0x278   : > { %v3087_v25 = vmax.f32 %v3085_v33, %v3086_v22  ;;  %v3164_v50 = vrot.slane %v3163_v47, 4  ;;  %v3128_v4 = vrot.slane %v3127_v35, 4  ;;  %v3059_v49 = vrot.slane %v3058_v27, 4 }
 0x279   : > { %v2992_v61 = vmax.f32 %v2990_v18, %v2991_v54  ;;  %v3047_v55 = vrot.slane %v3046_v53, 2  ;;  %v3173_v54 = vrot.slane %v3172_v1, 2 }
 0x27a   : > { %v3088_v32 = vrot.slane %v3087_v25, 4  ;;  %v3165_v42 = vmax.f32 %v3163_v47, %v3164_v50  ;;  %v3060_v62 = vmax.f32 %v3058_v27, %v3059_v49  ;;  %v3129_v40 = vmax.f32 %v3127_v35, %v3128_v4 }
 0x27b   : > { %v3104_v15 = vsel %vm3067_vm7, %v2992_v61, -inf  ;;  %v3141_v0 = vsel %vm3112_vm3, %v2992_v61, -inf  ;;  %v3177_v58 = vsel %vm3148_vm5, %v2992_v61, -inf  ;;  %v3048_v30 = vmax.f32 %v3046_v53, %v3047_v55 }
 0x27c   : > { %v3166_v36 = vrot.slane %v3165_v42, 2  ;;  %v3089_v10 = vmax.f32 %v3087_v25, %v3088_v32  ;;  %v3105_v43 = vmax.f32 %v3103_v21, %v3104_v15  ;;  %v3142_v31 = vrot.slane %v3141_v0, 4 }
 0x27d   : > { %v3178_v48 = vrot.slane %v3177_v58, 4  ;;  %v3061_v2 = vrot.slane %v3060_v62, 2  ;;  %v3130_v34 = vrot.slane %v3129_v40, 2  ;;  %v3049_v63 = vrot.slane %v3048_v30, 1 }
 0x27e   : > { %v3167_v51 = vmax.f32 %v3165_v42, %v3166_v36  ;;  %v3106_v13 = vrot.slane %v3105_v43, 4  ;;  %v3143_v41 = vmax.f32 %v3141_v0, %v3142_v31  ;;  %v3090_v57 = vrot.slane %v3089_v10, 2 }
 0x27f   : > { %v3196_v20 = vpop.permute.xlu1 %3195  ;;  %v3062_v59 = vmax.f32 %v3060_v62, %v3061_v2  ;;  %v3179_v37 = vmax.f32 %v3177_v58, %v3178_v48  ;;  %v3050_v18 = vmax.f32 %v3048_v30, %v3049_v63  ;;  %v3131_v27 = vmax.f32 %v3129_v40, %v3130_v34 }
 0x280   : > { %v3267_v11 = vsel %vm2466_vm13, %v3021_v56, %v3196_v20  ;;  %v3168_v29 = vrot.slane %v3167_v51, 1  ;;  %v3107_v46 = vmax.f32 %v3105_v43, %v3106_v13  ;;  %v3144_v19 = vrot.slane %v3143_v41, 2 }
 0x281   : > { %v3063_v6 = vrot.slane %v3062_v59, 1  ;;  %v3180_v22 = vrot.slane %v3179_v37, 2  ;;  %v3091_v53 = vmax.f32 %v3089_v10, %v3090_v57  ;;  %v3132_v4 = vrot.slane %v3131_v27, 1 }
 0x282   : > { %v3169_v44 = vmax.f32 %v3167_v51, %v3168_v29  ;;  %v3108_v9 = vrot.slane %v3107_v46, 2  ;;  %v3145_v33 = vmax.f32 %v3143_v41, %v3144_v19  ;;  %v3174_v49 = vmax.f32 %v3172_v1, %v3173_v54 }
 0x283   : > { %v3250_v28 = vpop.permute.xlu1 %3249  ;;  %v3064_v38 = vmax.f32 %v3062_v59, %v3063_v6  ;;  %v3092_v32 = vrot.slane %v3091_v53, 1  ;;  %v3181_v42 = vmax.f32 %v3179_v37, %v3180_v22  ;;  %v3133_v20 = vmax.f32 %v3131_v27, %v3132_v4 }
 0x284   : > { %3253 = vrot.lane.b32.xlu1 %v3169_v44, %s3866_s5  ;;  %v3109_v39 = vmax.f32 %v3107_v46, %v3108_v9  ;;  %v3146_v45 = vrot.slane %v3145_v33, 1  ;;  %v3001_v10 = vsel %vm2993_vm9, %v5403_v5, -inf  ;;  %v3008_v5 = vsel %vm2993_vm9, %v5429_v16, -inf }
 0x285   : > { %v3216_v12 = vpop.permute.xlu0 %3215  ;;  %3197 = vrot.lane.b32.xlu0 %v3064_v38, %s3859_s26  ;;  %v3093_v21 = vmax.f32 %v3091_v53, %v3092_v32  ;;  %v3182_v61 = vrot.slane %v3181_v42, 1  ;;  %v3002_v62 = vrot.slane %v3001_v10, 4  ;;  %v3022_v41 = vsel %vm2993_vm9, %v5438_v23, -inf }
 0x286   : > { %v3272_v17 = vsel %vm2532_vm15, %v3267_v11, %v3216_v12  ;;  %v3110_v35 = vrot.slane %v3109_v39, 1  ;;  %v3147_v56 = vmax.f32 %v3145_v33, %v3146_v45  ;;  %v3175_v11 = vrot.slane %v3174_v49, 1 }
 0x287   : > { %v3210_v14 = vpop.permute.xlu1 %3209  ;;  %v3183_v36 = vmax.f32 %v3181_v42, %v3182_v61  ;;  %v3009_v29 = vrot.slane %v3008_v5, 4  ;;  %v3023_v8 = vrot.slane %v3022_v41, 4 }
 0x288   : > { %v3269_v26 = vsel %vm2532_vm15, %v3264_v60, %v3210_v14  ;;  %v3111_v7 = vmax.f32 %v3109_v39, %v3110_v35  ;;  %v3176_v55 = vmax.f32 %v3174_v49, %v3175_v11 }
 0x289   : > { %v3274_v24 = vsel %vm2598_vm2, %v3269_v26, %v3230_v52  ;;  %3193 = vrot.lane.b32.xlu0 %v3050_v18, %s3859_s26  ;;  %v3003_v52 = vmax.f32 %v3001_v10, %v3002_v62  ;;  %v3024_v59 = vmax.f32 %v3022_v41, %v3023_v8  ;;  %v3010_v30 = vmax.f32 %v3008_v5, %v3009_v29 }
 0x28a   : > { %v3279_v47 = vsel %vm2664_vm6, %v3274_v24, %v3250_v28  ;;  %3217 = vrot.lane.b32.xlu1 %v3111_v7, %s3863_s30 }
 0x28b   : > { %3285 = vst.msk [vmem:[%s5468_s23] sm:$0x1] %vm3284_vm10, %v3279_v47  ;;  %v3236_v25 = vpop.permute.xlu1 %3235  ;;  %v3004_v15 = vrot.slane %v3003_v52, 2  ;;  %v3025_v12 = vrot.slane %v3024_v59, 2  ;;  %v3011_v57 = vrot.slane %v3010_v30, 2 }
 0x28c   : > { %v5473_v50 = vsel %vm2598_vm2, %v3272_v17, %v3236_v25 }
 0x28d   : > { %3237 = vrot.lane.b32.xlu0 %v3147_v56, %s3864_s3  ;;  %v3005_v0 = vmax.f32 %v3003_v52, %v3004_v15  ;;  %v3026_v46 = vmax.f32 %v3024_v59, %v3025_v12  ;;  %v3012_v37 = vmax.f32 %v3010_v30, %v3011_v57 }
 0x28e   : > { %3213 = vrot.lane.b32.xlu1 %v3093_v21, %s3863_s30 }
 0x28f   : > { %v3006_v58 = vrot.slane %v3005_v0, 1  ;;  %v3027_v1 = vrot.slane %v3026_v46, 1  ;;  %v3013_v60 = vrot.slane %v3012_v37, 1 }
 0x291   : > { %3233 = vrot.lane.b32.xlu0 %v3133_v20, %s3864_s3  ;;  %v3007_v48 = vmax.f32 %v3005_v0, %v3006_v58  ;;  %v3028_v16 = vmax.f32 %v3026_v46, %v3027_v1  ;;  %v3014_v14 = vmax.f32 %v3012_v37, %v3013_v60  ;;  %s3867_s3 = smov [#allocation3]  }
 0x292   : > { %3257 = vrot.lane.b32.xlu1 %v3183_v36, %s3866_s5  ;;  %s3800_s4 = sshll.u32 %s3867_s3, 4  ;;  %s3801_s4 = int_to_ptr.vmem [resolvable:$false] %s3800_s4 }
 0x293   : > { %p3803_p0 = scmp.lt.s32.totalorder %s5508_s25, %s3801_s4 }
 0x295   : > { %3255 = vrot.lane.b32.xlu0 %v3176_v55, %s3866_s5  ;;  %s3802_s5 = scalar_lea.vmem %s3801_s4, 160 }
 0x296   : > { %p3804_p1 = scmp.lt.s32.totalorder %s3802_s5, %s3796_s29 }
 0x298   : > { %p3805_p2 = por %p3804_p1, %p3803_p0 }
 0x29a   : > { %p3806_p3 = pnand %p3805_p2, %p3799_p13 }
 0x2af   : > { %v3192_v43 = vpop.permute.xlu1 %3191 }
 0x2b0   : > { %v3265_v51 = vsel %vm2466_vm13, %v3007_v48, %v3192_v43 }
 0x2b3   : > { %v3252_v31 = vpop.permute.xlu0 %3251  ;;  %v3232_v2 = vpop.permute.xlu1 %3231 }
 0x2b7   : > { %v3212_v3 = vpop.permute.xlu0 %3211 }
 0x2b8   : > { %v3270_v28 = vsel %vm2532_vm15, %v3265_v51, %v3212_v3 }
 0x2b9   : > { %v3275_v40 = vsel %vm2598_vm2, %v3270_v28, %v3232_v2 }
 0x2ba   : > { %v3280_v13 = vsel %vm2664_vm6, %v3275_v40, %v3252_v31 }
 0x2bb   : > { %3286 = vst.msk [vmem:[%s5468_s23 + $0x1] sm:$0x1] %vm3284_vm10, %v3280_v13 }
 0x2f6   : > { %v3254_v19 = vpop.permute.xlu1 %3253 }
 0x2f7   : > { %v3198_v44 = vpop.permute.xlu0 %3197 }
 0x2f8   : > { %v3268_v26 = vsel %vm2466_vm13, %v3028_v16, %v3198_v44 }
 0x2fb   : > { %v3194_v6 = vpop.permute.xlu0 %3193 }
 0x2fc   : > { %v3218_v17 = vpop.permute.xlu1 %3217  ;;  %v3266_v9 = vsel %vm2466_vm13, %v3014_v14, %v3194_v6 }
 0x2fd   : > { %v3273_v38 = vsel %vm2532_vm15, %v3268_v26, %v3218_v17 }
 0x2ff   : > { %v3238_v23 = vpop.permute.xlu0 %3237 }
 0x300   : > { %v3214_v34 = vpop.permute.xlu1 %3213  ;;  %v3278_v33 = vsel %vm2598_vm2, %v3273_v38, %v3238_v23 }
 0x301   : > { %v3271_v63 = vsel %vm2532_vm15, %v3266_v9, %v3214_v34 }
 0x303   : > { %v3234_v24 = vpop.permute.xlu0 %3233 }
 0x304   : > { %v3276_v22 = vsel %vm2598_vm2, %v3271_v63, %v3234_v24  ;;  %v3258_v47 = vpop.permute.xlu1 %3257 }
 0x305   : > { %v3281_v39 = vsel %vm2664_vm6, %v3276_v22, %v3254_v19  ;;  %v3283_v53 = vsel %vm2664_vm6, %v3278_v33, %v3258_v47 }
 0x306   : > { %3287 = vst.msk [vmem:[%s5468_s23 + $0x2] sm:$0x1] %vm3284_vm10, %v3281_v39  ;;  %3289 = vst.msk [vmem:[%s5468_s23 + $0x4] sm:$0x1] %vm3284_vm10, %v3283_v53 }
 0x307   : > { %v3256_v25 = vpop.permute.xlu0 %3255 }
 0x308   : > { %v3282_v35 = vsel %vm2664_vm6, %v5473_v50, %v3256_v25 }
 0x309   : > { %3288 = vst.msk [vmem:[%s5468_s23 + $0x3] sm:$0x1] %vm3284_vm10, %v3282_v35 }
 0x30a   : > { %3809 = shalt.err (!%p3806_p3)
}
 0x30b   : > { %s3810_s6 = scalar_lea.hbm %s5513_s27, 80  ;;  %s3814_s14 = scalar_lea.hbm %s5565_s2, 160 }
 0x30c   : > { %p3811_p4 = scmp.ne.s32.totalorder %s5513_s27, %s3810_s6  ;;  %p3815_p9 = scmp.lt.s32.totalorder %s5513_s27, %s5565_s2 }
 0x30d   : > { %p3816_p10 = scmp.lt.s32.totalorder %s3814_s14, %s3810_s6 }
 0x30e   : > { %p3812_p7 = pnand %p3811_p4, %p3922_p5 }
 0x30f   : > { %p3817_p11 = por %p3816_p10, %p3815_p9 }
 0x310   : > { %p3813_p8 = pneg %p3812_p7 }
 0x312   : > { %p3818_p12 = pnand %p3817_p11, %p3813_p8 }
 0x314   : > { %3821 = shalt.err (!%p3818_p12)
}
 0x315   : > { %s3868_s21 = smov 1  }
 0x316   : > { %3606 = dma.vmem_to_hbm [thread:$0]  (%p3922_p5), %s5508_s25, 80, %s5513_s27, %s5521_s28, %s3863_s30, %s3863_s30, %s3868_s21  }
 0x317 PF: > { %p3612_p13 = scmp.ge.s32.totalorder %s3856_s12, 2  ;;  %s3319_s22 = sand.u32 1, %s3844_s9  }
 0x318   : > { %s3320_s23 = scalar_lea.sflag [#allocation4], %s3319_s22 }
 0x319   : > { %p3609_p0 = pnand %p3612_p13, %p3926_p6 }
 0x31b   : > { %p3610_p1 = pneg %p3609_p0 }
 0x31d   : > { %3839 = dma.done.wait (%p3610_p1), %s3320_s23, 80  }
 0x31e   : > { %3841 = vsyncadd (%p3610_p1), %s3320_s23, 4294967216  ;;  %p12_p2 = scmp.ge.s32.totalorder %s3909_s15, 4   ;;  %s5576_s9 = smov %s3848_s10 }
 0x31f   : > { %s5577_s10 = smov %s3852_s11  ;;  %s5578_s11 = smov %s3920_s18 }
 0x320   : > { %s5579_s12 = smov %s3909_s15  ;;  %14 = sbr.rel (!%p12_p2) target bundleno = 3 (0x3), region = 66 }
 0x325   :  { %3325 = vsyncpa [#allocation4], 1 }
 0x326   :  { %3327 = vsyncpa [#allocation4 + $0x1], 1 }

</bundles_post_ra>
